<compile_context>
chip_gen: v7x
topology: tpu7x:2x2x1
jax: 0.10.0
libtpu: 0.0.40
codegen_flags: <defaults>
</compile_context>

<pallas_src>
import functools
import math

import jax
import jax.numpy as jnp
from jax import lax
from jax.experimental import pallas as pl
from jax.experimental.pallas import tpu as pltpu


# --------------------------------------------------------------------------- #
# Kernel A: residual branch (conv3x3 -> ReLU -> conv3x3) over H-strips,
#           plus the SE global-pool partial sum accumulated across strips.
# --------------------------------------------------------------------------- #
def _conv3x3_from_pad(pad_ref, row0, out_rows, W, C, w_ref, b_ref, fuse_k):
    """3x3 'valid' conv over pad_ref[row0 : row0+out_rows+2, 0 : W+2, :].

    Weights are (9C, C) bf16 with rows ordered (ky, kx, c_in).
    Returns (out_rows * W, C) f32 = conv + bias.
    """
    if fuse_k:
        # Small C: fuse the 9 taps into ONE MXU matmul with K = 9C.
        taps = [pad_ref[row0 + ky:row0 + ky + out_rows, kx:kx + W, :]
                for ky in range(3) for kx in range(3)]
        patches = jnp.concatenate(taps, axis=2).reshape(out_rows * W, 9 * C)
        acc = jnp.dot(patches, w_ref[...], preferred_element_type=jnp.float32)
    else:
        # Large C: 9 accumulating matmuls with K = C (1x activation VMEM;
        # K=C already saturates MXU depth, and on v7x the MRB accumulates).
        acc = jnp.zeros((out_rows * W, C), jnp.float32)
        t = 0
        for ky in range(3):
            for kx in range(3):
                tap = pad_ref[row0 + ky:row0 + ky + out_rows, kx:kx + W, :]
                acc = acc + jnp.dot(tap.reshape(out_rows * W, C),
                                    w_ref[t * C:(t + 1) * C, :],
                                    preferred_element_type=jnp.float32)
                t += 1
    return acc + b_ref[...]


def _res_conv_strip_kernel(x_ref, xtop_ref, xbot_ref, w1_ref, b1_ref,
                           w2_ref, b2_ref, res_ref, pool_ref, pad_ref,
                           *, S, W, C, fuse_k):
    """One grid step == one (image, H-strip).

    x_ref    : (1, S, W, C)   bf16 strip rows [a, a+S)
    xtop/xbot: (1, 2, W, C)   bf16 halo rows [a-2, a) / [a+S, a+S+2) (clamped)
    w1/w2    : (9C, C)        bf16 3x3 conv weights, rows ordered (ky, kx, c_in)
    b1/b2    : (1, C)         f32
    res_ref  : (1, S*W, C)    bf16 residual output (flattened, lane-dense store)
    pool_ref : (1, 1, C)      f32 SE pool partial sum (accumulated across strips)
    pad_ref  : (S+4, W+2, C)  bf16 scratch, reused for conv1's AND conv2's input
    """
    s = pl.program_id(1)
    ns = pl.num_programs(1)

    # ---- phase 1: stage x (strip + 2-row halo) into the padded scratch ------
    # Direct sub-slab stores only; halo rows outside the image become zeros
    # (they are conv1 zero-padding).  Border columns are written once as zeros
    # and never touched again (conv2 reuses them).
    zero2 = jnp.zeros((2, W, C), jnp.bfloat16)
    pad_ref[0:2, 1:W + 1, :] = jnp.where(s == 0, zero2, xtop_ref[0])
    pad_ref[2:S + 2, 1:W + 1, :] = x_ref[0]
    pad_ref[S + 2:S + 4, 1:W + 1, :] = jnp.where(s == ns - 1, zero2, xbot_ref[0])
    zcol = jnp.zeros((S + 4, 1, C), jnp.bfloat16)
    pad_ref[:, 0:1, :] = zcol
    pad_ref[:, W + 1:W + 2, :] = zcol

    # ---- conv1 + ReLU over S+2 rows (strip rows plus one halo row each side) -
    h = jnp.maximum(
        _conv3x3_from_pad(pad_ref, 0, S + 2, W, C, w1_ref, b1_ref, fuse_k), 0.0)
    h = h.reshape(S + 2, W, C).astype(jnp.bfloat16)

    # ---- phase 2: reuse the SAME padded scratch for conv2's input -----------
    # (the x taps above were consumed into `h`, so overwriting is safe; border
    #  columns are still zero from phase 1).
    pad_ref[1:S + 3, 1:W + 1, :] = h
    # h rows that fall outside the image are conv2 zero-padding, not real rows.
    @pl.when(s == 0)
    def _():
        pad_ref[1:2, 1:W + 1, :] = jnp.zeros((1, W, C), jnp.bfloat16)

    @pl.when(s == ns - 1)
    def _():
        pad_ref[S + 2:S + 3, 1:W + 1, :] = jnp.zeros((1, W, C), jnp.bfloat16)

    # ---- conv2 over the S strip rows ----------------------------------------
    res = _conv3x3_from_pad(pad_ref, 1, S, W, C, w2_ref, b2_ref, fuse_k)  # (S*W, C) f32

    # ---- SE global-pool partial sum (f32 accumulator across the strip axis) --
    @pl.when(s == 0)
    def _():
        pool_ref[...] = jnp.zeros_like(pool_ref)
    pool_ref[0] += jnp.sum(res, axis=0, keepdims=True)

    # ---- residual written back flattened (2D, lane-dense store) -------------
    res_ref[0] = res.astype(res_ref.dtype)


# --------------------------------------------------------------------------- #
# Kernel B: tiny SE gate (recomputed per strip — cheaper than any cross-step
#           plumbing) + elementwise combine out = x + res * sigmoid(gate).
# --------------------------------------------------------------------------- #
def _se_combine_kernel(x_ref, res_ref, pool_ref, bs1e_ref, ws1_ref, ws2_ref,
                       bs2_ref, out_ref, *, inv_hw):
    pooled = pool_ref[0] * inv_hw                                      # (1, C) f32
    z = jnp.dot(pooled, ws1_ref[...],
                preferred_element_type=jnp.float32) + bs1e_ref[0]      # df folded in
    z = jnp.maximum(z, 0.0)
    logit = jnp.dot(z, ws2_ref[...],
                    preferred_element_type=jnp.float32) + bs2_ref[...]
    scale = 1.0 / (1.0 + jnp.exp(-logit))   # exact sigmoid: the gate scales everything
    out = x_ref[0].astype(jnp.float32) + res_ref[0].astype(jnp.float32) * scale
    out_ref[0] = out.astype(out_ref.dtype)


# --------------------------------------------------------------------------- #
# Wrapper: chip-aware strip sizing and the two pallas_calls.
# --------------------------------------------------------------------------- #
def _vmem_budget_bytes():
    kind = ""
    try:
        kind = jax.devices()[0].device_kind.lower()
    except Exception:
        pass
    if "v5" in kind or "v6" in kind:
        return 88 << 20, 100 << 20   # 128 MiB VMEM/core: big strips, deep pipeline
    if "v7" in kind:
        return 40 << 20, 56 << 20    # 64 MiB VMEM/TC: keep live set well under half
    return 24 << 20, 32 << 20        # unknown / older generation: conservative


def _estimate_live_bytes(S, W, C, fuse_k):
    bf, f32 = 2, 4
    x_blk = 2 * S * W * C * bf + 2 * 2 * 2 * W * C * bf   # dbl-buffered strip + halos
    res_blk = 2 * S * W * C * bf                          # dbl-buffered res output
    pad = (S + 4) * (W + 2) * C * bf                      # shared padded scratch
    patches = (S + 2) * W * (9 if fuse_k else 1) * C * bf
    tmp = (S + 2) * W * C * f32 + S * W * C * f32         # f32 conv results
    weights = 2 * 2 * 9 * C * C * bf
    return x_blk + res_blk + pad + patches + tmp + weights + (1 << 20)


def _pick_strip_rows(H, W, C, fuse_k, max_strip_rows=None):
    live_budget, vmem_limit = _vmem_budget_bytes()
    cands = [s for s in range(H, 0, -1) if H % s == 0 and (s % 8 == 0 or s == H)]
    if max_strip_rows is not None:
        filt = [s for s in cands if s <= max_strip_rows]
        cands = filt or [cands[-1]]
    for s in cands:
        if _estimate_live_bytes(s, W, C, fuse_k) <= live_budget:
            return s, vmem_limit
    return cands[-1], vmem_limit


def resblock2_forward_nhwc(x_nhwc, down_factor, params, max_strip_rows=None):
    """NHWC core path. Returns the bf16 NHWC output (bf16 per perf review)."""
    N, H, W, C = x_nhwc.shape
    Cr = params["ws1"].shape[1]
    fuse_k = C < 128                       # fused K=9C im2col only while C is small
    S, vmem_limit = _pick_strip_rows(H, W, C, fuse_k, max_strip_rows)
    n_strips = H // S
    half = S // 2
    n_hblk = max(H // 2 - 1, 0)

    # bf16 MXU operands; biases / SE weights stay f32 (tiny).
    x_bf16 = x_nhwc.astype(jnp.bfloat16)
    w1p = params["w1"].reshape(9 * C, C).astype(jnp.bfloat16)   # rows = (ky, kx, cin)
    w2p = params["w2"].reshape(9 * C, C).astype(jnp.bfloat16)
    b1 = params["b1"].astype(jnp.float32).reshape(1, C)
    b2 = params["b2"].astype(jnp.float32).reshape(1, C)
    ws1 = params["ws1"].astype(jnp.float32)                     # (C+2, Cr)
    ws1_main = ws1[:C, :]
    ws2 = params["ws2"].astype(jnp.float32)
    bs2 = params["bs2"].astype(jnp.float32).reshape(1, C)
    # fold down_factor's SE contribution into a per-sample effective bias
    df = down_factor.reshape(N, 2).astype(jnp.float32)
    bs1_eff = (df @ ws1[C:C + 2, :]
               + params["bs1"].astype(jnp.float32).reshape(1, Cr)).reshape(N, 1, Cr)

    # ----------------- pass 1: residual convs + SE pool partial sums ---------
    # TODO(synk): with N == 1 on v7x one TensorCore idles; a strip-parallel
    #             restructuring with a cross-TC pool reduction would fix that.
    conv_kernel = functools.partial(_res_conv_strip_kernel,
                                    S=S, W=W, C=C, fuse_k=fuse_k)
    flops_a = 2 * 2 * N * H * W * 9 * C * C
    bytes_a = 3 * N * H * W * C * 2 + N * C * 4
    res_flat, pool_sum = pl.pallas_call(
        conv_kernel,
        out_shape=(jax.ShapeDtypeStruct((N, H * W, C), jnp.bfloat16),
                   jax.ShapeDtypeStruct((N, 1, C), jnp.float32)),
        grid=(N, n_strips),
        in_specs=[
            pl.BlockSpec((1, S, W, C), lambda n, s: (n, s, 0, 0)),          # x strip
            pl.BlockSpec((1, 2, W, C),                                       # top halo
                         lambda n, s: (n, jnp.maximum(s * half - 1, 0), 0, 0)),
            pl.BlockSpec((1, 2, W, C),                                       # bottom halo
                         lambda n, s: (n, jnp.minimum((s + 1) * half, n_hblk), 0, 0)),
            pl.BlockSpec((9 * C, C), lambda n, s: (0, 0)),                   # w1 packed
            pl.BlockSpec((1, C), lambda n, s: (0, 0)),                       # b1
            pl.BlockSpec((9 * C, C), lambda n, s: (0, 0)),                   # w2 packed
            pl.BlockSpec((1, C), lambda n, s: (0, 0)),                       # b2
        ],
        out_specs=(pl.BlockSpec((1, S * W, C), lambda n, s: (n, s, 0)),      # res (flat)
                   pl.BlockSpec((1, 1, C), lambda n, s: (n, 0, 0))),         # pool sum
        scratch_shapes=[pltpu.VMEM((S + 4, W + 2, C), jnp.bfloat16)],        # shared pad
        compiler_params=pltpu.CompilerParams(
            dimension_semantics=("parallel", "arbitrary"),
            vmem_limit_bytes=vmem_limit),
        cost_estimate=pl.CostEstimate(flops=flops_a, transcendentals=0,
                                      bytes_accessed=bytes_a),
    )(x_bf16, x_bf16, x_bf16, w1p, b1, w2p, b2)

    # ----------------- pass 2: SE gate + combine (flattened, elementwise) ----
    x_flat = x_bf16.reshape(N, H * W, C)        # contiguous reshape: free
    T = S * W
    comb_kernel = functools.partial(_se_combine_kernel, inv_hw=1.0 / float(H * W))
    flops_b = 4 * N * H * W * C
    bytes_b = 3 * N * H * W * C * 2
    out_flat = pl.pallas_call(
        comb_kernel,
        out_shape=jax.ShapeDtypeStruct((N, H * W, C), jnp.bfloat16),
        grid=(N, n_strips),
        in_specs=[
            pl.BlockSpec((1, T, C), lambda n, s: (n, s, 0)),     # x (flat)
            pl.BlockSpec((1, T, C), lambda n, s: (n, s, 0)),     # res (flat)
            pl.BlockSpec((1, 1, C), lambda n, s: (n, 0, 0)),     # pool sum
            pl.BlockSpec((1, 1, Cr), lambda n, s: (n, 0, 0)),    # bs1_eff (df folded)
            pl.BlockSpec((C, Cr), lambda n, s: (0, 0)),          # ws1[:C]
            pl.BlockSpec((Cr, C), lambda n, s: (0, 0)),          # ws2
            pl.BlockSpec((1, C), lambda n, s: (0, 0)),           # bs2
        ],
        out_specs=pl.BlockSpec((1, T, C), lambda n, s: (n, s, 0)),
        compiler_params=pltpu.CompilerParams(
            dimension_semantics=("parallel", "parallel"),
            vmem_limit_bytes=vmem_limit),
        cost_estimate=pl.CostEstimate(flops=flops_b,
                                      transcendentals=N * n_strips * C,
                                      bytes_accessed=bytes_b),
    )(x_flat, res_flat, pool_sum, bs1_eff, ws1_main, ws2, bs2)

    return out_flat.reshape(N, H, W, C)


def resblock2_forward(x_nchw, down_factor, params, max_strip_rows=None):
    """NCHW interface matching the PyTorch module. Returns (out, down_factor).

    NCHW<->NHWC transposes are interface glue only; an NHWC end-to-end model
    should call resblock2_forward_nhwc directly. Output is bf16 (per review).
    """
    x_nhwc = jnp.transpose(x_nchw, (0, 2, 3, 1))
    out_nhwc = resblock2_forward_nhwc(x_nhwc, down_factor, params, max_strip_rows)
    return jnp.transpose(out_nhwc, (0, 3, 1, 2)), down_factor


# --------------------------------------------------------------------------- #
# Parameters and pure-JAX reference.
# --------------------------------------------------------------------------- #
def init_params(key, C, r):
    """Deterministic synthetic parameters (PyTorch-default-style uniform init)."""
    Cr = max(C // r, 1)
    k = jax.random.split(key, 8)

    def u(kk, shape, fan_in):
        bound = 1.0 / math.sqrt(fan_in)
        return jax.random.uniform(kk, shape, jnp.float32, -bound, bound)

    return dict(
        w1=u(k[0], (3, 3, C, C), 9 * C),   # HWIO
        b1=u(k[1], (1, C), 9 * C),
        w2=u(k[2], (3, 3, C, C), 9 * C),
        b2=u(k[3], (1, C), 9 * C),
        ws1=u(k[4], (C + 2, Cr), C + 2),   # SE conv1x1 #1 as (in, out) matrix
        bs1=u(k[5], (1, Cr), C + 2),
        ws2=u(k[6], (Cr, C), Cr),          # SE conv1x1 #2
        bs2=u(k[7], (1, C), Cr),
    )


def resblock2_reference(x_nchw, down_factor, params):
    """Pure-JAX (f32) reference for correctness checking."""
    x = jnp.transpose(x_nchw, (0, 2, 3, 1)).astype(jnp.float32)
    dn = ("NHWC", "HWIO", "NHWC")
    h = lax.conv_general_dilated(x, params["w1"], (1, 1), "SAME",
                                 dimension_numbers=dn) + params["b1"]
    h = jnp.maximum(h, 0.0)
    res = lax.conv_general_dilated(h, params["w2"], (1, 1), "SAME",
                                   dimension_numbers=dn) + params["b2"]
    pooled = jnp.mean(res, axis=(1, 2))                        # (N, C)
    df = down_factor.reshape(down_factor.shape[0], 2).astype(jnp.float32)
    feat = jnp.concatenate([pooled, df], axis=1)               # (N, C+2)
    z = jnp.maximum(feat @ params["ws1"] + params["bs1"], 0.0)
    s = jax.nn.sigmoid(z @ params["ws2"] + params["bs2"])      # (N, C)
    out = x + res * s[:, None, None, :]
    return jnp.transpose(out, (0, 3, 1, 2)), down_factor


if __name__ == "__main__":
    N, C, H, W, r = 2, 4, 16, 16, 2

    key = jax.random.PRNGKey(0)
    kx, kd, kp = jax.random.split(key, 3)
    x = jax.random.normal(kx, (N, C, H, W), jnp.float32)
    down_factor = jax.random.uniform(kd, (N, 2, 1, 1), jnp.float32)
    params = init_params(kp, C, r)

    # Pre-quantize x and the conv weights to bf16-representable values so the
    # f32 reference sees the same operands the bf16 MXU path consumes.
    q = lambda a: a.astype(jnp.bfloat16).astype(jnp.float32)
    x = q(x)
    params = dict(params, w1=q(params["w1"]), w2=q(params["w2"]))

    # max_strip_rows=8 forces two H-strips per image so the halo handling and
    # the cross-strip SE-pool accumulation are exercised even at this toy size.
    out, df_out = resblock2_forward(x, down_factor, params, max_strip_rows=8)
    out = jax.block_until_ready(out)

    ref_out, _ = resblock2_reference(x, down_factor, params)
    assert out.shape == (N, C, H, W)
    assert df_out.shape == down_factor.shape
    max_err = float(jnp.max(jnp.abs(out.astype(jnp.float32) - ref_out)))
    # bf16 output + bf16 intermediates (ReLU(conv1), res) vs. an f32 reference:
    # worst-case rounding at these magnitudes is ~1e-2, so 5e-2 is a safe bound
    # that still catches structural errors.
    assert max_err < 5e-2, f"kernel/reference mismatch, max abs err = {max_err}"

    print("KERNEL_OK")
</pallas_src>

<mosaic_0001>
module attributes {stable_mosaic.version = 11 : i64} {
  func.func @_res_conv_strip_kernel(%arg0: i32, %arg1: i32, %arg2: memref<1x8x16x4xbf16, #tpu.memory_space<vmem>>, %arg3: memref<1x2x16x4xbf16, #tpu.memory_space<vmem>>, %arg4: memref<1x2x16x4xbf16, #tpu.memory_space<vmem>>, %arg5: memref<36x4xbf16, #tpu.memory_space<vmem>>, %arg6: memref<1x4xf32, #tpu.memory_space<vmem>>, %arg7: memref<36x4xbf16, #tpu.memory_space<vmem>>, %arg8: memref<1x4xf32, #tpu.memory_space<vmem>>, %arg9: memref<1x128x4xbf16, #tpu.memory_space<vmem>>, %arg10: memref<1x1x4xf32, #tpu.memory_space<vmem>>, %arg11: memref<12x18x4xbf16, #tpu.memory_space<vmem>>) attributes {dimension_semantics = [#tpu.dimension_semantics<parallel>, #tpu.dimension_semantics<arbitrary>], iteration_bounds = array<i64: 2, 2>, scalar_prefetch = 0 : i64, scratch_operands = 1 : i64, tpu.core_type = #tpu.core_type<tc>, window_params = [{transform_indices = @transform_0, window_bounds = array<i64: 1, 8, 16, 4>}, {transform_indices = @transform_1, window_bounds = array<i64: 1, 2, 16, 4>}, {transform_indices = @transform_2, window_bounds = array<i64: 1, 2, 16, 4>}, {pipeline_mode = #tpu.pipeline_mode<synchronous>, transform_indices = @transform_3, window_bounds = array<i64: 36, 4>}, {pipeline_mode = #tpu.pipeline_mode<synchronous>, transform_indices = @transform_4, window_bounds = array<i64: 1, 4>}, {pipeline_mode = #tpu.pipeline_mode<synchronous>, transform_indices = @transform_5, window_bounds = array<i64: 36, 4>}, {pipeline_mode = #tpu.pipeline_mode<synchronous>, transform_indices = @transform_6, window_bounds = array<i64: 1, 4>}, {transform_indices = @transform_7, window_bounds = array<i64: 1, 128, 4>}, {transform_indices = @transform_8, window_bounds = array<i64: 1, 1, 4>}]} {
    %cst = arith.constant 0.000000e+00 : bf16
    %0 = vector.broadcast %cst : bf16 to vector<2x16x4xbf16>
    %c0_i32 = arith.constant 0 : i32
    %1 = arith.cmpi eq, %arg1, %c0_i32 : i32
    %c0 = arith.constant 0 : index
    %c0_0 = arith.constant 0 : index
    %c0_1 = arith.constant 0 : index
    %c0_2 = arith.constant 0 : index
    %2 = vector.load %arg3[%c0, %c0_0, %c0_1, %c0_2] : memref<1x2x16x4xbf16, #tpu.memory_space<vmem>>, vector<1x2x16x4xbf16>
    %3 = vector.shape_cast %2 : vector<1x2x16x4xbf16> to vector<2x16x4xbf16>
    %4 = arith.select %1, %0, %3 : vector<2x16x4xbf16>
    %c0_3 = arith.constant 0 : index
    %c1 = arith.constant 1 : index
    %c0_4 = arith.constant 0 : index
    %5 = vector.load %arg11[%c0_3, %c1, %c0_4] : memref<12x18x4xbf16, #tpu.memory_space<vmem>>, vector<2x16x4xbf16>
    tpu.vector_store %arg11[%c0_3, %c1, %c0_4], %4 {strides = array<i32>} : memref<12x18x4xbf16, #tpu.memory_space<vmem>>, vector<2x16x4xbf16>,
    %c0_5 = arith.constant 0 : index
    %c0_6 = arith.constant 0 : index
    %c0_7 = arith.constant 0 : index
    %c0_8 = arith.constant 0 : index
    %6 = vector.load %arg2[%c0_5, %c0_6, %c0_7, %c0_8] : memref<1x8x16x4xbf16, #tpu.memory_space<vmem>>, vector<1x8x16x4xbf16>
    %7 = vector.shape_cast %6 : vector<1x8x16x4xbf16> to vector<8x16x4xbf16>
    %c2 = arith.constant 2 : index
    %c1_9 = arith.constant 1 : index
    %c0_10 = arith.constant 0 : index
    %8 = vector.load %arg11[%c2, %c1_9, %c0_10] : memref<12x18x4xbf16, #tpu.memory_space<vmem>>, vector<8x16x4xbf16>
    tpu.vector_store %arg11[%c2, %c1_9, %c0_10], %7 {strides = array<i32>} : memref<12x18x4xbf16, #tpu.memory_space<vmem>>, vector<8x16x4xbf16>,
    %c1_i32 = arith.constant 1 : i32
    %9 = arith.cmpi eq, %arg1, %c1_i32 : i32
    %c0_11 = arith.constant 0 : index
    %c0_12 = arith.constant 0 : index
    %c0_13 = arith.constant 0 : index
    %c0_14 = arith.constant 0 : index
    %10 = vector.load %arg4[%c0_11, %c0_12, %c0_13, %c0_14] : memref<1x2x16x4xbf16, #tpu.memory_space<vmem>>, vector<1x2x16x4xbf16>
    %11 = vector.shape_cast %10 : vector<1x2x16x4xbf16> to vector<2x16x4xbf16>
    %12 = arith.select %9, %0, %11 : vector<2x16x4xbf16>
    %c10 = arith.constant 10 : index
    %c1_15 = arith.constant 1 : index
    %c0_16 = arith.constant 0 : index
    %13 = vector.load %arg11[%c10, %c1_15, %c0_16] : memref<12x18x4xbf16, #tpu.memory_space<vmem>>, vector<2x16x4xbf16>
    tpu.vector_store %arg11[%c10, %c1_15, %c0_16], %12 {strides = array<i32>} : memref<12x18x4xbf16, #tpu.memory_space<vmem>>, vector<2x16x4xbf16>,
    %cst_17 = arith.constant 0.000000e+00 : bf16
    %14 = vector.broadcast %cst_17 : bf16 to vector<12x1x4xbf16>
    %c0_18 = arith.constant 0 : index
    %c0_19 = arith.constant 0 : index
    %c0_20 = arith.constant 0 : index
    %15 = vector.load %arg11[%c0_18, %c0_19, %c0_20] : memref<12x18x4xbf16, #tpu.memory_space<vmem>>, vector<12x1x4xbf16>
    tpu.vector_store %arg11[%c0_18, %c0_19, %c0_20], %14 {strides = array<i32>} : memref<12x18x4xbf16, #tpu.memory_space<vmem>>, vector<12x1x4xbf16>,
    %c0_21 = arith.constant 0 : index
    %c17 = arith.constant 17 : index
    %c0_22 = arith.constant 0 : index
    %16 = vector.load %arg11[%c0_21, %c17, %c0_22] : memref<12x18x4xbf16, #tpu.memory_space<vmem>>, vector<12x1x4xbf16>
    tpu.vector_store %arg11[%c0_21, %c17, %c0_22], %14 {strides = array<i32>} : memref<12x18x4xbf16, #tpu.memory_space<vmem>>, vector<12x1x4xbf16>,
    %c0_23 = arith.constant 0 : index
    %c0_24 = arith.constant 0 : index
    %c0_25 = arith.constant 0 : index
    %17 = vector.load %arg11[%c0_23, %c0_24, %c0_25] : memref<12x18x4xbf16, #tpu.memory_space<vmem>>, vector<10x16x4xbf16>
    %c0_26 = arith.constant 0 : index
    %c1_27 = arith.constant 1 : index
    %c0_28 = arith.constant 0 : index
    %18 = vector.load %arg11[%c0_26, %c1_27, %c0_28] : memref<12x18x4xbf16, #tpu.memory_space<vmem>>, vector<10x16x4xbf16>
    %c0_29 = arith.constant 0 : index
    %c2_30 = arith.constant 2 : index
    %c0_31 = arith.constant 0 : index
    %19 = vector.load %arg11[%c0_29, %c2_30, %c0_31] : memref<12x18x4xbf16, #tpu.memory_space<vmem>>, vector<10x16x4xbf16>
    %c1_32 = arith.constant 1 : index
    %c0_33 = arith.constant 0 : index
    %c0_34 = arith.constant 0 : index
    %20 = vector.load %arg11[%c1_32, %c0_33, %c0_34] : memref<12x18x4xbf16, #tpu.memory_space<vmem>>, vector<10x16x4xbf16>
    %c1_35 = arith.constant 1 : index
    %c1_36 = arith.constant 1 : index
    %c0_37 = arith.constant 0 : index
    %21 = vector.load %arg11[%c1_35, %c1_36, %c0_37] : memref<12x18x4xbf16, #tpu.memory_space<vmem>>, vector<10x16x4xbf16>
    %c1_38 = arith.constant 1 : index
    %c2_39 = arith.constant 2 : index
    %c0_40 = arith.constant 0 : index
    %22 = vector.load %arg11[%c1_38, %c2_39, %c0_40] : memref<12x18x4xbf16, #tpu.memory_space<vmem>>, vector<10x16x4xbf16>
    %c2_41 = arith.constant 2 : index
    %c0_42 = arith.constant 0 : index
    %c0_43 = arith.constant 0 : index
    %23 = vector.load %arg11[%c2_41, %c0_42, %c0_43] : memref<12x18x4xbf16, #tpu.memory_space<vmem>>, vector<10x16x4xbf16>
    %c2_44 = arith.constant 2 : index
    %c1_45 = arith.constant 1 : index
    %c0_46 = arith.constant 0 : index
    %24 = vector.load %arg11[%c2_44, %c1_45, %c0_46] : memref<12x18x4xbf16, #tpu.memory_space<vmem>>, vector<10x16x4xbf16>
    %c2_47 = arith.constant 2 : index
    %c2_48 = arith.constant 2 : index
    %c0_49 = arith.constant 0 : index
    %25 = vector.load %arg11[%c2_47, %c2_48, %c0_49] : memref<12x18x4xbf16, #tpu.memory_space<vmem>>, vector<10x16x4xbf16>
    %26 = tpu.concatenate %17, %18, %19, %20, %21, %22, %23, %24, %25 in 2 : vector<10x16x4xbf16>, vector<10x16x4xbf16>, vector<10x16x4xbf16>, vector<10x16x4xbf16>, vector<10x16x4xbf16>, vector<10x16x4xbf16>, vector<10x16x4xbf16>, vector<10x16x4xbf16>, vector<10x16x4xbf16> -> vector<10x16x36xbf16>
    %27 = vector.shape_cast %26 : vector<10x16x36xbf16> to vector<160x36xbf16>
    %c0_50 = arith.constant 0 : index
    %c0_51 = arith.constant 0 : index
    %28 = vector.load %arg5[%c0_50, %c0_51] : memref<36x4xbf16, #tpu.memory_space<vmem>>, vector<36x4xbf16>
    %cst_52 = arith.constant dense<0.000000e+00> : vector<160x4xf32>
    %29 = tpu.matmul %27, %28, %cst_52 {dimension_numbers = #tpu.dot_dimension_numbers<[1], [0], [0], [1], [0, 0, 1, 1], [], []>} : vector<160x36xbf16>, vector<36x4xbf16>, vector<160x4xf32> -> vector<160x4xf32>
    %c0_53 = arith.constant 0 : index
    %c0_54 = arith.constant 0 : index
    %30 = vector.load %arg6[%c0_53, %c0_54] : memref<1x4xf32, #tpu.memory_space<vmem>>, vector<1x4xf32>
    %31 = vector.broadcast %30 : vector<1x4xf32> to vector<160x4xf32>
    %32 = arith.addf %29, %31 : vector<160x4xf32>
    %cst_55 = arith.constant 0.000000e+00 : f32
    %33 = vector.broadcast %cst_55 : f32 to vector<160x4xf32>
    %34 = arith.maximumf %32, %33 : vector<160x4xf32>
    %35 = vector.shape_cast %34 : vector<160x4xf32> to vector<10x16x4xf32>
    %36 = arith.truncf %35 : vector<10x16x4xf32> to vector<10x16x4xbf16>
    %c1_56 = arith.constant 1 : index
    %c1_57 = arith.constant 1 : index
    %c0_58 = arith.constant 0 : index
    %37 = vector.load %arg11[%c1_56, %c1_57, %c0_58] : memref<12x18x4xbf16, #tpu.memory_space<vmem>>, vector<10x16x4xbf16>
    tpu.vector_store %arg11[%c1_56, %c1_57, %c0_58], %36 {strides = array<i32>} : memref<12x18x4xbf16, #tpu.memory_space<vmem>>, vector<10x16x4xbf16>,
    %c0_i32_59 = arith.constant 0 : i32
    %38 = arith.cmpi eq, %arg1, %c0_i32_59 : i32
    %39 = arith.extui %38 : i1 to i32
    %c0_i32_60 = arith.constant 0 : i32
    %40 = arith.cmpi ne, %39, %c0_i32_60 : i32
    scf.if %40 {
      %cst_106 = arith.constant 0.000000e+00 : bf16
      %75 = vector.broadcast %cst_106 : bf16 to vector<1x16x4xbf16>
      %c1_107 = arith.constant 1 : index
      %c1_108 = arith.constant 1 : index
      %c0_109 = arith.constant 0 : index
      %76 = vector.load %arg11[%c1_107, %c1_108, %c0_109] : memref<12x18x4xbf16, #tpu.memory_space<vmem>>, vector<1x16x4xbf16>
      tpu.vector_store %arg11[%c1_107, %c1_108, %c0_109], %75 {strides = array<i32>} : memref<12x18x4xbf16, #tpu.memory_space<vmem>>, vector<1x16x4xbf16>,
    } else {
    }
    %c1_i32_61 = arith.constant 1 : i32
    %41 = arith.cmpi eq, %arg1, %c1_i32_61 : i32
    %42 = arith.extui %41 : i1 to i32
    %c0_i32_62 = arith.constant 0 : i32
    %43 = arith.cmpi ne, %42, %c0_i32_62 : i32
    scf.if %43 {
      %cst_106 = arith.constant 0.000000e+00 : bf16
      %75 = vector.broadcast %cst_106 : bf16 to vector<1x16x4xbf16>
      %c10_107 = arith.constant 10 : index
      %c1_108 = arith.constant 1 : index
      %c0_109 = arith.constant 0 : index
      %76 = vector.load %arg11[%c10_107, %c1_108, %c0_109] : memref<12x18x4xbf16, #tpu.memory_space<vmem>>, vector<1x16x4xbf16>
      tpu.vector_store %arg11[%c10_107, %c1_108, %c0_109], %75 {strides = array<i32>} : memref<12x18x4xbf16, #tpu.memory_space<vmem>>, vector<1x16x4xbf16>,
    } else {
    }
    %c1_63 = arith.constant 1 : index
    %c0_64 = arith.constant 0 : index
    %c0_65 = arith.constant 0 : index
    %44 = vector.load %arg11[%c1_63, %c0_64, %c0_65] : memref<12x18x4xbf16, #tpu.memory_space<vmem>>, vector<8x16x4xbf16>
    %c1_66 = arith.constant 1 : index
    %c1_67 = arith.constant 1 : index
    %c0_68 = arith.constant 0 : index
    %45 = vector.load %arg11[%c1_66, %c1_67, %c0_68] : memref<12x18x4xbf16, #tpu.memory_space<vmem>>, vector<8x16x4xbf16>
    %c1_69 = arith.constant 1 : index
    %c2_70 = arith.constant 2 : index
    %c0_71 = arith.constant 0 : index
    %46 = vector.load %arg11[%c1_69, %c2_70, %c0_71] : memref<12x18x4xbf16, #tpu.memory_space<vmem>>, vector<8x16x4xbf16>
    %c2_72 = arith.constant 2 : index
    %c0_73 = arith.constant 0 : index
    %c0_74 = arith.constant 0 : index
    %47 = vector.load %arg11[%c2_72, %c0_73, %c0_74] : memref<12x18x4xbf16, #tpu.memory_space<vmem>>, vector<8x16x4xbf16>
    %c2_75 = arith.constant 2 : index
    %c1_76 = arith.constant 1 : index
    %c0_77 = arith.constant 0 : index
    %48 = vector.load %arg11[%c2_75, %c1_76, %c0_77] : memref<12x18x4xbf16, #tpu.memory_space<vmem>>, vector<8x16x4xbf16>
    %c2_78 = arith.constant 2 : index
    %c2_79 = arith.constant 2 : index
    %c0_80 = arith.constant 0 : index
    %49 = vector.load %arg11[%c2_78, %c2_79, %c0_80] : memref<12x18x4xbf16, #tpu.memory_space<vmem>>, vector<8x16x4xbf16>
    %c3 = arith.constant 3 : index
    %c0_81 = arith.constant 0 : index
    %c0_82 = arith.constant 0 : index
    %50 = vector.load %arg11[%c3, %c0_81, %c0_82] : memref<12x18x4xbf16, #tpu.memory_space<vmem>>, vector<8x16x4xbf16>
    %c3_83 = arith.constant 3 : index
    %c1_84 = arith.constant 1 : index
    %c0_85 = arith.constant 0 : index
    %51 = vector.load %arg11[%c3_83, %c1_84, %c0_85] : memref<12x18x4xbf16, #tpu.memory_space<vmem>>, vector<8x16x4xbf16>
    %c3_86 = arith.constant 3 : index
    %c2_87 = arith.constant 2 : index
    %c0_88 = arith.constant 0 : index
    %52 = vector.load %arg11[%c3_86, %c2_87, %c0_88] : memref<12x18x4xbf16, #tpu.memory_space<vmem>>, vector<8x16x4xbf16>
    %53 = tpu.concatenate %44, %45, %46, %47, %48, %49, %50, %51, %52 in 2 : vector<8x16x4xbf16>, vector<8x16x4xbf16>, vector<8x16x4xbf16>, vector<8x16x4xbf16>, vector<8x16x4xbf16>, vector<8x16x4xbf16>, vector<8x16x4xbf16>, vector<8x16x4xbf16>, vector<8x16x4xbf16> -> vector<8x16x36xbf16>
    %54 = vector.shape_cast %53 : vector<8x16x36xbf16> to vector<128x36xbf16>
    %c0_89 = arith.constant 0 : index
    %c0_90 = arith.constant 0 : index
    %55 = vector.load %arg7[%c0_89, %c0_90] : memref<36x4xbf16, #tpu.memory_space<vmem>>, vector<36x4xbf16>
    %cst_91 = arith.constant dense<0.000000e+00> : vector<128x4xf32>
    %56 = tpu.matmul %54, %55, %cst_91 {dimension_numbers = #tpu.dot_dimension_numbers<[1], [0], [0], [1], [0, 0, 1, 1], [], []>} : vector<128x36xbf16>, vector<36x4xbf16>, vector<128x4xf32> -> vector<128x4xf32>
    %c0_92 = arith.constant 0 : index
    %c0_93 = arith.constant 0 : index
    %57 = vector.load %arg8[%c0_92, %c0_93] : memref<1x4xf32, #tpu.memory_space<vmem>>, vector<1x4xf32>
    %58 = vector.broadcast %57 : vector<1x4xf32> to vector<128x4xf32>
    %59 = arith.addf %56, %58 : vector<128x4xf32>
    %c0_i32_94 = arith.constant 0 : i32
    %60 = arith.cmpi eq, %arg1, %c0_i32_94 : i32
    %61 = arith.extui %60 : i1 to i32
    %c0_i32_95 = arith.constant 0 : i32
    %62 = arith.cmpi ne, %61, %c0_i32_95 : i32
    scf.if %62 {
      %cst_106 = arith.constant 0.000000e+00 : f32
      %75 = vector.broadcast %cst_106 : f32 to vector<1x1x4xf32>
      %c0_107 = arith.constant 0 : index
      %c0_108 = arith.constant 0 : index
      %c0_109 = arith.constant 0 : index
      %76 = vector.load %arg10[%c0_107, %c0_108, %c0_109] : memref<1x1x4xf32, #tpu.memory_space<vmem>>, vector<1x1x4xf32>
      tpu.vector_store %arg10[%c0_107, %c0_108, %c0_109], %75 {strides = array<i32>} : memref<1x1x4xf32, #tpu.memory_space<vmem>>, vector<1x1x4xf32>,
    } else {
    }
    %c0_96 = arith.constant 0 : index
    %c0_97 = arith.constant 0 : index
    %c0_98 = arith.constant 0 : index
    %63 = vector.load %arg10[%c0_96, %c0_97, %c0_98] : memref<1x1x4xf32, #tpu.memory_space<vmem>>, vector<1x1x4xf32>
    %64 = vector.shape_cast %63 : vector<1x1x4xf32> to vector<1x4xf32>
    %cst_99 = arith.constant dense<0.000000e+00> : vector<4xf32>
    %65 = vector.multi_reduction <add>, %59, %cst_99 [0] : vector<128x4xf32> to vector<4xf32>
    %66 = vector.shape_cast %65 : vector<4xf32> to vector<1x4xf32>
    %67 = arith.addf %64, %66 : vector<1x4xf32>
    %c0_100 = arith.constant 0 : index
    %c0_101 = arith.constant 0 : index
    %c0_102 = arith.constant 0 : index
    %68 = vector.load %arg10[%c0_100, %c0_101, %c0_102] : memref<1x1x4xf32, #tpu.memory_space<vmem>>, vector<1x1x4xf32>
    %69 = vector.shape_cast %68 : vector<1x1x4xf32> to vector<1x4xf32>
    %70 = vector.shape_cast %67 : vector<1x4xf32> to vector<1x1x4xf32>
    tpu.vector_store %arg10[%c0_100, %c0_101, %c0_102], %70 {strides = array<i32>} : memref<1x1x4xf32, #tpu.memory_space<vmem>>, vector<1x1x4xf32>,
    %71 = arith.truncf %59 : vector<128x4xf32> to vector<128x4xbf16>
    %c0_103 = arith.constant 0 : index
    %c0_104 = arith.constant 0 : index
    %c0_105 = arith.constant 0 : index
    %72 = vector.load %arg9[%c0_103, %c0_104, %c0_105] : memref<1x128x4xbf16, #tpu.memory_space<vmem>>, vector<1x128x4xbf16>
    %73 = vector.shape_cast %72 : vector<1x128x4xbf16> to vector<128x4xbf16>
    %74 = vector.shape_cast %71 : vector<128x4xbf16> to vector<1x128x4xbf16>
    tpu.vector_store %arg9[%c0_103, %c0_104, %c0_105], %74 {strides = array<i32>} : memref<1x128x4xbf16, #tpu.memory_space<vmem>>, vector<1x128x4xbf16>,
    return
  }
  func.func @transform_0(%arg0: i32, %arg1: i32) -> (i32, i32, i32, i32) {
    %c0_i32 = arith.constant 0 : i32
    %c0_i32_0 = arith.constant 0 : i32
    %c0_i32_1 = arith.constant 0 : i32
    return %arg0, %arg1, %c0_i32, %c0_i32_0 : i32, i32, i32, i32
  }
  func.func @transform_1(%arg0: i32, %arg1: i32) -> (i32, i32, i32, i32) {
    %c4_i32 = arith.constant 4 : i32
    %0 = arith.muli %arg1, %c4_i32 : i32
    %c1_i32 = arith.constant 1 : i32
    %1 = arith.subi %0, %c1_i32 : i32
    %c0_i32 = arith.constant 0 : i32
    %2 = arith.maxsi %1, %c0_i32 : i32
    %c0_i32_0 = arith.constant 0 : i32
    %c0_i32_1 = arith.constant 0 : i32
    %c0_i32_2 = arith.constant 0 : i32
    return %arg0, %2, %c0_i32_0, %c0_i32_1 : i32, i32, i32, i32
  }
  func.func @transform_2(%arg0: i32, %arg1: i32) -> (i32, i32, i32, i32) {
    %c1_i32 = arith.constant 1 : i32
    %0 = arith.addi %arg1, %c1_i32 : i32
    %c4_i32 = arith.constant 4 : i32
    %1 = arith.muli %0, %c4_i32 : i32
    %c7_i32 = arith.constant 7 : i32
    %2 = arith.minsi %1, %c7_i32 : i32
    %c0_i32 = arith.constant 0 : i32
    %c0_i32_0 = arith.constant 0 : i32
    %c0_i32_1 = arith.constant 0 : i32
    return %arg0, %2, %c0_i32, %c0_i32_0 : i32, i32, i32, i32
  }
  func.func @transform_3(%arg0: i32, %arg1: i32) -> (i32, i32) {
    %c0_i32 = arith.constant 0 : i32
    %c0_i32_0 = arith.constant 0 : i32
    %c0_i32_1 = arith.constant 0 : i32
    return %c0_i32, %c0_i32_0 : i32, i32
  }
  func.func @transform_4(%arg0: i32, %arg1: i32) -> (i32, i32) {
    %c0_i32 = arith.constant 0 : i32
    %c0_i32_0 = arith.constant 0 : i32
    %c0_i32_1 = arith.constant 0 : i32
    return %c0_i32, %c0_i32_0 : i32, i32
  }
  func.func @transform_5(%arg0: i32, %arg1: i32) -> (i32, i32) {
    %c0_i32 = arith.constant 0 : i32
    %c0_i32_0 = arith.constant 0 : i32
    %c0_i32_1 = arith.constant 0 : i32
    return %c0_i32, %c0_i32_0 : i32, i32
  }
  func.func @transform_6(%arg0: i32, %arg1: i32) -> (i32, i32) {
    %c0_i32 = arith.constant 0 : i32
    %c0_i32_0 = arith.constant 0 : i32
    %c0_i32_1 = arith.constant 0 : i32
    return %c0_i32, %c0_i32_0 : i32, i32
  }
  func.func @transform_7(%arg0: i32, %arg1: i32) -> (i32, i32, i32) {
    %c0_i32 = arith.constant 0 : i32
    %c0_i32_0 = arith.constant 0 : i32
    return %arg0, %arg1, %c0_i32 : i32, i32, i32
  }
  func.func @transform_8(%arg0: i32, %arg1: i32) -> (i32, i32, i32) {
    %c0_i32 = arith.constant 0 : i32
    %c0_i32_0 = arith.constant 0 : i32
    %c0_i32_1 = arith.constant 0 : i32
    return %arg0, %c0_i32, %c0_i32_0 : i32, i32, i32
  }
}

</mosaic_0001>

<bundles_post_ra>
// kernel: tpu_custom_call.1
= control target key start
LH: loop header
LB: loop body
LE: loop exit
PB: predicated region body
PF: predicated region fallthrough
CT: control target
= control target key end

     0   :  { %s6473_s0 = inlined_call_operand.vmem [shape: bf16[2,16,16,4], index: 0, kind: input, shape index: {}]   ;;  %s6474_s1 = inlined_call_operand.vmem [shape: bf16[2,16,16,4], index: 1, kind: input, shape index: {}]   ;;  %s6475_s2 = inlined_call_operand.vmem [shape: bf16[2,16,16,4], index: 2, kind: input, shape index: {}]   ;;  %s6476_s3 = inlined_call_operand.vmem [shape: bf16[36,4], index: 3, kind: input, shape index: {}]   ;;  %s6477_s4 = inlined_call_operand.vmem [shape: f32[1,4], index: 4, kind: input, shape index: {}]   ;;  %s6478_s5 = inlined_call_operand.vmem [shape: bf16[36,4], index: 5, kind: input, shape index: {}]   ;;  %s6479_s6 = inlined_call_operand.vmem [shape: f32[1,4], index: 6, kind: input, shape index: {}]   ;;  %s6480_s7 = inlined_call_operand.vmem [shape: bf16[2,256,4], index: 7, kind: output, shape index: {0}]   ;;  %s6481_s8 = inlined_call_operand.hbm [shape: f32[2,1,4], index: 8, kind: output, shape index: {1}]  }
   0x1   :  { %6505 = sst [smem:[#allocation7_spill]] %s6473_s0 }
   0x2   :  { %6506 = sst [smem:[#allocation8_spill]] %s6474_s1 }
   0x3   :  { %14 = vsyncpa [#allocation4], 0 }
   0x4   :  { %16 = vsyncpa [#allocation4 + $0x1], 0  ;;  %s4895_s27 = smov 0   ;;  %s4897_s28 = smov 0  }
   0x5   :  { %s4899_s29 = smov 0   ;;  %s4901_s30 = smov 0  }
   0x6   :  { %s4903_s9 = smov 0   ;;  %s4905_s10 = smov 0  }
   0x7   :  { %s4907_s11 = smov 0   ;;  %s4909_s12 = smov 0  }
   0x8 LB: > { %s4132_s13 = sadd.s32 4294967295, %s4836_s12   ;;  %s4133_s14 = sadd.s32 4294967294, %s4836_s12   ;;  %s4836_s12 = sphi %s4909_s12, %s22_s12   ;;  %s4832_s11 = sphi %s4907_s11, %s6549_s11   ;;  %s4828_s10 = sphi %s4905_s10, %s6548_s10   ;;  %s4824_s9 = sphi %s4903_s9, %s6547_s9   ;;  %s4820_s30 = sphi %s4901_s30, %s6546_s30   ;;  %s4816_s29 = sphi %s4899_s29, %s6545_s29   ;;  %s4812_s28 = sphi %s4897_s28, %s6544_s28   ;;  %s4808_s27 = sphi %s4895_s27, %s6543_s27  }
   0x9   : > { %s31_s15 = sadd.s32 1, %s4828_s10  ;;  %s34_s16 = sadd.s32 1, %s4832_s11 }
   0xa   : > { %p32_p0 = scmp.ge.s32.totalorder %s31_s15, 2  ;;  %p263_p1 = scmp.ne.s32.totalorder %s4816_s29, %s4812_s28 }
   0xb   : > { %p264_p2 = scmp.eq.s32.totalorder %s4132_s13, 3  ;;  %p269_p4 = scmp.ne.s32.totalorder %s4812_s28, %s4808_s27 }
   0xc   : > { %s6551_s15 = smov (%p32_p0, %s31_s15), 0  ;;  %s6553_s16 = smov (!%p32_p0, %s34_s16), %s4832_s11 }
   0xd   : > { %p4944_p3 = por %p264_p2, %p263_p1  ;;  %p36_p5 = scmp.ge.s32.totalorder %s6553_s16, 2 }
   0xe   : > { %p270_p6 = scmp.eq.s32.totalorder %s4133_s14, 3  ;;  %p4142_p7 = scmp.ge.s32.totalorder %s4836_s12, 1 }
   0xf   : > { %p358_p8 = scmp.lt.s32.totalorder %s4836_s12, 5  ;;  %s6555_s16 = smov (%p36_p5, %s6553_s16), 0 }
  0x10   : > { %6508 = sst [smem:[#allocation6_spill]] %s6555_s16  ;;  %p4954_p9 = por %p270_p6, %p269_p4 }
  0x11   : > { %p359_p10 = pnand %p4142_p7, %p358_p8  ;;  %s250_s19 = ssub.s32 %s4832_s11, %s6555_s16 }
  0x12   : > { %s253_s20 = sadd.s32 1, %s4816_s29  ;;  %p251_p11 = scmp.eq.s32.totalorder %s250_s19, 0  ;;  %vm505_vm0 = vsmask.f32 (!%p359_p10), 256  ;;  %vm506_vm1 = vsmask.f32 (!%p359_p10), 4368 }
  0x13   : > { %362 = sbr.rel (%p359_p10) target bundleno = 1106 (0x452), region = 48  ;;  %s4143_s22 = sshll.u32 (!%p359_p10), %s4820_s30, 3  ;;  %vm548_vm2 = vcmask (!%p359_p10), 27648   ;;  %vm549_vm3 = vsmask.f32 (!%p359_p10), 7938  ;;  %vm6504_vm4 = vcmask (!%p359_p10), 24576   ;;  %vm4981_vm5 = vmor (!%p359_p10), %vm505_vm0, %vm506_vm1 }
  0x14   : > { %s4962_s21 = scalar_select %p251_p11, %s4816_s29, %s253_s20  }
  0x15   : > { %p434_p12 = scmp.lt.s32.totalorder (!%p359_p10), %s4824_s9, 1  ;;  %p436_p13 = scmp.lt.s32.totalorder (!%p359_p10), %s4143_s22, 15  ;;  %v745_v8 = vld [vmem:[#allocation2 + $0x18] sm:$0xf] (!%p359_p10)  ;;  %vm4989_vm6 = vmand (!%p359_p10), %vm548_vm2, %vm549_vm3  ;;  %v749_v17 = vld [vmem:[#allocation2 + $0x20] sm:$0x1] (!%p359_p10) }
  0x16   : > { %s4158_s23 = sshll.u32 (!%p359_p10), %s4820_s30, 4  ;;  %s6510_s0 = sld [smem:[#allocation7_spill]] (!%p359_p10)  ;;  %vm5000_vm7 = vmand (!%p359_p10), %vm6504_vm4, %vm505_vm0  ;;  %v752_v28 = vld [vmem:[#allocation2 + $0x24] sm:$0xf] (!%p359_p10)  ;;  %v759_v38 = vld [vmem:[#allocation2 + $0x30] sm:$0xf] (!%p359_p10) }
  0x17   : > { %p485_p0 = scmp.lt.s32.totalorder (!%p359_p10), %s4158_s23, 31  ;;  %v756_v39 = vld [vmem:[#allocation2 + $0x2c] sm:$0x1] (!%p359_p10)  ;;  %v763_v53 = vld [vmem:[#allocation2 + $0x38] sm:$0x1] (!%p359_p10)  ;;  %p493_p2 = scmp.eq.s32.totalorder (!%p359_p10), %s4820_s30, 0  ;;  %vm5035_vm8 = vmand (!%p359_p10), %vm6504_vm4, %vm549_vm3 }
  0x18   : > { %v766_v63 = vld [vmem:[#allocation2 + $0x3c] sm:$0xf] (!%p359_p10)  ;;  %vm1313_vm9 = vcmask (!%p359_p10), 1046528   ;;  %s6521_s1 = sld [smem:[#allocation8_spill]] (!%p359_p10)  ;;  %vm1142_vm11 = vsmask.f32 (!%p359_p10), 7424 }
  0x19   : > { %p801_p7 = scmp.eq.s32.totalorder (!%p359_p10), %s4820_s30, 1  ;;  %vm2220_vm13 = vcmask (!%p359_p10), 1041408   ;;  %vm2004_vm14 = vcmask (!%p359_p10), 31744   ;;  %vm2025_vm15 = vcmask (!%p359_p10), 64512   ;;  %vm2046_vm0 = vcmask (!%p359_p10), 97280   ;;  %p4285_p8 = scmp.ne.s32.totalorder (!%p359_p10), %s4820_s30, 0 }
  0x1a   : > { %s435_s24 = scalar_select %p434_p12, %s4824_s9, 1  ;;  %vm2067_vm1 = vcmask 130048   ;;  %vm2109_vm3 = vcmask 195584   ;;  %vm2199_vm4 = vcmask 293888  }
  0x1b   : > { %s6557_s22 = smov (!%p436_p13, %s4143_s22), 15  ;;  %s6559_s23 = smov (!%p485_p0, %s4158_s23), 31 }
  0x1c   : > { %s4968_s25 = sshll.u32 %s435_s24, 5  ;;  %s4144_s26 = sshll.u32 %s6557_s22, 1 }
  0x1d   : > { %s440_s13 = sadd.s32 %s4968_s25, %s4144_s26  ;;  %s488_s22 = sadd.s32 %s4968_s25, %s6559_s23 }
  0x1e   : > { %s4146_s14 = sshll.u32 %s440_s13, 2  ;;  %s4160_s24 = sshll.u32 %s488_s22, 2 }
  0x1f   : > { %s4974_s16 = scalar_lea.vmem %s6510_s0, %s4146_s14  ;;  %s4996_s13 = scalar_lea.vmem %s6480_s7, %s4160_s24 }
  0x20   : > { %v568_v0 = vld [vmem:[%s4974_s16] sm:$0xf]  ;;  %v569_v1 = vld [vmem:[%s4974_s16 + $0x4] sm:$0xf]  ;;  %v570_v6 = vld [vmem:[%s4974_s16 + $0x8] sm:$0xf] }
  0x21   : > { %v585_v2 = vshrl.u32 %v568_v0, 16  ;;  %v588_v3 = vshll.u32 %v568_v0, 16  ;;  %v593_v4 = vshrl.u32 %v569_v1, 16  ;;  %v596_v5 = vshll.u32 %v569_v1, 16  ;;  %v571_v9 = vld [vmem:[%s4974_s16 + $0xc] sm:$0xf] }
  0x22   : > { %v602_v10 = vshrl.u32 %v570_v6, 16  ;;  %v605_v11 = vshll.u32 %v570_v6, 16  ;;  %v572_v12 = vld [vmem:[%s4974_s16 + $0x10] sm:$0xf]  ;;  %v610_v16 = vshrl.u32 %v571_v9, 16  ;;  %v613_v20 = vshll.u32 %v571_v9, 16 }
  0x23   : > { %v587_v14 = vrot.slane %v585_v2, 7  ;;  %v595_v15 = vrot.slane %v593_v4, 7  ;;  %v573_v21 = vld [vmem:[%s4974_s16 + $0x14] sm:$0xf]  ;;  %v619_v22 = vshrl.u32 %v572_v12, 16  ;;  %v622_v23 = vshll.u32 %v572_v12, 16 }
  0x24   : > { %v604_v19 = vrot.slane %v602_v10, 7  ;;  %s4147_s14 = sshll.u32 %s4820_s30, 2  ;;  %v612_v31 = vrot.slane %v610_v16, 7  ;;  %v574_v33 = vld [vmem:[%s4974_s16 + $0x18] sm:$0xf]  ;;  %v627_v37 = vshrl.u32 %v573_v21, 16 }
  0x25   : > { %v590_v24 = vor.u32 %v588_v3, %v587_v14  ;;  %v591_v25 = vrot.slane %v587_v14, 4  ;;  %v598_v26 = vor.u32 %v596_v5, %v595_v15  ;;  %v600_v27 = vrot.slane %v595_v15, 4  ;;  %s4148_s19 = sadd.s32 4294967295, %s4147_s14  ;;  %v575_v44 = vld [vmem:[%s4974_s16 + $0x1c] sm:$0xf]  ;;  %s5073_s26 = sadd.s32 4, %s4147_s14 }
  0x26   : > { %v607_v29 = vor.u32 %v605_v11, %v604_v19  ;;  %v608_v30 = vrot.slane %v604_v19, 4  ;;  %v621_v32 = vrot.slane %v619_v22, 7  ;;  %p446_p1 = scmp.gt.s32.totalorder %s4148_s19, 0  ;;  %v615_v40 = vor.u32 %v613_v20, %v612_v31  ;;  %v576_v45 = vld [vmem:[%s4974_s16 + $0x20] sm:$0xf]  ;;  %p465_p5 = scmp.lt.s32.totalorder %s5073_s26, 7 }
  0x27   : > { %v599_v34 = vsel %vm4981_vm5, %v591_v25, %v598_v26  ;;  %v746_v35 = vsel %vm4989_vm6, %v590_v24, %v745_v8  ;;  %v750_v36 = vsel %vm5000_vm7, %v600_v27, %v749_v17  ;;  %v617_v41 = vrot.slane %v612_v31, 4  ;;  %s5046_s22 = scalar_select %p493_p2, 1, 0  ;;  %v773_v8 = vld [vmem:[#allocation2 + $0x48] sm:$0xf] }
  0x28   : > { %747 = vst [vmem:[#allocation2 + $0x18] sm:$0xf] %v746_v35  ;;  %748 = vst.msk [vmem:[#allocation2 + $0x1c] sm:$0xf] %vm548_vm2, %v599_v34  ;;  %v753_v42 = vsel %vm4989_vm6, %v607_v29, %v752_v28  ;;  %v624_v43 = vor.u32 %v622_v23, %v621_v32  ;;  %v625_v46 = vrot.slane %v621_v32, 4  ;;  %v629_v47 = vrot.slane %v627_v37, 7 }
  0x29   : > { %751 = vst [vmem:[#allocation2 + $0x20] sm:$0x1] %v750_v36  ;;  %754 = vst [vmem:[#allocation2 + $0x24] sm:$0xf] %v753_v42  ;;  %v630_v48 = vshll.u32 %v573_v21, 16  ;;  %s6561_s19 = smov (!%p446_p1, %s4148_s19), 0  ;;  %v616_v50 = vsel %vm4981_vm5, %v608_v30, %v615_v40  ;;  %v757_v52 = vsel %vm5000_vm7, %v617_v41, %v756_v39  ;;  %v499_v30 = vstv %s5046_s22 }
  0x2a   : > { %v636_v49 = vshrl.u32 %v574_v33, 16  ;;  %v760_v51 = vsel %vm4989_vm6, %v624_v43, %v759_v38  ;;  %755 = vst.msk [vmem:[#allocation2 + $0x28] sm:$0xf] %vm548_vm2, %v616_v50  ;;  %v634_v55 = vrot.slane %v629_v47, 4  ;;  %758 = vst [vmem:[#allocation2 + $0x2c] sm:$0x1] %v757_v52 }
  0x2b   : > { %v632_v54 = vor.u32 %v630_v48, %v629_v47  ;;  %761 = vst [vmem:[#allocation2 + $0x30] sm:$0xf] %v760_v51  ;;  %s4149_s20 = sshll.u32 %s6561_s19, 1  ;;  %v639_v57 = vshll.u32 %v574_v33, 16  ;;  %v644_v58 = vshrl.u32 %v575_v44, 16  ;;  %v647_v59 = vshll.u32 %v575_v44, 16 }
  0x2c   : > { %v638_v56 = vrot.slane %v636_v49, 7  ;;  %p451_p4 = scmp.lt.s32.totalorder %s4149_s20, 15  ;;  %v653_v60 = vshrl.u32 %v576_v45, 16  ;;  %v764_v62 = vsel %vm5000_vm7, %v634_v55, %v763_v53  ;;  %v656_v0 = vshll.u32 %v576_v45, 16  ;;  %v770_v21 = vld [vmem:[#allocation2 + $0x44] sm:$0x1] }
  0x2d   : > { %v633_v61 = vsel %vm4981_vm5, %v625_v46, %v632_v54  ;;  %765 = vst [vmem:[#allocation2 + $0x38] sm:$0x1] %v764_v62  ;;  %v646_v4 = vrot.slane %v644_v58, 7  ;;  %vm5084_vm10 = vcmp.eq.s32.totalorder %v499_v30, 1  ;;  %s6565_s26 = smov (!%p465_p5, %s5073_s26), 7  ;;  %s6489_s14 = smov 32  }
  0x2e   : > { %762 = vst.msk [vmem:[#allocation2 + $0x34] sm:$0xf] %vm548_vm2, %v633_v61  ;;  %s6563_s20 = smov (!%p451_p4, %s4149_s20), 15  ;;  %v641_v2 = vor.u32 %v639_v57, %v638_v56  ;;  %v642_v3 = vrot.slane %v638_v56, 4  ;;  %v5042_v5 = vrot.slane %v653_v60, 7  ;;  %s6529_s0 = smov 4  }
  0x2f   : > { %v874_v6 = vld [vmem:[#allocation2 + $0x18] sm:$0x1]  ;;  %v649_v12 = vor.u32 %v647_v59, %v646_v4  ;;  %s4150_s24 = sshll.u32 %s6563_s20, 1  ;;  %v1052_v23 = vld [vmem:[#allocation2 + $0x18] sm:$0xe]  ;;  %v651_v31 = vrot.slane %v646_v4, 4 }
  0x30   : > { %v875_v9 = vsel %vm5000_vm7, 0, %v874_v6  ;;  %v877_v10 = vld [vmem:[#allocation2 + $0x24] sm:$0x1]  ;;  %v911_v11 = vld [vmem:[#allocation2 + $0x20] sm:$0x1]  ;;  %v767_v14 = vsel %vm4989_vm6, %v641_v2, %v766_v63  ;;  %v658_v15 = vor.u32 %v656_v0, %v5042_v5  ;;  %s5068_s23 = sadd.s32 %s4150_s24, %s4968_s25  ;;  %s6483_s24 = smov 24  }
  0x31   : > { %876 = vst [vmem:[#allocation2 + $0x18] sm:$0x1] %v875_v9  ;;  %v878_v16 = vsel %vm5000_vm7, 0, %v877_v10  ;;  %v912_v17 = vsel %vm5035_vm8, 0, %v911_v11  ;;  %768 = vst [vmem:[#allocation2 + $0x3c] sm:$0xf] %v767_v14  ;;  %v650_v20 = vsel %vm4981_vm5, %v642_v3, %v649_v12  ;;  %v771_v40 = vsel %vm5000_vm7, %v651_v31, %v770_v21 }
  0x32   : > { %879 = vst [vmem:[#allocation2 + $0x24] sm:$0x1] %v878_v16  ;;  %913 = vst [vmem:[#allocation2 + $0x20] sm:$0x1] %v912_v17  ;;  %v880_v19 = vld [vmem:[#allocation2 + $0x30] sm:$0x1]  ;;  %v774_v22 = vsel %vm4989_vm6, %v658_v15, %v773_v8 }
  0x33   : > { %v881_v24 = vsel %vm5000_vm7, 0, %v880_v19  ;;  %v914_v25 = vld [vmem:[#allocation2 + $0x2c] sm:$0x1]  ;;  %769 = vst.msk [vmem:[#allocation2 + $0x40] sm:$0xf] %vm548_vm2, %v650_v20  ;;  %s4152_s19 = sshll.u32 %s5068_s23, 2 }
  0x34   : > { %775 = vst [vmem:[#allocation2 + $0x48] sm:$0xf] %v774_v22  ;;  %882 = vst [vmem:[#allocation2 + $0x30] sm:$0x1] %v881_v24  ;;  %v915_v26 = vsel %vm5035_vm8, 0, %v914_v25  ;;  %s5098_s22 = scalar_lea.vmem %s6521_s1, %s4152_s19  ;;  %s6486_s23 = smov 12  }
  0x35   : > { %v1053_v27 = vld [vmem:[#allocation2 + $0x24] sm:$0xe]  ;;  %v1013_v28 = vld [vmem:[#allocation2 + $0x18] sm:$0xe]  ;;  %v1023_v29 = vld [vmem:[#allocation2 + $0x1c] sm:$0xf] }
  0x36   : > { %916 = vst [vmem:[#allocation2 + $0x2c] sm:$0x1] %v915_v26  ;;  %v985_v32 = vld [vmem:[#allocation2 + $0x1c] sm:$0xf]  ;;  %v5075_v33 = vld [vmem:[#allocation2 + $0x28] sm:$0xf]  ;;  %v4241_v35 = vcombine.low %v1052_v23, %v1023_v29 }
  0x37   : > { %v1025_v34 = vld [vmem:[#allocation2 + $0x28] sm:$0xf]  ;;  %v4212_v37 = vcombine.low %v1013_v28, %v985_v32  ;;  %v5077_v38 = vld [vmem:[#allocation2 + $0x1c] sm:$0xf]  ;;  %v973_v39 = vld [vmem:[#allocation2 + $0x18] sm:$0xe] }
  0x38   : > { %v4242_v36 = vcombine.low %v1053_v27, %v1025_v34  ;;  %v1022_v41 = vld [vmem:[#allocation2 + $0x18] sm:$0xf]  ;;  %v5082_v43 = vld [vmem:[#allocation2 + $0x28] sm:$0xf]  ;;  %v974_v44 = vld [vmem:[#allocation2 + $0x24] sm:$0xe]  ;;  %v4183_v59 = vcombine.low %v973_v39, %v5077_v38 }
  0x39   : > { %v984_v42 = vld [vmem:[#allocation2 + $0x18] sm:$0xf]  ;;  %772 = vst [vmem:[#allocation2 + $0x44] sm:$0x1] %v771_v40  ;;  %v5089_v46 = vcombine.low %v1022_v41, %v1023_v29  ;;  %v986_v48 = vld [vmem:[#allocation2 + $0x24] sm:$0xf]  ;;  %v4184_v63 = vcombine.low %v974_v44, %v5082_v43 }
  0x3a   : > { %v5091_v47 = vcombine.low %v984_v42, %v985_v32  ;;  %v1024_v49 = vld [vmem:[#allocation2 + $0x24] sm:$0xf]  ;;  %v5093_v50 = vld [vmem:[#allocation2 + $0x20] ss:$0 sps:$4 sm:$0x11]   ;;  %v1954_v51 = vrot.slane %v4241_v35, 1  ;;  %v5105_v52 = vcombine.low %v986_v48, %v5075_v33 }
  0x3b   : > { %1734 = vrot.lane.b32.xlu0 %v5089_v46, %s6483_s24  ;;  %v5107_v53 = vcombine.low %v1024_v49, %v1025_v34  ;;  %v5109_v54 = vld [vmem:[#allocation2 + $0x34] sm:$0xf]  ;;  %v1957_v55 = vrot.slane %v4242_v36, 1  ;;  %v1637_v56 = vrot.slane %v4212_v37, 1  ;;  %v1955_v57 = vrot.slane %v5093_v50, 1  ;;  %s4154_s19 = sshll.u32 %s6565_s26, 1 }
  0x3c   : > { %1416 = vrot.lane.b32.xlu1 %v5091_v47, %s6486_s23  ;;  %v988_v58 = vld [vmem:[#allocation2 + $0x30] sm:$0xf]  ;;  %v1014_v60 = vld [vmem:[#allocation2 + $0x24] sm:$0xe]  ;;  %v496_v0 = vld [vmem:[%s5098_s22 + $0x8] sm:$0xf] }
  0x3d   : > { %v5118_v61 = vld [vmem:[#allocation2 + $0x2c] ss:$0 sps:$4 sm:$0x11]   ;;  %v4596_v62 = vld [vmem:[#allocation2 + $0x20] ss:$0 sps:$4 sm:$0x11]   ;;  %v5131_v6 = vcombine.low %v988_v58, %v5109_v54  ;;  %v1956_v10 = vsel %vm1313_vm9, %v1954_v51, %v1955_v57  ;;  %v4213_v19 = vcombine.low %v1014_v60, %v5075_v33 }
  0x3e   : > { %v1479_v2 = vshll.u32 %v5091_v47, 16  ;;  %v5123_v3 = vld [vmem:[#allocation2 + $0x20] ss:$0 sps:$4 sm:$0x11]   ;;  %v497_v4 = vld [vmem:[%s5098_s22 + $0xc] sm:$0xf] }
  0x3f   : > { %1418 = vrot.lane.b32.xlu0 %v5105_v52, %s6486_s23  ;;  %v1958_v8 = vrot.slane %v5118_v61, 1  ;;  %v1638_v9 = vrot.slane %v4596_v62, 1  ;;  %v1320_v11 = vrot.slane %v4183_v59, 1  ;;  %v5135_v12 = vld [vmem:[#allocation2 + $0x2c] ss:$0 sps:$4 sm:$0x11]  }
  0x40   : > { %1736 = vrot.lane.b32.xlu1 %v5107_v53, %s6483_s24  ;;  %v1799_v14 = vshll.u32 %v5107_v53, 16  ;;  %v1321_v15 = vrot.slane %v5123_v3, 1  ;;  %v945_v16 = vld [vmem:[#allocation2 + $0x18] sm:$0xf]  ;;  %v1323_v17 = vrot.slane %v4184_v63, 1  ;;  %v1477_v22 = vshrl.u32 %v5091_v47, 16 }
  0x41   : > { %v1959_v20 = vsel %vm1313_vm9, %v1957_v55, %v1958_v8  ;;  %v947_v21 = vld [vmem:[#allocation2 + $0x24] sm:$0xf]  ;;  %v503_v23 = vsel %vm5084_vm10, 0, %v496_v0  ;;  %v504_v24 = vsel %vm5084_vm10, 0, %v497_v4  ;;  %p470_p6 = scmp.lt.s32.totalorder %s4154_s19, 15  ;;  %v1639_v25 = vsel %vm1313_vm9, %v1637_v56, %v1638_v9  ;;  %s4841_s26 = smov 20  }
  0x42   : > { %v5151_v26 = vld [vmem:[#allocation2 + $0x2c] ss:$0 sps:$4 sm:$0x11]   ;;  %v1481_v27 = vrot.slane %v1479_v2, 1  ;;  %v1484_v28 = vshll.u32 %v4596_v62, 16  ;;  %v526_v29 = vshrl.u32 %v503_v23, 16  ;;  %v5155_v34 = vcombine.low %v945_v16, %v5077_v38 }
  0x43   : > { %1984 = vrot.lane.b32.xlu0 %v1956_v10, %s6489_s14  ;;  %v1324_v30 = vrot.slane %v5135_v12, 1  ;;  %v529_v31 = vshll.u32 %v503_v23, 16  ;;  %v534_v32 = vshrl.u32 %v504_v24, 16  ;;  %v537_v33 = vshll.u32 %v504_v24, 16  ;;  %s6567_s19 = smov (!%p470_p6, %s4154_s19), 15 }
  0x44   : > { %1420 = vrot.lane.b32.xlu1 %v5131_v6, %s6486_s23  ;;  %v5158_v35 = vcombine.low %v947_v21, %v5082_v43  ;;  %v1640_v36 = vrot.slane %v4213_v19, 1  ;;  %v528_v37 = vrot.slane %v526_v29, 7  ;;  %v561_v40 = vld [vmem:[#allocation2 + $0xc] sm:$0xf]  ;;  %v1797_v41 = vshrl.u32 %v5107_v53, 16  ;;  %s4155_s20 = sshll.u32 %s6567_s19, 1 }
  0x45   : > { %v536_v39 = vrot.slane %v534_v32, 7  ;;  %v1801_v42 = vrot.slane %v1799_v14, 1  ;;  %v1804_v44 = vshll.u32 %v5118_v61, 16  ;;  %v1322_v38 = vsel %vm1313_vm9, %v1320_v11, %v1321_v15  ;;  %s5168_s24 = sadd.s32 %s4155_s20, %s4968_s25  ;;  %v565_v63 = vld [vmem:[#allocation2 + $0x14] sm:$0x1]  ;;  %s6498_s25 = smov 8  }
  0x46   : > { %v1641_v43 = vrot.slane %v5151_v26, 1  ;;  %v531_v47 = vor.u32 %v529_v31, %v528_v37  ;;  %v532_v48 = vrot.slane %v528_v37, 4  ;;  %v1325_v49 = vsel %vm1313_vm9, %v1323_v17, %v1324_v30  ;;  %v917_v4 = vld [vmem:[#allocation2 + $0x38] sm:$0x1]  ;;  %v494_v14 = vld [vmem:[%s5098_s22] sm:$0xf] }
  0x47   : > { %1986 = vrot.lane.b32.xlu0 %v1959_v20, %s6489_s14  ;;  %v1482_v51 = vor.u32 %v1481_v27, %v1477_v22  ;;  %v1486_v55 = vrot.slane %v1484_v28, 1  ;;  %v539_v53 = vor.u32 %v537_v33, %v536_v39  ;;  %v1787_v56 = vshll.u32 %v5089_v46, 16  ;;  %v495_v19 = vld [vmem:[%s5098_s22 + $0x4] sm:$0xf]  ;;  %s6495_s19 = smov 16   ;;  %s6492_s22 = smov 28  }
  0x48   : > { %1666 = vrot.lane.b32.xlu1 %v1639_v25, %s4841_s26  ;;  %v541_v57 = vrot.slane %v536_v39, 4  ;;  %v562_v58 = vsel %vm4989_vm6, %v531_v47, %v561_v40  ;;  %v1802_v60 = vor.u32 %v1801_v42, %v1797_v41  ;;  %v1806_v61 = vrot.slane %v1804_v44, 1  ;;  %s6501_s20 = smov 4   ;;  %s6524_s14 = smov 28  }
  0x49   : > { %v540_v59 = vsel %vm4981_vm5, %v532_v48, %v539_v53  ;;  %563 = vst [vmem:[#allocation2 + $0xc] sm:$0xf] %v562_v58  ;;  %v1170_v62 = vshll.u32 %v5155_v34, 16  ;;  %v1168_v0 = vshrl.u32 %v5155_v34, 16  ;;  %v1175_v2 = vshll.u32 %v5123_v3, 16 }
  0x4a   : > { %564 = vst.msk [vmem:[#allocation2 + $0x10] sm:$0xf] %vm548_vm2, %v540_v59  ;;  %v1642_v8 = vsel %vm1313_vm9, %v1640_v36, %v1641_v43  ;;  %v1487_v9 = vsel %vm1142_vm11, %v1482_v51, %v1486_v55  ;;  %v1182_v11 = vshll.u32 %v5158_v35, 16  ;;  %v1491_v15 = vshll.u32 %v5105_v52, 16  ;;  %v883_v36 = vld [vmem:[#allocation2 + $0x3c] sm:$0x1] }
  0x4b   : > { %1348 = vrot.lane.b32.xlu0 %v1322_v38, %s6498_s25  ;;  %v1172_v10 = vrot.slane %v1170_v62, 1  ;;  %v1503_v16 = vshll.u32 %v5131_v6, 16  ;;  %v566_v17 = vsel %vm5000_vm7, %v541_v57, %v565_v63  ;;  %v1807_v20 = vsel %vm1142_vm11, %v1802_v60, %v1806_v61  ;;  %v551_v38 = vld [vmem:[#allocation2] sm:$0xf]  ;;  %v920_v57 = vld [vmem:[#allocation2 + $0x44] sm:$0x1] }
  0x4c   : > { %1350 = vrot.lane.b32.xlu1 %v1325_v49, %s6498_s25  ;;  %v1785_v3 = vshrl.u32 %v5089_v46, 16  ;;  %v1789_v21 = vrot.slane %v1787_v56, 1  ;;  %567 = vst [vmem:[#allocation2 + $0x14] sm:$0x1] %v566_v17  ;;  %v918_v22 = vsel %vm5035_vm8, 0, %v917_v4  ;;  %v1177_v24 = vrot.slane %v1175_v2, 1 }
  0x4d   : > { %v1173_v23 = vor.u32 %v1172_v10, %v1168_v0  ;;  %v1187_v25 = vshll.u32 %v5135_v12, 16  ;;  %919 = vst [vmem:[#allocation2 + $0x38] sm:$0x1] %v918_v22  ;;  %v501_v27 = vsel %vm5084_vm10, 0, %v494_v14  ;;  %v1180_v46 = vshrl.u32 %v5158_v35, 16 }
  0x4e   : > { %v1184_v28 = vrot.slane %v1182_v11, 1  ;;  %v502_v29 = vsel %vm5084_vm10, 0, %v495_v19  ;;  %v509_v30 = vshrl.u32 %v501_v27, 16  ;;  %v512_v32 = vshll.u32 %v501_v27, 16  ;;  %v558_v49 = vld [vmem:[#allocation2 + $0x8] sm:$0x1] }
  0x4f   : > { %1668 = vrot.lane.b32.xlu0 %v1642_v8, %s4841_s26  ;;  %v517_v33 = vshrl.u32 %v502_v29, 16  ;;  %v1501_v12 = vshrl.u32 %v5131_v6, 16  ;;  %v520_v40 = vshll.u32 %v502_v29, 16  ;;  %v1178_v41 = vsel %vm1142_vm11, %v1173_v23, %v1177_v24  ;;  %v1026_v62 = vld [vmem:[#allocation2 + $0x30] sm:$0xf] }
  0x50   : > { %1586 = vrot.lane.b32.xlu1 %v1487_v9, %s6495_s19  ;;  %v871_v31 = vld [vmem:[#allocation2 + $0xc] sm:$0x1]  ;;  %v511_v39 = vrot.slane %v509_v30, 7  ;;  %v1189_v45 = vrot.slane %v1187_v25, 1  ;;  %v1505_v42 = vrot.slane %v1503_v16, 1  ;;  %v1185_v43 = vor.u32 %v1184_v28, %v1180_v46 }
  0x51   : > { %v872_v37 = vsel %vm5000_vm7, 0, %v871_v31  ;;  %v519_v44 = vrot.slane %v517_v33, 7  ;;  %v884_v51 = vsel %vm5000_vm7, 0, %v883_v36  ;;  %v1792_v6 = vshll.u32 %v5093_v50, 16  ;;  %v983_v63 = vld [vmem:[#allocation2 + $0x10] sm:$0xf] }
  0x52   : > { %873 = vst [vmem:[#allocation2 + $0xc] sm:$0x1] %v872_v37  ;;  %v514_v47 = vor.u32 %v512_v32, %v511_v39  ;;  %v515_v48 = vrot.slane %v511_v39, 4  ;;  %885 = vst [vmem:[#allocation2 + $0x3c] sm:$0x1] %v884_v51  ;;  %v1190_v0 = vsel %vm1142_vm11, %v1185_v43, %v1189_v45  ;;  %v1506_v2 = vor.u32 %v1505_v42, %v1501_v12 }
  0x53   : > { %v908_v55 = vld [vmem:[#allocation2 + $0x14] sm:$0x1]  ;;  %v522_v53 = vor.u32 %v520_v40, %v519_v44  ;;  %v524_v56 = vrot.slane %v519_v44, 4  ;;  %v1790_v8 = vor.u32 %v1789_v21, %v1785_v3  ;;  %v1794_v9 = vrot.slane %v1792_v6, 1  ;;  %v1012_v10 = vld [vmem:[#allocation2 + $0xc] sm:$0xe] }
  0x54   : > { %1906 = vrot.lane.b32.xlu1 %v1807_v20, %s6492_s22  ;;  %v909_v58 = vsel %vm5035_vm8, 0, %v908_v55  ;;  %v5212_v59 = vld [vmem:[#allocation2 + $0x38] ss:$0 sps:$4 sm:$0x11]   ;;  %v552_v60 = vsel %vm4989_vm6, %v514_v47, %v551_v38  ;;  %v5224_v11 = vld [vmem:[#allocation2 + $0x34] sm:$0xf]  ;;  %v4211_v3 = vcombine.low %v1012_v10, %v983_v63 }
  0x55   : > { %910 = vst [vmem:[#allocation2 + $0x14] sm:$0x1] %v909_v58  ;;  %v523_v50 = vsel %vm4981_vm5, %v515_v48, %v522_v53  ;;  %553 = vst [vmem:[#allocation2] sm:$0xf] %v552_v60  ;;  %v559_v61 = vsel %vm5000_vm7, %v524_v56, %v558_v49  ;;  %v1508_v4 = vshll.u32 %v5212_v59, 16  ;;  %v921_v14 = vsel %vm5035_vm8, 0, %v920_v57 }
  0x56   : > { %555 = vst.msk [vmem:[#allocation2 + $0x4] sm:$0xf] %vm548_vm2, %v523_v50  ;;  %560 = vst [vmem:[#allocation2 + $0x8] sm:$0x1] %v559_v61  ;;  %v1489_v17 = vshrl.u32 %v5105_v52, 16  ;;  %v1493_v19 = vrot.slane %v1491_v15, 1  ;;  %v5237_v25 = vcombine.low %v1026_v62, %v5224_v11  ;;  %v1795_v46 = vsel %vm1142_vm11, %v1790_v8, %v1794_v9 }
  0x57   : > { %v1496_v20 = vshll.u32 %v5151_v26, 16  ;;  %v1510_v22 = vrot.slane %v1508_v4, 1  ;;  %922 = vst [vmem:[#allocation2 + $0x44] sm:$0x1] %v921_v14  ;;  %v1015_v24 = vld [vmem:[#allocation2 + $0x30] sm:$0xe] }
  0x58   : > { %1267 = vrot.lane.b32.xlu1 %v1178_v41, %s6501_s20  ;;  %v949_v27 = vld [vmem:[#allocation2 + $0x30] sm:$0xf]  ;;  %v5241_v15 = vld [vmem:[#allocation2 + $0x34] sm:$0xf]  ;;  %v1494_v28 = vor.u32 %v1493_v19, %v1489_v17  ;;  %v5247_v31 = vld [vmem:[%s4974_s16 + $0x24] sm:$0xf]  ;;  %v4214_v36 = vcombine.low %v1015_v24, %v5109_v54 }
  0x59   : > { %v982_v16 = vld [vmem:[#allocation2 + $0xc] sm:$0xf]  ;;  %v1511_v21 = vsel %vm1142_vm11, %v1506_v2, %v1510_v22  ;;  %v944_v26 = vld [vmem:[#allocation2 + $0x10] sm:$0xf]  ;;  %v1498_v29 = vrot.slane %v1496_v20, 1  ;;  %v1634_v12 = vrot.slane %v4211_v3, 1  ;;  %v5264_v43 = vcombine.low %v949_v27, %v5241_v15 }
  0x5a   : > { %v5232_v23 = vcombine.low %v982_v16, %v983_v63  ;;  %v943_v52 = vld [vmem:[#allocation2 + $0xc] sm:$0xf]  ;;  %v5251_v37 = vld [vmem:[#allocation2 + $0x40] sm:$0xf]  ;;  %v1811_v45 = vshll.u32 %v5237_v25, 16  ;;  %v1643_v51 = vrot.slane %v4214_v36, 1 }
  0x5b   : > { %v972_v41 = vld [vmem:[#allocation2 + $0xc] sm:$0xe]  ;;  %v5261_v54 = vcombine.low %v943_v52, %v944_v26  ;;  %v1028_v38 = vld [vmem:[#allocation2 + $0x3c] sm:$0xf]  ;;  %v1499_v47 = vsel %vm1142_vm11, %v1494_v28, %v1498_v29  ;;  %v659_v55 = vrot.slane %v5042_v5, 4  ;;  %v661_v53 = vshrl.u32 %v5247_v31, 16 }
  0x5c   : > { %1269 = vrot.lane.b32.xlu1 %v1190_v0, %s6501_s20  ;;  %1414 = vrot.lane.b32.xlu0 %v5232_v23, %s6486_s23  ;;  %v5244_v30 = vld [vmem:[#allocation2 + $0x14] ss:$0 sps:$4 sm:$0x11]   ;;  %v868_v32 = vld [vmem:[#allocation2] sm:$0x1]  ;;  %v1467_v42 = vshll.u32 %v5232_v23, 16  ;;  %v4182_v49 = vcombine.low %v972_v41, %v944_v26  ;;  %v5273_v58 = vcombine.low %v1028_v38, %v5251_v37 }
  0x5d   : > { %v905_v33 = vld [vmem:[#allocation2 + $0x8] sm:$0x1]  ;;  %v869_v39 = vsel %vm5000_vm7, 0, %v868_v32  ;;  %v1635_v44 = vrot.slane %v5244_v30, 1  ;;  %v971_v48 = vld [vmem:[#allocation2] sm:$0xe] }
  0x5e   : > { %v906_v40 = vsel %vm5035_vm8, 0, %v905_v33  ;;  %870 = vst [vmem:[#allocation2] sm:$0x1] %v869_v39  ;;  %v5267_v6 = vld [vmem:[#allocation2 + $0x38] ss:$0 sps:$4 sm:$0x11]  }
  0x5f   : > { %907 = vst [vmem:[#allocation2 + $0x8] sm:$0x1] %v906_v40  ;;  %v942_v56 = vld [vmem:[#allocation2 + $0x4] sm:$0xf]  ;;  %v1644_v57 = vrot.slane %v5212_v59, 1  ;;  %v1809_v60 = vshrl.u32 %v5237_v25, 16  ;;  %v1636_v2 = vsel %vm1313_vm9, %v1634_v12, %v1635_v44 }
  0x60   : > { %1590 = vrot.lane.b32.xlu1 %v1511_v21, %s6495_s19  ;;  %1904 = vrot.lane.b32.xlu0 %v1795_v46, %s6492_s22  ;;  %v4181_v50 = vcombine.low %v971_v48, %v942_v56  ;;  %v1158_v61 = vshll.u32 %v5261_v54, 16  ;;  %v1813_v62 = vrot.slane %v1811_v45, 1  ;;  %v5278_v63 = vld [vmem:[#allocation2 + $0x30] sm:$0xe]  ;;  %v1194_v0 = vshll.u32 %v5264_v43, 16  ;;  %s6523_s23 = smov 24  }
  0x61   : > { %v4611_v4 = vld [vmem:[#allocation2 + $0x14] ss:$0 sps:$4 sm:$0x11]   ;;  %v1465_v59 = vshrl.u32 %v5232_v23, 16  ;;  %v1469_v8 = vrot.slane %v1467_v42, 1  ;;  %v1156_v9 = vshrl.u32 %v5261_v54, 16  ;;  %v5289_v20 = vsel %vm1313_vm9, %v1643_v51, %v1644_v57 }
  0x62   : > { %v1317_v10 = vrot.slane %v4182_v49, 1  ;;  %v1816_v14 = vshll.u32 %v5267_v6, 16  ;;  %v1192_v16 = vshrl.u32 %v5264_v43, 16  ;;  %v1472_v19 = vshll.u32 %v5244_v30, 16  ;;  %v5307_v40 = vld [vmem:[#allocation2 + $0x40] sm:$0xf] }
  0x63   : > { %v1823_v22 = vshll.u32 %v5273_v58, 16  ;;  %v4243_v23 = vcombine.low %v5278_v63, %v5224_v11  ;;  %v1314_v24 = vrot.slane %v4181_v50, 1  ;;  %v5297_v27 = vor.u32 %v1813_v62, %v1809_v60  ;;  %v5301_v30 = vld [vmem:[#allocation2 + $0x44] ss:$0 sps:$4 sm:$0x11]   ;;  %s6526_s22 = smov 12  }
  0x64   : > { %1588 = vrot.lane.b32.xlu0 %v1499_v47, %s6495_s19  ;;  %v5299_v52 = vrot.slane %v1194_v0, 1  ;;  %v1160_v26 = vrot.slane %v1158_v61, 1  ;;  %v1163_v46 = vshll.u32 %v4611_v4, 16  ;;  %v1318_v28 = vrot.slane %v4611_v4, 1  ;;  %v886_v41 = vld [vmem:[#allocation2 + $0x48] sm:$0x1] }
  0x65   : > { %v941_v17 = vld [vmem:[#allocation2] sm:$0xf]  ;;  %v1470_v29 = vor.u32 %v1469_v8, %v1465_v59  ;;  %v5303_v32 = vld [vmem:[#allocation2 + $0x38] ss:$0 sps:$4 sm:$0x11]   ;;  %v1474_v44 = vrot.slane %v1472_v19, 1 }
  0x66   : > { %v5295_v3 = vcombine.low %v941_v17, %v942_v56  ;;  %v4608_v21 = vld [vmem:[#allocation2 + $0x8] ss:$0 sps:$4 sm:$0x11]   ;;  %v777_v45 = vld [vmem:[#allocation2 + $0x50] sm:$0x1]  ;;  %v1821_v38 = vshrl.u32 %v5273_v58, 16  ;;  %v1161_v62 = vor.u32 %v1160_v26, %v1156_v9  ;;  %v1319_v59 = vsel %vm1313_vm9, %v1317_v10, %v1318_v28 }
  0x67   : > { %v1151_v12 = vshll.u32 %v4608_v21, 16  ;;  %v1315_v39 = vrot.slane %v4608_v21, 1  ;;  %v578_v42 = vld [vmem:[%s4974_s16 + $0x28] sm:$0xf]  ;;  %v1825_v47 = vrot.slane %v1823_v22, 1  ;;  %v663_v48 = vrot.slane %v661_v53, 7 }
  0x68   : > { %1664 = vrot.lane.b32.xlu0 %v1636_v2, %s4841_s26  ;;  %v1144_v33 = vshrl.u32 %v5295_v3, 16  ;;  %v1146_v36 = vshll.u32 %v5295_v3, 16  ;;  %v4663_v49 = vld [vmem:[%s6476_s3] sm:$0xff]   ;;  %v951_v60 = vld [vmem:[#allocation2 + $0x3c] sm:$0xf]  ;;  %v664_v50 = vshll.u32 %v5247_v31, 16  ;;  %v1475_v26 = vsel %vm1142_vm11, %v1470_v29, %v1474_v44 }
  0x69   : > { %v1153_v56 = vrot.slane %v1151_v12, 1  ;;  %v1316_v57 = vsel %vm1313_vm9, %v1314_v24, %v1315_v39  ;;  %v4664_v61 = vld [vmem:[%s6476_s3 + $0x8] sm:$0xff]   ;;  %v1165_v53 = vrot.slane %v1163_v46, 1  ;;  %v668_v0 = vrot.slane %v663_v48, 4  ;;  %4457 = vmatprep.subr.bf16.mxu0 %v4663_v49  ;;  %v580_v24 = vld [vmem:[%s4974_s16 + $0x30] sm:$0xf] }
  0x6a   : > { %v1148_v51 = vrot.slane %v1146_v36, 1  ;;  %1344 = vrot.lane.b32.xlu1 %v1316_v57, %s6498_s25  ;;  %v887_v2 = vsel %vm5000_vm7, 0, %v886_v41  ;;  %v1828_v8 = vshll.u32 %v5301_v30, 16  ;;  %v666_v31 = vor.u32 %v664_v50, %v663_v48  ;;  %v579_v17 = vld [vmem:[%s4974_s16 + $0x2c] sm:$0xf]  ;;  %4458 = vmatpush3.bf16.msra.mxu0 %v4663_v49  ;;  %s6525_s19 = smov 32  }
  0x6b   : > { %888 = vst [vmem:[#allocation2 + $0x48] sm:$0x1] %v887_v2  ;;  %v1199_v9 = vshll.u32 %v5303_v32, 16  ;;  %v5327_v19 = vcombine.low %v951_v60, %v5307_v40  ;;  %v778_v22 = vsel %vm5000_vm7, %v668_v0, %v777_v45  ;;  %v670_v21 = vshrl.u32 %v578_v42, 16  ;;  %4459 = vmatprep.subr.bf16.mxu0 %v4664_v61  ;;  %v581_v36 = vld [vmem:[%s4974_s16 + $0x34] sm:$0xf] }
  0x6c   : > { %v1149_v4 = vor.u32 %v1148_v51, %v1144_v33  ;;  %v5334_v46 = vor.u32 %v1825_v47, %v1821_v38  ;;  %v667_v28 = vsel %vm4981_vm5, %v659_v55, %v666_v31  ;;  %779 = vst [vmem:[#allocation2 + $0x50] sm:$0x1] %v778_v22  ;;  %v780_v33 = vld [vmem:[#allocation2 + $0x54] sm:$0xf]  ;;  %v582_v12 = vld [vmem:[%s4974_s16 + $0x38] sm:$0xf]  ;;  %v1166_v39 = vsel %vm1142_vm11, %v1161_v62, %v1165_v53 }
  0x6d   : > { %776 = vst.msk [vmem:[#allocation2 + $0x4c] sm:$0xf] %vm548_vm2, %v667_v28  ;;  %v672_v29 = vrot.slane %v670_v21, 7  ;;  %v673_v41 = vshll.u32 %v578_v42, 16  ;;  %v678_v45 = vshrl.u32 %v579_v17, 16  ;;  %v1830_v44 = vrot.slane %v1828_v8, 1 }
  0x6e   : > { %v1154_v10 = vsel %vm1142_vm11, %v1149_v4, %v1153_v56  ;;  %1346 = vrot.lane.b32.xlu1 %v1319_v59, %s6498_s25  ;;  %v681_v5 = vshll.u32 %v579_v17, 16  ;;  %v784_v38 = vld [vmem:[#allocation2 + $0x5c] sm:$0x1]  ;;  %v687_v47 = vshrl.u32 %v580_v24, 16  ;;  %v690_v55 = vshll.u32 %v580_v24, 16  ;;  %4460 = vmatpush3.bf16.msra.mxu0 %v4664_v61 }
  0x6f   : > { %1263 = vrot.lane.b32.xlu0 %v1154_v10, %s6501_s20  ;;  %v675_v48 = vor.u32 %v673_v41, %v672_v29  ;;  %v676_v49 = vrot.slane %v672_v29, 4  ;;  %v680_v51 = vrot.slane %v678_v45, 7  ;;  %v695_v56 = vshrl.u32 %v581_v36, 16  ;;  %v787_v57 = vld [vmem:[#allocation2 + $0x60] sm:$0xf] }
  0x70   : > { %v689_v60 = vrot.slane %v687_v47, 7  ;;  %v698_v50 = vshll.u32 %v581_v36, 16  ;;  %v704_v62 = vshrl.u32 %v582_v12, 16  ;;  %v707_v53 = vshll.u32 %v582_v12, 16  ;;  %v5355_v17 = vld [vmem:[%s4974_s16 + $0x3c] sm:$0xf] }
  0x71   : > { %v5349_v42 = vld [vmem:[#allocation2 + $0x44] ss:$0 sps:$4 sm:$0x11]   ;;  %v683_v0 = vor.u32 %v681_v5, %v680_v51  ;;  %v685_v2 = vrot.slane %v680_v51, 4  ;;  %v781_v61 = vsel %vm4989_vm6, %v675_v48, %v780_v33  ;;  %v697_v4 = vrot.slane %v695_v56, 7  ;;  %s6522_s16 = smov 16  }
  0x72   : > { %1670 = vrot.lane.b32.xlu1 %v5289_v20, %s4841_s26  ;;  %v1206_v59 = vshll.u32 %v5327_v19, 16  ;;  %782 = vst [vmem:[#allocation2 + $0x54] sm:$0xf] %v781_v61  ;;  %v692_v8 = vor.u32 %v690_v55, %v689_v60  ;;  %v693_v31 = vrot.slane %v689_v60, 4  ;;  %v5357_v22 = vrot.slane %v704_v62, 7 }
  0x73   : > { %1265 = vrot.lane.b32.xlu0 %v1166_v39, %s6501_s20  ;;  %v1818_v20 = vrot.slane %v1816_v14, 1  ;;  %v923_v21 = vld [vmem:[#allocation2 + $0x50] sm:$0x1]  ;;  %v684_v24 = vsel %vm4981_vm5, %v676_v49, %v683_v0  ;;  %v785_v10 = vsel %vm5000_vm7, %v685_v2, %v784_v38  ;;  %v700_v28 = vor.u32 %v698_v50, %v697_v4  ;;  %v1055_v12 = vld [vmem:[#allocation2 + $0x3c] sm:$0xe] }
  0x74   : > { %v1197_v33 = vor.u32 %v5299_v52, %v1192_v16  ;;  %v1201_v36 = vrot.slane %v1199_v9, 1  ;;  %v924_v39 = vsel %vm5035_vm8, 0, %v923_v21  ;;  %783 = vst.msk [vmem:[#allocation2 + $0x58] sm:$0xf] %vm548_vm2, %v684_v24  ;;  %786 = vst [vmem:[#allocation2 + $0x5c] sm:$0x1] %v785_v10  ;;  %v788_v14 = vsel %vm4989_vm6, %v692_v8, %v787_v57 }
  0x75   : > { %v1211_v29 = vshll.u32 %v5349_v42, 16  ;;  %v976_v41 = vld [vmem:[#allocation2 + $0x3c] sm:$0xe]  ;;  %925 = vst [vmem:[#allocation2 + $0x50] sm:$0x1] %v924_v39  ;;  %v702_v16 = vrot.slane %v697_v4, 4  ;;  %v709_v52 = vor.u32 %v707_v53, %v5357_v22  ;;  %v1831_v45 = vsel %vm1142_vm11, %v5334_v46, %v1830_v44 }
  0x76   : > { %1740 = vrot.lane.b32.xlu1 %v5273_v58, %s6523_s23  ;;  %789 = vst [vmem:[#allocation2 + $0x60] sm:$0xf] %v788_v14  ;;  %v712_v9 = vshrl.u32 %v5355_v17, 16  ;;  %v1204_v5 = vshrl.u32 %v5327_v19, 16  ;;  %v1208_v38 = vrot.slane %v1206_v59, 1  ;;  %v1960_v55 = vrot.slane %v4243_v23, 1 }
  0x77   : > { %1584 = vrot.lane.b32.xlu0 %v1475_v26, %s6522_s16  ;;  %v701_v26 = vsel %vm4981_vm5, %v693_v31, %v700_v28  ;;  %v791_v58 = vld [vmem:[#allocation2 + $0x68] sm:$0x1]  ;;  %v794_v47 = vld [vmem:[#allocation2 + $0x6c] sm:$0xf]  ;;  %v4244_v48 = vcombine.low %v1055_v12, %v5251_v37  ;;  %v1819_v46 = vsel %vm1142_vm11, %v5297_v27, %v1818_v20  ;;  %v1961_v44 = vrot.slane %v5267_v6, 1 }
  0x78   : > { %v992_v49 = vld [vmem:[#allocation2 + $0x48] sm:$0xf]  ;;  %v5388_v51 = vld [vmem:[#allocation2 + $0x4c] sm:$0xf]  ;;  %790 = vst.msk [vmem:[#allocation2 + $0x64] sm:$0xf] %vm548_vm2, %v701_v26  ;;  %v1202_v56 = vsel %vm1142_vm11, %v1197_v33, %v1201_v36  ;;  %v4186_v57 = vcombine.low %v976_v41, %v5307_v40  ;;  %v792_v23 = vsel %vm5000_vm7, %v702_v16, %v791_v58  ;;  %v795_v6 = vsel %vm4989_vm6, %v709_v52, %v794_v47 }
  0x79   : > { %v990_v60 = vld [vmem:[#allocation2 + $0x3c] sm:$0xf]  ;;  %v5396_v50 = vld [vmem:[#allocation2 + $0x40] sm:$0xf]  ;;  %v1213_v11 = vrot.slane %v1211_v29, 1  ;;  %v714_v27 = vrot.slane %v712_v9, 7  ;;  %v1209_v62 = vor.u32 %v1208_v38, %v1204_v5  ;;  %v5406_v40 = vcombine.low %v992_v49, %v5388_v51 }
  0x7a   : > { %1910 = vrot.lane.b32.xlu1 %v1831_v45, %s6524_s14  ;;  %v975_v37 = vld [vmem:[#allocation2 + $0x30] sm:$0xe]  ;;  %v889_v63 = vld [vmem:[#allocation2 + $0x54] sm:$0x1]  ;;  %793 = vst [vmem:[#allocation2 + $0x68] sm:$0x1] %v792_v23  ;;  %v5412_v2 = vcombine.low %v990_v60, %v5396_v50 }
  0x7b   : > { %1738 = vrot.lane.b32.xlu0 %v5237_v25, %s6523_s23  ;;  %v890_v53 = vsel %vm5000_vm7, 0, %v889_v63  ;;  %v715_v25 = vshll.u32 %v5355_v17, 16  ;;  %796 = vst [vmem:[#allocation2 + $0x6c] sm:$0xf] %v795_v6  ;;  %v1963_v0 = vrot.slane %v4244_v48, 1  ;;  %v710_v4 = vrot.slane %v5357_v22, 4 }
  0x7c   : > { %891 = vst [vmem:[#allocation2 + $0x54] sm:$0x1] %v890_v53  ;;  %v926_v61 = vld [vmem:[#allocation2 + $0x5c] sm:$0x1]  ;;  %v1964_v59 = vrot.slane %v5301_v30, 1  ;;  %v4185_v8 = vcombine.low %v975_v37, %v5241_v15  ;;  %v1329_v17 = vrot.slane %v4186_v57, 1  ;;  %v1962_v22 = vsel %vm1313_vm9, %v1960_v55, %v1961_v44 }
  0x7d   : > { %v927_v31 = vsel %vm5035_vm8, 0, %v926_v61  ;;  %v798_v20 = vld [vmem:[#allocation2 + $0x74] sm:$0x1]  ;;  %v1330_v21 = vrot.slane %v5349_v42, 1  ;;  %v717_v24 = vor.u32 %v715_v25, %v714_v27  ;;  %v719_v10 = vrot.slane %v714_v27, 4 }
  0x7e   : > { %1271 = vrot.lane.b32.xlu1 %v1202_v56, %s6501_s20  ;;  %928 = vst [vmem:[#allocation2 + $0x5c] sm:$0x1] %v927_v31  ;;  %v1214_v30 = vsel %vm1142_vm11, %v1209_v62, %v1213_v11  ;;  %v1527_v15 = vshll.u32 %v5406_v40, 16  ;;  %v5425_v28 = vld [vmem:[#allocation2 + $0x50] ss:$0 sps:$4 sm:$0x11]   ;;  %v1965_v39 = vsel %vm1313_vm9, %v1963_v0, %v1964_v59 }
  0x7f   : > { %1908 = vrot.lane.b32.xlu0 %v1819_v46, %s6524_s14  ;;  %v1515_v33 = vshll.u32 %v5412_v2, 16  ;;  %v718_v36 = vsel %vm4981_vm5, %v710_v4, %v717_v24  ;;  %v799_v12 = vsel %vm5000_vm7, %v719_v10, %v798_v20  ;;  %v5432_v42 = vld [vmem:[#allocation2 + $0x44] ss:$0 sps:$4 sm:$0x11]   ;;  %v1326_v14 = vrot.slane %v4185_v8, 1 }
  0x80   : > { %797 = vst.msk [vmem:[#allocation2 + $0x70] sm:$0xf] %vm548_vm2, %v718_v36  ;;  %800 = vst [vmem:[#allocation2 + $0x74] sm:$0x1] %v799_v12  ;;  %v1327_v29 = vrot.slane %v5303_v32, 1  ;;  %v1331_v52 = vsel %vm1313_vm9, %v1329_v17, %v1330_v21  ;;  %v1525_v9 = vshrl.u32 %v5406_v40, 16 }
  0x81   : > { %v1016_v41 = vld [vmem:[#allocation2 + $0x3c] sm:$0xe]  ;;  %v892_v16 = vld [vmem:[#allocation2 + $0x60] sm:$0x1]  ;;  %v1529_v45 = vrot.slane %v1527_v15, 1  ;;  %v1532_v5 = vshll.u32 %v5425_v28, 16 }
  0x82   : > { %1273 = vrot.lane.b32.xlu1 %v1214_v30, %s6501_s20  ;;  %v1017_v38 = vld [vmem:[#allocation2 + $0x48] sm:$0xe]  ;;  %v1513_v26 = vshrl.u32 %v5412_v2, 16  ;;  %v1517_v58 = vrot.slane %v1515_v33, 1  ;;  %v5443_v55 = vld [vmem:[#allocation2 + $0x58] sm:$0xf]  ;;  %v4215_v32 = vcombine.low %v1016_v41, %v5396_v50  ;;  %v1328_v60 = vsel %vm1313_vm9, %v1326_v14, %v1327_v29 }
  0x83   : > { %1988 = vrot.lane.b32.xlu0 %v1962_v22, %s6525_s19  ;;  %v1032_v47 = vld [vmem:[#allocation2 + $0x54] sm:$0xf]  ;;  %v1520_v48 = vshll.u32 %v5432_v42, 16  ;;  %v893_v49 = vsel %vm5000_vm7, 0, %v892_v16  ;;  %v929_v46 = vld [vmem:[#allocation2 + $0x68] sm:$0x1]  ;;  %v4216_v44 = vcombine.low %v1017_v38, %v5388_v51  ;;  %v1530_v11 = vor.u32 %v1529_v45, %v1525_v9 }
  0x84   : > { %v1030_v56 = vld [vmem:[#allocation2 + $0x48] sm:$0xf]  ;;  %v5452_v57 = vld [vmem:[#allocation2 + $0x4c] sm:$0xf]  ;;  %894 = vst [vmem:[#allocation2 + $0x60] sm:$0x1] %v893_v49  ;;  %v5456_v50 = vcombine.low %v1032_v47, %v5443_v55  ;;  %v1518_v6 = vor.u32 %v1517_v58, %v1513_v26 }
  0x85   : > { %v1534_v37 = vrot.slane %v1532_v5, 1  ;;  %v953_v63 = vld [vmem:[#allocation2 + $0x48] sm:$0xf]  ;;  %v5458_v23 = vld [vmem:[#allocation2 + $0x4c] sm:$0xf]  ;;  %v930_v27 = vsel %vm5035_vm8, 0, %v929_v46  ;;  %v5463_v62 = vcombine.low %v1030_v56, %v5452_v57 }
  0x86   : > { %1354 = vrot.lane.b32.xlu1 %v1331_v52, %s6498_s25  ;;  %v1646_v51 = vrot.slane %v4215_v32, 1  ;;  %931 = vst [vmem:[#allocation2 + $0x68] sm:$0x1] %v930_v27  ;;  %v1522_v53 = vrot.slane %v1520_v48, 1  ;;  %v1649_v25 = vrot.slane %v4216_v44, 1  ;;  %v1650_v0 = vrot.slane %v5425_v28, 1 }
  0x87   : > { %1990 = vrot.lane.b32.xlu0 %v1965_v39, %s6525_s19  ;;  %v5470_v61 = vcombine.low %v953_v63, %v5458_v23  ;;  %v1535_v4 = vsel %vm1142_vm11, %v1530_v11, %v1534_v37  ;;  %v1847_v59 = vshll.u32 %v5456_v50, 16  ;;  %v5475_v8 = vld [vmem:[#allocation2 + $0x5c] ss:$0 sps:$4 sm:$0x11]   ;;  %v5477_v31 = vld [vmem:[#allocation2 + $0x58] sm:$0xf] }
  0x88   : > { %v955_v20 = vld [vmem:[#allocation2 + $0x54] sm:$0xf]  ;;  %v895_v17 = vld [vmem:[#allocation2 + $0x6c] sm:$0x1]  ;;  %v1835_v24 = vshll.u32 %v5463_v62, 16  ;;  %v1523_v30 = vsel %vm1142_vm11, %v1518_v6, %v1522_v53  ;;  %v1651_v15 = vsel %vm1313_vm9, %v1649_v25, %v1650_v0  ;;  %v1845_v12 = vshrl.u32 %v5456_v50, 16 }
  0x89   : > { %v932_v21 = vld [vmem:[#allocation2 + $0x74] sm:$0x1]  ;;  %v5481_v10 = vld [vmem:[#allocation2 + $0x50] ss:$0 sps:$4 sm:$0x11]   ;;  %v896_v22 = vsel %vm5000_vm7, 0, %v895_v17 }
  0x8a   : > { %1424 = vrot.lane.b32.xlu1 %v5406_v40, %s6526_s22  ;;  %v1647_v40 = vrot.slane %v5432_v42, 1  ;;  %v5490_v28 = vld [vmem:[#allocation2 + $0x50] ss:$0 sps:$4 sm:$0x11]   ;;  %v1218_v33 = vshll.u32 %v5470_v61, 16  ;;  %v933_v36 = vsel %vm5035_vm8, 0, %v932_v21 }
  0x8b   : > { %1352 = vrot.lane.b32.xlu0 %v1328_v60, %s6498_s25  ;;  %897 = vst [vmem:[#allocation2 + $0x6c] sm:$0x1] %v896_v22  ;;  %v1849_v42 = vrot.slane %v1847_v59, 1  ;;  %v1852_v39 = vshll.u32 %v5475_v8, 16  ;;  %934 = vst [vmem:[#allocation2 + $0x74] sm:$0x1] %v933_v36 }
  0x8c   : > { %v1056_v14 = vld [vmem:[#allocation2 + $0x48] sm:$0xe]  ;;  %s5502_s25 = scalar_select %p801_p7, 1, 0  ;;  %v1833_v29 = vshrl.u32 %v5463_v62, 16  ;;  %v1837_v41 = vrot.slane %v1835_v24, 1  ;;  %v1648_v38 = vsel %vm1313_vm9, %v1646_v51, %v1647_v40 }
  0x8d   : > { %v1216_v16 = vshrl.u32 %v5470_v61, 16  ;;  %v1840_v52 = vshll.u32 %v5481_v10, 16  ;;  %v1220_v9 = vrot.slane %v1218_v33, 1  ;;  %v1223_v45 = vshll.u32 %v5490_v28, 16  ;;  %s4157_s20 = sshll.u32 %s5168_s24, 2 }
  0x8e   : > { %1594 = vrot.lane.b32.xlu1 %v1535_v4, %s6522_s16  ;;  %v5510_v5 = vld [vmem:[#allocation2 + $0x5c] ss:$0 sps:$4 sm:$0x11]   ;;  %v1850_v26 = vor.u32 %v1849_v42, %v1845_v12  ;;  %v1854_v58 = vrot.slane %v1852_v39, 1  ;;  %v1057_v48 = vld [vmem:[#allocation2 + $0x54] sm:$0xe]  ;;  %v1838_v46 = vor.u32 %v1837_v41, %v1833_v29  ;;  %v4245_v44 = vcombine.low %v1056_v14, %v5452_v57  ;;  %s5530_s1 = scalar_lea.vmem %s6475_s2, %s4157_s20 }
  0x8f   : > { %1422 = vrot.lane.b32.xlu0 %v5412_v2, %s6526_s22  ;;  %v5498_v2 = vcombine.low %v955_v20, %v5477_v31  ;;  %v977_v32 = vld [vmem:[#allocation2 + $0x48] sm:$0xe]  ;;  %v978_v49 = vld [vmem:[#allocation2 + $0x54] sm:$0xe]  ;;  %v5516_v60 = vld [vmem:[#allocation2 + $0x58] sm:$0xf]  ;;  %v1221_v63 = vor.u32 %v1220_v9, %v1216_v16  ;;  %v807_v51 = vstv %s5502_s25 }
  0x90   : > { %v994_v56 = vld [vmem:[#allocation2 + $0x54] sm:$0xf]  ;;  %v5518_v11 = vld [vmem:[#allocation2 + $0x64] sm:$0xf]  ;;  %v1842_v37 = vrot.slane %v1840_v52, 1  ;;  %v1225_v27 = vrot.slane %v1223_v45, 1  ;;  %v1855_v53 = vsel %vm1142_vm11, %v1850_v26, %v1854_v58  ;;  %v4187_v4 = vcombine.low %v977_v32, %v5458_v23 }
  0x91   : > { %v1230_v47 = vshll.u32 %v5498_v2, 16  ;;  %v996_v6 = vld [vmem:[#allocation2 + $0x60] sm:$0xf]  ;;  %v1228_v25 = vshrl.u32 %v5498_v2, 16  ;;  %v1235_v0 = vshll.u32 %v5510_v5, 16  ;;  %v5535_v59 = vcombine.low %v994_v56, %v5516_v60 }
  0x92   : > { %1674 = vrot.lane.b32.xlu1 %v1651_v15, %s4841_s26  ;;  %v4188_v20 = vcombine.low %v978_v49, %v5477_v31  ;;  %v5539_v17 = vcombine.low %v996_v6, %v5518_v11  ;;  %v1966_v21 = vrot.slane %v4245_v44, 1  ;;  %v1967_v40 = vrot.slane %v5481_v10, 1  ;;  %v802_v24 = vld [vmem:[%s5530_s1] sm:$0xf]  ;;  %v803_v15 = vld [vmem:[%s5530_s1 + $0x4] sm:$0xf] }
  0x93   : > { %1592 = vrot.lane.b32.xlu0 %v1523_v30, %s6522_s16  ;;  %v1232_v57 = vrot.slane %v1230_v47, 1  ;;  %vm5546_vm12 = vcmp.eq.s32.totalorder %v807_v51, 1  ;;  %v1843_v23 = vsel %vm1142_vm11, %v1838_v46, %v1842_v37  ;;  %v1226_v31 = vsel %vm1142_vm11, %v1221_v63, %v1225_v27  ;;  %v5555_v10 = vld [vmem:[#allocation2 + $0x5c] ss:$0 sps:$4 sm:$0x11]  }
  0x94   : > { %v1237_v30 = vrot.slane %v1235_v0, 1  ;;  %v1332_v36 = vrot.slane %v4187_v4, 1  ;;  %v1335_v12 = vrot.slane %v4188_v20, 1  ;;  %v1551_v42 = vshll.u32 %v5539_v17, 16  ;;  %v854_v49 = vld [vmem:[#allocation2 + $0x78] sm:$0xf] }
  0x95   : > { %v1233_v22 = vor.u32 %v1232_v57, %v1228_v25  ;;  %v809_v39 = vsel %vm5546_vm12, 0, %v802_v24  ;;  %v1968_v14 = vsel %vm1313_vm9, %v1966_v21, %v1967_v40  ;;  %v1970_v29 = vrot.slane %v5475_v8, 1  ;;  %v5564_v16 = vld [vmem:[#allocation2 + $0x68] ss:$0 sps:$4 sm:$0x11]  }
  0x96   : > { %1744 = vrot.lane.b32.xlu1 %v5456_v50, %s6523_s23  ;;  %v4246_v50 = vcombine.low %v1057_v48, %v5443_v55  ;;  %v1333_v41 = vrot.slane %v5490_v28, 1  ;;  %v810_v52 = vsel %vm5546_vm12, 0, %v803_v15  ;;  %v1336_v45 = vrot.slane %v5510_v5, 1  ;;  %v1019_v56 = vld [vmem:[#allocation2 + $0x60] sm:$0xe] }
  0x97   : > { %1672 = vrot.lane.b32.xlu0 %v1648_v38, %s4841_s26  ;;  %v1238_v9 = vsel %vm1142_vm11, %v1233_v22, %v1237_v30  ;;  %v5570_v38 = vld [vmem:[#allocation2 + $0x54] sm:$0xe]  ;;  %v814_v26 = vshrl.u32 %v809_v39, 16  ;;  %v817_v58 = vshll.u32 %v809_v39, 16  ;;  %v1537_v47 = vshrl.u32 %v5535_v59, 16 }
  0x98   : > { %v1969_v33 = vrot.slane %v4246_v50, 1  ;;  %v822_v32 = vshrl.u32 %v810_v52, 16  ;;  %v825_v8 = vshll.u32 %v810_v52, 16  ;;  %v1544_v28 = vshll.u32 %v5555_v10, 16  ;;  %v858_v5 = vld [vmem:[#allocation2 + $0x80] sm:$0x1] }
  0x99   : > { %v1549_v46 = vshrl.u32 %v5539_v17, 16  ;;  %v1553_v44 = vrot.slane %v1551_v42, 1  ;;  %v816_v37 = vrot.slane %v814_v26, 7  ;;  %v1334_v63 = vsel %vm1313_vm9, %v1332_v36, %v1333_v41  ;;  %v1034_v51 = vld [vmem:[#allocation2 + $0x60] sm:$0xf] }
  0x9a   : > { %1914 = vrot.lane.b32.xlu1 %v1855_v53, %s6524_s14  ;;  %v1556_v27 = vshll.u32 %v5564_v16, 16  ;;  %v4217_v6 = vcombine.low %v5570_v38, %v5516_v60  ;;  %v5581_v53 = vld [vmem:[#allocation2 + $0x64] sm:$0xf]  ;;  %v824_v25 = vrot.slane %v822_v32, 7  ;;  %v1971_v57 = vsel %vm1313_vm9, %v1969_v33, %v1970_v29  ;;  %v804_v20 = vld [vmem:[%s5530_s1 + $0x8] sm:$0xf] }
  0x9b   : > { %1742 = vrot.lane.b32.xlu0 %v5463_v62, %s6523_s23  ;;  %v1539_v62 = vshll.u32 %v5535_v59, 16  ;;  %v1337_v0 = vsel %vm1313_vm9, %v1335_v12, %v1336_v45  ;;  %v819_v50 = vor.u32 %v817_v58, %v816_v37  ;;  %v820_v4 = vrot.slane %v816_v37, 4  ;;  %v805_v21 = vld [vmem:[%s5530_s1 + $0xc] sm:$0xf]  ;;  %s6530_s1 = smov 8  }
  0x9c   : > { %v4218_v24 = vcombine.low %v1019_v56, %v5518_v11  ;;  %v827_v22 = vor.u32 %v825_v8, %v824_v25  ;;  %v829_v60 = vrot.slane %v824_v25, 4  ;;  %v1546_v30 = vrot.slane %v1544_v28, 1  ;;  %v957_v12 = vld [vmem:[#allocation2 + $0x60] sm:$0xf]  ;;  %v5600_v42 = vld [vmem:[#allocation2 + $0x64] sm:$0xf] }
  0x9d   : > { %v1541_v48 = vrot.slane %v1539_v62, 1  ;;  %v1554_v15 = vor.u32 %v1553_v44, %v1549_v46  ;;  %v5591_v36 = vcombine.low %v1034_v51, %v5581_v53  ;;  %v855_v33 = vsel %vm4989_vm6, %v819_v50, %v854_v49  ;;  %v4665_v62 = vld [vmem:[%s6476_s3 + $0x10] ss:$0 sps:$4 sm:$0x33]   ;;  %v865_v46 = vld [vmem:[#allocation2 + $0x8c] sm:$0x1] }
  0x9e   : > { %1275 = vrot.lane.b32.xlu1 %v1226_v31, %s6529_s0  ;;  %v5588_v31 = vld [vmem:[#allocation2 + $0x70] sm:$0xf]  ;;  %v1558_v11 = vrot.slane %v1556_v27, 1  ;;  %v828_v39 = vsel %vm4981_vm5, %v820_v4, %v827_v22  ;;  %856 = vst [vmem:[#allocation2 + $0x78] sm:$0xf] %v855_v33  ;;  %v811_v29 = vsel %vm5546_vm12, 0, %v804_v20  ;;  %v5620_v49 = vcombine.low %v957_v12, %v5600_v42  ;;  %4505 = vmatprep.subr.msk.bf16.mxu0 %vm2220_vm13, %v4665_v62 }
  0x9f   : > { %1912 = vrot.lane.b32.xlu0 %v1843_v23, %s6524_s14  ;;  %v1542_v40 = vor.u32 %v1541_v48, %v1537_v47  ;;  %v1036_v23 = vld [vmem:[#allocation2 + $0x6c] sm:$0xf]  ;;  %857 = vst.msk [vmem:[#allocation2 + $0x7c] sm:$0xf] %vm548_vm2, %v828_v39  ;;  %v812_v52 = vsel %vm5546_vm12, 0, %v805_v21  ;;  %v834_v45 = vshll.u32 %v811_v29, 16 }
  0xa0   : > { %v5609_v41 = vcombine.low %v1036_v23, %v5588_v31  ;;  %v1655_v38 = vrot.slane %v4218_v24, 1  ;;  %v839_v26 = vshrl.u32 %v812_v52, 16  ;;  %v842_v58 = vshll.u32 %v812_v52, 16  ;;  %v861_v47 = vld [vmem:[#allocation2 + $0x84] sm:$0xf] }
  0xa1   : > { %v1656_v48 = vrot.slane %v5564_v16, 1  ;;  %v2222_v55 = vsel %vm2220_vm13, %v4665_v62, 0  ;;  %v1652_v44 = vrot.slane %v4217_v6, 1  ;;  %v1653_v16 = vrot.slane %v5555_v10, 1  ;;  %v5629_v37 = vld [vmem:[#allocation2 + $0x70] sm:$0xf] }
  0xa2   : > { %1277 = vrot.lane.b32.xlu1 %v1238_v9, %s6529_s0  ;;  %v831_v9 = vshrl.u32 %v811_v29, 16  ;;  %v1859_v56 = vshll.u32 %v5591_v36, 16  ;;  %v1559_v27 = vsel %vm1142_vm11, %v1554_v15, %v1558_v11  ;;  %v1871_v51 = vshll.u32 %v5609_v41, 16  ;;  %v5633_v25 = vld [vmem:[#allocation2 + $0x74] ss:$0 sps:$4 sm:$0x11]   ;;  %4462 = vmatpush3.bf16.msra.mxu0 %v2222_v55 }
  0xa3   : > { %1992 = vrot.lane.b32.xlu0 %v1968_v14, %s6525_s19  ;;  %v859_v14 = vsel %vm5000_vm7, %v829_v60, %v858_v5  ;;  %v841_v5 = vrot.slane %v839_v26, 7  ;;  %v1547_v10 = vsel %vm1142_vm11, %v1542_v40, %v1546_v30  ;;  %v1657_v4 = vsel %vm1313_vm9, %v1655_v38, %v1656_v48  ;;  %v5643_v24 = vld [vmem:[#allocation2 + $0x68] ss:$0 sps:$4 sm:$0x11]  }
  0xa4   : > { %860 = vst [vmem:[#allocation2 + $0x80] sm:$0x1] %v859_v14  ;;  %v833_v28 = vrot.slane %v831_v9, 7  ;;  %v1242_v23 = vshll.u32 %v5620_v49, 16  ;;  %v1869_v40 = vshrl.u32 %v5609_v41, 16  ;;  %v1873_v11 = vrot.slane %v1871_v51, 1 }
  0xa5   : > { %v844_v6 = vor.u32 %v842_v58, %v841_v5  ;;  %v846_v50 = vrot.slane %v841_v5, 4  ;;  %v898_v22 = vld [vmem:[#allocation2 + $0x78] sm:$0x1]  ;;  %v1876_v12 = vshll.u32 %v5633_v25, 16  ;;  %v1857_v14 = vshrl.u32 %v5591_v36, 16 }
  0xa6   : > { %1358 = vrot.lane.b32.xlu1 %v1337_v0, %s6530_s1  ;;  %v837_v0 = vrot.slane %v833_v28, 4  ;;  %v899_v30 = vsel %vm5000_vm7, 0, %v898_v22  ;;  %v1861_v29 = vrot.slane %v1859_v56, 1  ;;  %v1240_v38 = vshrl.u32 %v5620_v49, 16  ;;  %v5690_v22 = vld [vmem:[#allocation2 + $0x7c] sm:$0xf] }
  0xa7   : > { %1994 = vrot.lane.b32.xlu0 %v1971_v57, %s6525_s19  ;;  %v836_v57 = vor.u32 %v834_v45, %v833_v28  ;;  %v866_v62 = vsel %vm5000_vm7, %v846_v50, %v865_v46  ;;  %900 = vst [vmem:[#allocation2 + $0x78] sm:$0x1] %v899_v30  ;;  %v1058_v45 = vld [vmem:[#allocation2 + $0x60] sm:$0xe]  ;;  %v1244_v26 = vrot.slane %v1242_v23, 1  ;;  %v1247_v58 = vshll.u32 %v5643_v24, 16 }
  0xa8   : > { %v845_v33 = vsel %vm4981_vm5, %v837_v0, %v844_v6  ;;  %867 = vst [vmem:[#allocation2 + $0x8c] sm:$0x1] %v866_v62  ;;  %v1874_v48 = vor.u32 %v1873_v11, %v1869_v40  ;;  %v1878_v28 = vrot.slane %v1876_v12, 1  ;;  %v5676_v55 = vld [vmem:[#allocation2 + $0x74] ss:$0 sps:$4 sm:$0x11]   ;;  %v1862_v5 = vor.u32 %v1861_v29, %v1857_v14 }
  0xa9   : > { %v862_v60 = vsel %vm4989_vm6, %v836_v57, %v861_v47  ;;  %864 = vst.msk [vmem:[#allocation2 + $0x88] sm:$0xf] %vm548_vm2, %v845_v33  ;;  %v1654_v47 = vsel %vm1313_vm9, %v1652_v44, %v1653_v16  ;;  %v4247_v51 = vcombine.low %v1058_v45, %v5581_v53  ;;  %v1059_v0 = vld [vmem:[#allocation2 + $0x6c] sm:$0xe]  ;;  %v1245_v44 = vor.u32 %v1244_v26, %v1240_v38  ;;  %v999_v38 = vld [vmem:[#allocation2 + $0x70] sm:$0xf] }
  0xaa   : > { %1428 = vrot.lane.b32.xlu1 %v5539_v17, %s6526_s22  ;;  %v959_v17 = vld [vmem:[#allocation2 + $0x6c] sm:$0xf]  ;;  %863 = vst [vmem:[#allocation2 + $0x84] sm:$0xf] %v862_v60  ;;  %v1249_v16 = vrot.slane %v1247_v58, 1  ;;  %v1259_v23 = vshll.u32 %v5676_v55, 16 }
  0xab   : > { %1356 = vrot.lane.b32.xlu0 %v1334_v63, %s6530_s1  ;;  %v5635_v63 = vld [vmem:[#allocation2 + $0x68] ss:$0 sps:$4 sm:$0x11]   ;;  %v935_v15 = vld [vmem:[#allocation2 + $0x80] sm:$0x1]  ;;  %v1972_v30 = vrot.slane %v4247_v51, 1 }
  0xac   : > { %v936_v39 = vsel %vm5035_vm8, 0, %v935_v15  ;;  %v1864_v52 = vshll.u32 %v5635_v63, 16  ;;  %v980_v50 = vld [vmem:[#allocation2 + $0x6c] sm:$0xe]  ;;  %v4248_v15 = vcombine.low %v1059_v0, %v5588_v31  ;;  %v1973_v11 = vrot.slane %v5635_v63, 1 }
  0xad   : > { %v5615_v32 = vpop.permute.xlu0 %1734  ;;  %937 = vst [vmem:[#allocation2 + $0x80] sm:$0x1] %v936_v39  ;;  %v1250_v12 = vsel %vm1142_vm11, %v1245_v44, %v1249_v16  ;;  %v979_v39 = vld [vmem:[#allocation2 + $0x60] sm:$0xe]  ;;  %v4190_v31 = vcombine.low %v980_v50, %v5629_v37  ;;  %v998_v45 = vld [vmem:[#allocation2 + $0x6c] sm:$0xf] }
  0xae   : > { %v5617_v8 = vpop.permute.xlu1 %1416  ;;  %1598 = vrot.lane.b32.xlu1 %v1559_v27, %s6522_s16  ;;  %v1866_v27 = vrot.slane %v1864_v52, 1  ;;  %v1000_v60 = vld [vmem:[#allocation2 + $0x78] sm:$0xf]  ;;  %v1261_v52 = vrot.slane %v1259_v23, 1  ;;  %v4189_v26 = vcombine.low %v979_v39, %v5600_v42  ;;  %v1974_v63 = vsel %vm1313_vm9, %v1972_v30, %v1973_v11 }
  0xaf   : > { %1426 = vrot.lane.b32.xlu0 %v5535_v59, %s6526_s22  ;;  %v5660_v59 = vcombine.low %v959_v17, %v5629_v37  ;;  %v938_v40 = vld [vmem:[#allocation2 + $0x8c] sm:$0x1]  ;;  %v1975_v58 = vrot.slane %v4248_v15, 1  ;;  %v1976_v1 = vrot.slane %v5633_v25, 1  ;;  %v1339_v0 = vrot.slane %v5643_v24, 1 }
  0xb0   : > { %v1867_v62 = vsel %vm1142_vm11, %v1862_v5, %v1866_v27  ;;  %v939_v14 = vsel %vm5035_vm8, 0, %v938_v40  ;;  %v1342_v5 = vrot.slane %v5676_v55, 1  ;;  %v1338_v51 = vrot.slane %v4189_v26, 1  ;;  %v4655_v44 = vld [vmem:[#allocation2 + $0x74] ss:$0 sps:$4 sm:$0x11]  }
  0xb1   : > { %v5639_v20 = vpop.permute.xlu0 %1418  ;;  %v1254_v56 = vshll.u32 %v5660_v59, 16  ;;  %v901_v17 = vld [vmem:[#allocation2 + $0x84] sm:$0x1]  ;;  %v1252_v6 = vshrl.u32 %v5660_v59, 16  ;;  %940 = vst [vmem:[#allocation2 + $0x8c] sm:$0x1] %v939_v14 }
  0xb2   : > { %v5641_v21 = vpop.permute.xlu1 %1736  ;;  %1678 = vrot.lane.b32.xlu1 %v1657_v4, %s4841_s26  ;;  %v1879_v4 = vsel %vm1142_vm11, %v1874_v48, %v1878_v28  ;;  %v4199_v48 = vcombine.low %v998_v45, %v999_v38  ;;  %v1021_v55 = vld [vmem:[#allocation2 + $0x78] sm:$0xe]  ;;  %v1041_v23 = vld [vmem:[#allocation2 + $0x88] sm:$0xf]  ;;  %v1340_v24 = vsel %vm1313_vm9, %v1338_v51, %v1339_v0  ;;  %v1568_v15 = vshll.u32 %v4655_v44, 16 }
  0xb3   : > { %1596 = vrot.lane.b32.xlu0 %v1547_v10, %s6522_s16  ;;  %v902_v10 = vsel %vm5000_vm7, 0, %v901_v17  ;;  %v1256_v53 = vrot.slane %v1254_v56, 1  ;;  %v1341_v56 = vrot.slane %v4190_v31, 1  ;;  %v1977_v17 = vsel %vm1313_vm9, %v1975_v58, %v1976_v1  ;;  %v1038_v14 = vld [vmem:[#allocation2 + $0x78] sm:$0xf] }
  0xb4   : > { %903 = vst [vmem:[#allocation2 + $0x84] sm:$0x1] %v902_v10  ;;  %v4656_v27 = vld [vmem:[#allocation2 + $0x80] ss:$0 sps:$4 sm:$0x11]   ;;  %v1563_v25 = vshll.u32 %v4199_v48, 16  ;;  %v4220_v39 = vcombine.low %v1021_v55, %v5690_v22 }
  0xb5   : > { %v5674_v46 = vpop.permute.xlu0 %1984  ;;  %v1257_v29 = vor.u32 %v1256_v53, %v1252_v6  ;;  %v1343_v16 = vsel %vm1313_vm9, %v1341_v56, %v1342_v5  ;;  %v1580_v10 = vshll.u32 %v4656_v27, 16  ;;  %v1561_v40 = vshrl.u32 %v4199_v48, 16 }
  0xb6   : > { %v5667_v9 = vpop.permute.xlu1 %1420  ;;  %1748 = vrot.lane.b32.xlu1 %v5609_v41, %s6523_s23  ;;  %v1565_v30 = vrot.slane %v1563_v25, 1  ;;  %v1570_v45 = vrot.slane %v1568_v15, 1  ;;  %v1661_v56 = vrot.slane %v4220_v39, 1  ;;  %v1662_v5 = vrot.slane %v4656_v27, 1  ;;  %v1061_v25 = vld [vmem:[#allocation2 + $0x84] sm:$0xe] }
  0xb7   : > { %1676 = vrot.lane.b32.xlu0 %v1654_v47, %s4841_s26  ;;  %v1262_v37 = vsel %vm1142_vm11, %v1257_v29, %v1261_v52  ;;  %v1039_v29 = vld [vmem:[#allocation2 + $0x7c] sm:$0xf]  ;;  %v1659_v0 = vrot.slane %v4655_v44, 1  ;;  %vm2088_vm8 = vcmask 162816   ;;  %vm2130_vm10 = vcmask 228352  }
  0xb8   : > { %v1566_v31 = vor.u32 %v1565_v30, %v1561_v40  ;;  %v4229_v58 = vcombine.low %v1038_v14, %v1039_v29  ;;  %vm2151_vm12 = vcmask 261120  }
  0xb9   : > { %v5692_v41 = vpop.permute.xlu0 %1986 }
  0xba   : > { %v5680_v57 = vpop.permute.xlu1 %1666  ;;  %1918 = vrot.lane.b32.xlu1 %v1879_v4, %s6524_s14  ;;  %v1571_v51 = vsel %vm1142_vm11, %v1566_v31, %v1570_v45  ;;  %v1881_v44 = vshrl.u32 %v4229_v58, 16 }
  0xbb   : > { %1746 = vrot.lane.b32.xlu0 %v5591_v36, %s6523_s23  ;;  %v4200_v36 = vcombine.low %v1000_v60, %v5690_v22  ;;  %v1040_v53 = vld [vmem:[#allocation2 + $0x84] sm:$0xf] }
  0xbc   : > { %v4230_v52 = vcombine.low %v1040_v53, %v1041_v23  ;;  %v4250_v53 = vcombine.low %v1061_v25, %v1041_v23 }
  0xbd   : > { %v5715_v28 = vpop.permute.xlu0 %1348  ;;  %v1575_v42 = vshll.u32 %v4200_v36, 16  ;;  %v1573_v6 = vshrl.u32 %v4200_v36, 16 }
  0xbe   : > { %v5695_v33 = vpop.permute.xlu1 %1350  ;;  %1279 = vrot.lane.b32.xlu1 %v1250_v12, %s6529_s0  ;;  %v1582_v12 = vrot.slane %v1580_v10, 1  ;;  %v1895_v22 = vshll.u32 %v4230_v52, 16  ;;  %v1981_v14 = vrot.slane %v4250_v53, 1 }
  0xbf   : > { %1916 = vrot.lane.b32.xlu0 %v1867_v62, %s6524_s14  ;;  %v1577_v50 = vrot.slane %v1575_v42, 1  ;;  %v1020_v62 = vld [vmem:[#allocation2 + $0x6c] sm:$0xe]  ;;  %v4662_v42 = vld [vmem:[#allocation2 + $0x8c] ss:$0 sps:$4 sm:$0x11]  }
  0xc0   : > { %v1897_v10 = vrot.slane %v1895_v22, 1  ;;  %v1900_v27 = vshll.u32 %v4662_v42, 16  ;;  %v1982_v23 = vrot.slane %v4662_v42, 1 }
  0xc1   : > { %v5725_v60 = vpop.permute.xlu0 %1668  ;;  %v1578_v11 = vor.u32 %v1577_v50, %v1573_v6  ;;  %v4661_v6 = vld [vmem:[#allocation2 + $0x80] ss:$0 sps:$4 sm:$0x11]   ;;  %v1893_v50 = vshrl.u32 %v4230_v52, 16 }
  0xc2   : > { %v5712_v47 = vpop.permute.xlu1 %1586  ;;  %1281 = vrot.lane.b32.xlu1 %v1262_v37, %s6529_s0  ;;  %v1888_v40 = vshll.u32 %v4661_v6, 16  ;;  %v1902_v15 = vrot.slane %v1900_v27, 1  ;;  %v1979_v22 = vrot.slane %v4661_v6, 1 }
  0xc3   : > { %1996 = vrot.lane.b32.xlu0 %v1974_v63, %s6525_s19  ;;  %v4219_v63 = vcombine.low %v1020_v62, %v999_v38  ;;  %v1583_v37 = vsel %vm1142_vm11, %v1578_v11, %v1582_v12  ;;  %v1898_v30 = vor.u32 %v1897_v10, %v1893_v50  ;;  %v1060_v62 = vld [vmem:[#allocation2 + $0x78] sm:$0xe] }
  0xc4   : > { %v4249_v39 = vcombine.low %v1060_v62, %v1039_v29  ;;  %v1890_v45 = vrot.slane %v1888_v40, 1 }
  0xc6   : > { %v5723_v4 = vpop.permute.xlu1 %1906  ;;  %1362 = vrot.lane.b32.xlu1 %v1343_v16, %s6530_s1  ;;  %v1663_v16 = vsel %vm1313_vm9, %v1661_v56, %v1662_v5  ;;  %v1978_v5 = vrot.slane %v4249_v39, 1 }
  0xc7   : > { %1998 = vrot.lane.b32.xlu0 %v1977_v17, %s6525_s19  ;;  %v1883_v17 = vshll.u32 %v4229_v58, 16 }
  0xc8   : > { %v1980_v29 = vsel %vm1313_vm9, %v1978_v5, %v1979_v22 }
  0xca   : > { %1432 = vrot.lane.b32.xlu1 %v4200_v36, %s6526_s22  ;;  %v5733_v26 = vpop.permute.xlu1 %1267  ;;  %v1658_v36 = vrot.slane %v4219_v63, 1  ;;  %v1903_v63 = vsel %vm1142_vm11, %v1898_v30, %v1902_v15 }
  0xcb   : > { %1360 = vrot.lane.b32.xlu0 %v1340_v24, %s6530_s1  ;;  %v1885_v24 = vrot.slane %v1883_v17, 1  ;;  %v2010_v6 = vsel %vm2004_vm14, %v5155_v34, %v5733_v26 }
  0xcc   : > { %v2031_v34 = vsel %vm2025_vm15, %v2010_v6, %v5715_v28 }
  0xcd   : > { %v1886_v31 = vor.u32 %v1885_v24, %v1881_v44  ;;  %v2052_v28 = vsel %vm2046_vm0, %v2031_v34, %v5639_v20 }
  0xce   : > { %v5735_v1 = vpop.permute.xlu0 %1414  ;;  %1602 = vrot.lane.b32.xlu1 %v1583_v37, %s6522_s16  ;;  %v5744_v55 = vpop.permute.xlu1 %1269 }
  0xcf   : > { %1430 = vrot.lane.b32.xlu0 %v4199_v48, %s6526_s22  ;;  %v1660_v48 = vsel %vm1313_vm9, %v1658_v36, %v1659_v0  ;;  %v1891_v56 = vsel %vm1142_vm11, %v1886_v31, %v1890_v45 }
  0xd2   : > { %v5741_v38 = vpop.permute.xlu0 %1904  ;;  %1682 = vrot.lane.b32.xlu1 %v1663_v16, %s4841_s26  ;;  %v5751_v12 = vpop.permute.xlu1 %1590 }
  0xd3   : > { %1600 = vrot.lane.b32.xlu0 %v1571_v51, %s6522_s16 }
  0xd6   : > { %v1589_v11 = vpop.permute.xlu0 %1588  ;;  %1752 = vrot.lane.b32.xlu1 %v4230_v52, %s6523_s23  ;;  %v1983_v52 = vsel %vm1313_vm9, %v1981_v14, %v1982_v23 }
  0xd7   : > { %1680 = vrot.lane.b32.xlu0 %v1660_v48, %s4841_s26 }
  0xda   : > { %v1665_v37 = vpop.permute.xlu0 %1664  ;;  %1922 = vrot.lane.b32.xlu1 %v1903_v63, %s6524_s14 }
  0xdb   : > { %1750 = vrot.lane.b32.xlu0 %v4229_v58, %s6523_s23 }
  0xdc   : > { %v1345_v51 = vpop.permute.xlu1 %1344 }
  0xde   : > { %2002 = vrot.lane.b32.xlu1 %v1983_v52, %s6525_s19 }
  0xdf   : > { %1920 = vrot.lane.b32.xlu0 %v1891_v56, %s6524_s14  ;;  %s6531_s14 = sand.u32 1, %s4812_s28  }
  0xe0   : > { %v1347_v42 = vpop.permute.xlu1 %1346 }
  0xe1   : > { %v1264_v36 = vpop.permute.xlu0 %1263 }
  0xe2   : > { %v2006_v58 = vsel %vm2004_vm14, %v5295_v3, %v1264_v36 }
  0xe3   : > { %2000 = vrot.lane.b32.xlu0 %v1980_v29, %s6525_s19  ;;  %v2027_v25 = vsel %vm2025_vm15, %v2006_v58, %v1345_v51  ;;  %s5977_s19 = scalar_lea.vmem [#allocation3], %s6531_s14 }
  0xe4   : > { %v1671_v17 = vpop.permute.xlu1 %1670 }
  0xe5   : > { %v1266_v0 = vpop.permute.xlu0 %1265 }
  0xe6   : > { %v2008_v16 = vsel %vm2004_vm14, %v5261_v54, %v1266_v0  ;;  %v2048_v54 = vsel %vm2046_vm0, %v2027_v25, %v5735_v1 }
  0xe7   : > { %v2029_v50 = vsel %vm2025_vm15, %v2008_v16, %v1347_v42 }
  0xe8   : > { %v2050_v3 = vsel %vm2046_vm0, %v2029_v50, %v5617_v8  ;;  %v1741_v48 = vpop.permute.xlu1 %1740 }
  0xe9   : > { %v2071_v10 = vsel %vm2067_vm1, %v2050_v3, %v5712_v47  ;;  %v1585_v27 = vpop.permute.xlu0 %1584 }
  0xea   : > { %v2092_v26 = vsel %vm2088_vm8, %v2071_v10, %v5680_v57  ;;  %v2069_v53 = vsel %vm2067_vm1, %v2048_v54, %v1585_v27  ;;  %v2012_v57 = vsel %vm2004_vm14, %v5158_v35, %v5744_v55 }
  0xeb   : > { %v2090_v8 = vsel %vm2088_vm8, %v2069_v53, %v1665_v37  ;;  %v2113_v47 = vsel %vm2109_vm3, %v2092_v26, %v5641_v21  ;;  %v2033_v20 = vsel %vm2025_vm15, %v2012_v57, %v5695_v33 }
  0xec   : > { %v2111_v44 = vsel %vm2109_vm3, %v2090_v8, %v5615_v32  ;;  %v2134_v1 = vsel %vm2130_vm10, %v2113_v47, %v5723_v4  ;;  %v1911_v30 = vpop.permute.xlu1 %1910  ;;  %v2073_v4 = vsel %vm2067_vm1, %v2052_v28, %v1589_v11 }
  0xed   : > { %v1739_v24 = vpop.permute.xlu0 %1738  ;;  %v2132_v40 = vsel %vm2130_vm10, %v2111_v44, %v5741_v38  ;;  %v2155_v32 = vsel %vm2151_vm12, %v2134_v1, %v5692_v41  ;;  %v2054_v38 = vsel %vm2046_vm0, %v2033_v20, %v5667_v9 }
  0xee   : > { %v2153_v21 = vsel %vm2151_vm12, %v2132_v40, %v5674_v46  ;;  %v2094_v46 = vsel %vm2088_vm8, %v2073_v4, %v5725_v60  ;;  %v2075_v11 = vsel %vm2067_vm1, %v2054_v38, %v5751_v12 }
  0xef   : > { %4463 = vmatprep.mubr.msk.bf16.mxu0 %vm2199_vm4, %v2153_v21  ;;  %v2115_v15 = vsel %vm2109_vm3, %v2094_v46, %v1739_v24  ;;  %v2096_v14 = vsel %vm2088_vm8, %v2075_v11, %v1671_v17 }
  0xf0   : > { %4464 = vmatmul.mubr.msk.bf16.vlgmr.msra.gmra.mrb[0].mxu0 %vm2199_vm4, %v2155_v32  ;;  %v1272_v55 = vpop.permute.xlu1 %1271  ;;  %v2117_v9 = vsel %vm2109_vm3, %v2096_v14, %v1741_v48 }
  0xf1   : > { %v1909_v35 = vpop.permute.xlu0 %1908  ;;  %v2138_v31 = vsel %vm2130_vm10, %v2117_v9, %v1911_v30  ;;  %v2014_v42 = vsel %vm2004_vm14, %v5264_v43, %v1272_v55 }
  0xf2   : > { %v2136_v62 = vsel %vm2130_vm10, %v2115_v15, %v1909_v35 }
  0xf4   : > { %v1274_v39 = vpop.permute.xlu1 %1273 }
  0xf5   : > { %v1989_v41 = vpop.permute.xlu0 %1988  ;;  %v2016_v6 = vsel %vm2004_vm14, %v5327_v19, %v1274_v39 }
  0xf6   : > { %v2157_v33 = vsel %vm2151_vm12, %v2136_v62, %v1989_v41 }
  0xf7   : > { %4467 = vmatprep.mubr.msk.bf16.mxu0 %vm2199_vm4, %v2157_v33 }
  0xf8   : > { %v1355_v45 = vpop.permute.xlu1 %1354 }
  0xf9   : > { %v1991_v60 = vpop.permute.xlu0 %1990  ;;  %v2037_v3 = vsel %vm2025_vm15, %v2016_v6, %v1355_v45 }
  0xfa   : > { %v2159_v63 = vsel %vm2151_vm12, %v2138_v31, %v1991_v60 }
  0xfb   : > { %4468 = vmatmul.mubr.msk.bf16.gmra.mrb[4].mxu0 %vm2199_vm4, %v2159_v63 }
  0xfc   : > { %v1425_v37 = vpop.permute.xlu1 %1424 }
  0xfd   : > { %v1353_v23 = vpop.permute.xlu0 %1352  ;;  %v2058_v27 = vsel %vm2046_vm0, %v2037_v3, %v1425_v37 }
  0xfe   : > { %v2035_v58 = vsel %vm2025_vm15, %v2014_v42, %v1353_v23 }
 0x100   : > { %v1595_v12 = vpop.permute.xlu1 %1594 }
 0x101   : > { %v1423_v56 = vpop.permute.xlu0 %1422  ;;  %v2079_v34 = vsel %vm2067_vm1, %v2058_v27, %v1595_v12 }
 0x102   : > { %v2056_v0 = vsel %vm2046_vm0, %v2035_v58, %v1423_v56 }
 0x104   : > { %v1675_v22 = vpop.permute.xlu1 %1674 }
 0x105   : > { %v1593_v5 = vpop.permute.xlu0 %1592  ;;  %v2100_v53 = vsel %vm2088_vm8, %v2079_v34, %v1675_v22 }
 0x106   : > { %v2077_v16 = vsel %vm2067_vm1, %v2056_v0, %v1593_v5 }
 0x108   : > { %v1745_v51 = vpop.permute.xlu1 %1744 }
 0x109   : > { %v1673_v52 = vpop.permute.xlu0 %1672  ;;  %v2121_v19 = vsel %vm2109_vm3, %v2100_v53, %v1745_v51 }
 0x10a   : > { %v2098_v50 = vsel %vm2088_vm8, %v2077_v16, %v1673_v52 }
 0x10c   : > { %v1915_v36 = vpop.permute.xlu1 %1914 }
 0x10d   : > { %v1743_v29 = vpop.permute.xlu0 %1742  ;;  %v2142_v8 = vsel %vm2130_vm10, %v2121_v19, %v1915_v36 }
 0x10e   : > { %v2119_v10 = vsel %vm2109_vm3, %v2098_v50, %v1743_v29 }
 0x110   : > { %v1276_v25 = vpop.permute.xlu1 %1275 }
 0x111   : > { %v1913_v17 = vpop.permute.xlu0 %1912  ;;  %v2018_v55 = vsel %vm2004_vm14, %v5470_v61, %v1276_v25 }
 0x112   : > { %v2140_v43 = vsel %vm2130_vm10, %v2119_v10, %v1913_v17 }
 0x114   : > { %v1278_v48 = vpop.permute.xlu1 %1277 }
 0x115   : > { %v1993_v54 = vpop.permute.xlu0 %1992  ;;  %v2020_v39 = vsel %vm2004_vm14, %v5498_v2, %v1278_v48 }
 0x116   : > { %v2161_v26 = vsel %vm2151_vm12, %v2140_v43, %v1993_v54 }
 0x117   : > { %4471 = vmatprep.mubr.msk.bf16.mxu0 %vm2199_vm4, %v2161_v26 }
 0x118   : > { %v1359_v44 = vpop.permute.xlu1 %1358 }
 0x119   : > { %v1995_v47 = vpop.permute.xlu0 %1994  ;;  %v2041_v33 = vsel %vm2025_vm15, %v2020_v39, %v1359_v44 }
 0x11a   : > { %v2163_v1 = vsel %vm2151_vm12, %v2142_v8, %v1995_v47 }
 0x11b   : > { %4472 = vmatmul.mubr.msk.bf16.gmra.mrb[8].mxu0 %vm2199_vm4, %v2163_v1 }
 0x11c   : > { %v1429_v57 = vpop.permute.xlu1 %1428 }
 0x11d   : > { %v1357_v28 = vpop.permute.xlu0 %1356  ;;  %v2062_v9 = vsel %vm2046_vm0, %v2041_v33, %v1429_v57 }
 0x11e   : > { %v2039_v38 = vsel %vm2025_vm15, %v2018_v55, %v1357_v28  ;;  %v5883_v28 = vld [vmem:[%s6477_s4] ss:$0 sm:$0xff] }
 0x120   : > { %v1599_v40 = vpop.permute.xlu1 %1598 }
 0x121   : > { %v1427_v24 = vpop.permute.xlu0 %1426  ;;  %v2083_v45 = vsel %vm2067_vm1, %v2062_v9, %v1599_v40 }
 0x122   : > { %v2060_v46 = vsel %vm2046_vm0, %v2039_v38, %v1427_v24 }
 0x124   : > { %v1679_v21 = vpop.permute.xlu1 %1678 }
 0x125   : > { %v1597_v30 = vpop.permute.xlu0 %1596  ;;  %v2104_v23 = vsel %vm2088_vm8, %v2083_v45, %v1679_v21 }
 0x126   : > { %v2081_v41 = vsel %vm2067_vm1, %v2060_v46, %v1597_v30 }
 0x128   : > { %v1749_v4 = vpop.permute.xlu1 %1748 }
 0x129   : > { %v1677_v32 = vpop.permute.xlu0 %1676  ;;  %v2125_v2 = vsel %vm2109_vm3, %v2104_v23, %v1749_v4 }
 0x12a   : > { %v2102_v11 = vsel %vm2088_vm8, %v2081_v41, %v1677_v32 }
 0x12c   : > { %v1919_v35 = vpop.permute.xlu1 %1918 }
 0x12d   : > { %v1747_v20 = vpop.permute.xlu0 %1746  ;;  %v2146_v37 = vsel %vm2130_vm10, %v2125_v2, %v1919_v35 }
 0x12e   : > { %v2123_v14 = vsel %vm2109_vm3, %v2102_v11, %v1747_v20 }
 0x130   : > { %v1280_v62 = vpop.permute.xlu1 %1279 }
 0x131   : > { %v1917_v15 = vpop.permute.xlu0 %1916  ;;  %v2022_v6 = vsel %vm2004_vm14, %v5620_v49, %v1280_v62 }
 0x132   : > { %v2144_v61 = vsel %vm2130_vm10, %v2123_v14, %v1917_v15 }
 0x134   : > { %v1282_v60 = vpop.permute.xlu1 %1281 }
 0x135   : > { %v1997_v31 = vpop.permute.xlu0 %1996  ;;  %v2024_v16 = vsel %vm2004_vm14, %v5660_v59, %v1282_v60 }
 0x136   : > { %v2165_v63 = vsel %vm2151_vm12, %v2144_v61, %v1997_v31  ;;  %v2623_v31 = vld [vmem:[#allocation2 + $0x18] sm:$0xf] }
 0x137   : > { %4475 = vmatprep.mubr.msk.bf16.mxu0 %vm2199_vm4, %v2165_v63 }
 0x138   : > { %v1363_v12 = vpop.permute.xlu1 %1362 }
 0x139   : > { %v1999_v56 = vpop.permute.xlu0 %1998  ;;  %v2045_v50 = vsel %vm2025_vm15, %v2024_v16, %v1363_v12 }
 0x13a   : > { %v2167_v5 = vsel %vm2151_vm12, %v2146_v37, %v1999_v56 }
 0x13b   : > { %4476 = vmatmul.mubr.msk.bf16.gmra.mrb[12].mxu0 %vm2199_vm4, %v2167_v5 }
 0x13c   : > { %v1433_v52 = vpop.permute.xlu1 %1432 }
 0x13d   : > { %v1361_v22 = vpop.permute.xlu0 %1360  ;;  %v2066_v10 = vsel %vm2046_vm0, %v2045_v50, %v1433_v52  ;;  %v4666_v50 = vld [vmem:[#allocation2 + $0xc] sm:$0xf] }
 0x13e   : > { %v2043_v3 = vsel %vm2025_vm15, %v2022_v6, %v1361_v22 }
 0x140   : > { %v1603_v29 = vpop.permute.xlu1 %1602 }
 0x141   : > { %v1431_v51 = vpop.permute.xlu0 %1430  ;;  %v2087_v43 = vsel %vm2067_vm1, %v2066_v10, %v1603_v29 }
 0x142   : > { %v2064_v27 = vsel %vm2046_vm0, %v2043_v3, %v1431_v51  ;;  %v2627_v51 = vld [vmem:[#allocation2 + $0x20] sm:$0x1] }
 0x144   : > { %v1683_v42 = vpop.permute.xlu1 %1682 }
 0x145   : > { %v1601_v36 = vpop.permute.xlu0 %1600  ;;  %v2108_v34 = vsel %vm2088_vm8, %v2087_v43, %v1683_v42 }
 0x146   : > { %v2085_v48 = vsel %vm2067_vm1, %v2064_v27, %v1601_v36 }
 0x148   : > { %v1753_v0 = vpop.permute.xlu1 %1752 }
 0x149   : > { %v1681_v58 = vpop.permute.xlu0 %1680  ;;  %v2129_v49 = vsel %vm2109_vm3, %v2108_v34, %v1753_v0 }
 0x14a   : > { %v2106_v59 = vsel %vm2088_vm8, %v2085_v48, %v1681_v58 }
 0x14c   : > { %v1923_v25 = vpop.permute.xlu1 %1922 }
 0x14d   : > { %v1751_v17 = vpop.permute.xlu0 %1750  ;;  %v2150_v19 = vsel %vm2130_vm10, %v2129_v49, %v1923_v25  ;;  %v2620_v25 = vld [vmem:[#allocation2 + $0x14] sm:$0x1] }
 0x14e   : > { %v2127_v53 = vsel %vm2109_vm3, %v2106_v59, %v1751_v17 }
 0x150   : > { %v2003_v26 = vpop.permute.xlu1 %2002 }
 0x151   : > { %v1921_v54 = vpop.permute.xlu0 %1920  ;;  %v2171_v44 = vsel %vm2151_vm12, %v2150_v19, %v2003_v26 }
 0x152   : > { %v2148_v8 = vsel %vm2130_vm10, %v2127_v53, %v1921_v54 }
 0x155   : > { %v2001_v47 = vpop.permute.xlu0 %2000 }
 0x156   : > { %v2169_v1 = vsel %vm2151_vm12, %v2148_v8, %v2001_v47 }
 0x157   : > { %4479 = vmatprep.mubr.msk.bf16.mxu0 %vm2199_vm4, %v2169_v1 }
 0x158   : > { %4480 = vmatmul.mubr.msk.bf16.gmra.mrb[16].mxu0 %vm2199_vm4, %v2171_v44 }
 0x1c3   : > { %v4465_v57 = vpop.f32.mrb[0].mxu0 }
 0x1c4   : > { %v2267_v24 = vadd.f32 %v4465_v57, %v5883_v28  ;;  %v2258_v40 = vpop.f32.mrb[1].mxu0 }
 0x1c5   : > { %v2259_v30 = vadd.f32 %v5883_v28, %v2258_v40  ;;  %v4466_v21 = vpop.f32.mrb[2].mxu0 }
 0x1c6   : > { %v2339_v32 = vmax.f32 %v2267_v24, 0.0  ;;  %v2270_v4 = vadd.f32 %v4466_v21, %v5883_v28  ;;  %v2261_v20 = vpop.f32.mrb[3].mxu0 }
 0x1c7   : > { %v2337_v35 = vmax.f32 %v2259_v30, 0.0  ;;  %v2262_v55 = vadd.f32 %v5883_v28, %v2261_v20 }
 0x1c8   : > { %v4399_v38 = vpack.c.bf16 %v2339_v32, %v2339_v32  ;;  %v2340_v46 = vmax.f32 %v2270_v4, 0.0  ;;  %v2637_v4 = vld [vmem:[#allocation2 + $0x30] sm:$0xf] }
 0x1c9   : > { %v4397_v15 = vpack.c.bf16 %v2337_v35, %v2337_v35  ;;  %v2338_v62 = vmax.f32 %v2262_v55, 0.0 }
 0x1ca   : > { %v2435_v41 = vshrl.u32 %v4399_v38, 16  ;;  %v4400_v39 = vpack.c.bf16 %v2340_v46, %v2340_v46  ;;  %v2438_v9 = vshll.u32 %v4399_v38, 16  ;;  %v2630_v46 = vld [vmem:[#allocation2 + $0x24] sm:$0xf] }
 0x1cb   : > { %v2418_v11 = vshrl.u32 %v4397_v15, 16  ;;  %v4398_v33 = vpack.c.bf16 %v2338_v62, %v2338_v62  ;;  %v2421_v45 = vshll.u32 %v4397_v15, 16 }
 0x1cc   : > { %v2437_v14 = vrot.slane %v2435_v41, 7  ;;  %v2443_v61 = vshrl.u32 %v4400_v39, 16  ;;  %v2446_v63 = vshll.u32 %v4400_v39, 16 }
 0x1cd   : > { %v2420_v60 = vrot.slane %v2418_v11, 7  ;;  %v2426_v23 = vshrl.u32 %v4398_v33, 16  ;;  %v2429_v12 = vshll.u32 %v4398_v33, 16  ;;  %v2641_v33 = vld [vmem:[#allocation2 + $0x38] sm:$0x1] }
 0x1ce   : > { %v2440_v2 = vor.u32 %v2438_v9, %v2437_v14  ;;  %v2441_v37 = vrot.slane %v2437_v14, 4  ;;  %v2445_v56 = vrot.slane %v2443_v61, 7  ;;  %v4469_v5 = vpop.f32.mrb[4].mxu0 }
 0x1cf   : > { %v2423_v22 = vor.u32 %v2421_v45, %v2420_v60  ;;  %v2424_v52 = vrot.slane %v2420_v60, 4  ;;  %v2428_v29 = vrot.slane %v2426_v23, 7  ;;  %v2283_v36 = vadd.f32 %v4469_v5, %v5883_v28  ;;  %v2274_v42 = vpop.f32.mrb[5].mxu0 }
 0x1d0   : > { %v2624_v58 = vsel %vm4989_vm6, %v2440_v2, %v2623_v31  ;;  %v2448_v0 = vor.u32 %v2446_v63, %v2445_v56  ;;  %v2450_v17 = vrot.slane %v2445_v56, 4  ;;  %v2275_v16 = vadd.f32 %v5883_v28, %v2274_v42  ;;  %v4470_v6 = vpop.f32.mrb[6].mxu0  ;;  %v2634_v63 = vld [vmem:[#allocation2 + $0x2c] sm:$0x1] }
 0x1d1   : > { %2625 = vst [vmem:[#allocation2 + $0x18] sm:$0xf] %v2624_v58  ;;  %v2617_v3 = vsel %vm4989_vm6, %v2423_v22, %v4666_v50  ;;  %v2431_v10 = vor.u32 %v2429_v12, %v2428_v29  ;;  %v2433_v27 = vrot.slane %v2428_v29, 4  ;;  %v2343_v43 = vmax.f32 %v2283_v36, 0.0  ;;  %v2277_v54 = vpop.f32.mrb[7].mxu0 }
 0x1d2   : > { %2618 = vst [vmem:[#allocation2 + $0xc] sm:$0xf] %v2617_v3  ;;  %v2449_v48 = vsel %vm4981_vm5, %v2441_v37, %v2448_v0  ;;  %v2628_v34 = vsel %vm5000_vm7, %v2450_v17, %v2627_v51  ;;  %v2341_v26 = vmax.f32 %v2275_v16, 0.0  ;;  %v2286_v59 = vadd.f32 %v4470_v6, %v5883_v28 }
 0x1d3   : > { %2626 = vst.msk [vmem:[#allocation2 + $0x1c] sm:$0xf] %vm548_vm2, %v2449_v48  ;;  %2629 = vst [vmem:[#allocation2 + $0x20] sm:$0x1] %v2628_v34  ;;  %v2432_v49 = vsel %vm4981_vm5, %v2424_v52, %v2431_v10  ;;  %v2621_v53 = vsel %vm5000_vm7, %v2433_v27, %v2620_v25  ;;  %v4403_v19 = vpack.c.bf16 %v2343_v43, %v2343_v43 }
 0x1d4   : > { %v2278_v8 = vadd.f32 %v5883_v28, %v2277_v54  ;;  %2619 = vst.msk [vmem:[#allocation2 + $0x10] sm:$0xf] %vm548_vm2, %v2432_v49  ;;  %2622 = vst [vmem:[#allocation2 + $0x14] sm:$0x1] %v2621_v53  ;;  %v4401_v47 = vpack.c.bf16 %v2341_v26, %v2341_v26  ;;  %v2344_v44 = vmax.f32 %v2286_v59, 0.0 }
 0x1d5   : > { %v2469_v1 = vshrl.u32 %v4403_v19, 16  ;;  %v2472_v21 = vshll.u32 %v4403_v19, 16  ;;  %v2651_v49 = vld [vmem:[#allocation2 + $0x48] sm:$0xf] }
 0x1d6   : > { %v2342_v57 = vmax.f32 %v2278_v8, 0.0  ;;  %v2452_v24 = vshrl.u32 %v4401_v47, 16  ;;  %v4404_v40 = vpack.c.bf16 %v2344_v44, %v2344_v44  ;;  %v2455_v35 = vshll.u32 %v4401_v47, 16  ;;  %v2644_v44 = vld [vmem:[#allocation2 + $0x3c] sm:$0xf] }
 0x1d7   : > { %v2471_v30 = vrot.slane %v2469_v1, 7 }
 0x1d8   : > { %v4402_v32 = vpack.c.bf16 %v2342_v57, %v2342_v57  ;;  %v2454_v20 = vrot.slane %v2452_v24, 7  ;;  %v2477_v55 = vshrl.u32 %v4404_v40, 16  ;;  %v2480_v39 = vshll.u32 %v4404_v40, 16  ;;  %v2655_v40 = vld [vmem:[#allocation2 + $0x50] sm:$0x1] }
 0x1d9   : > { %v2474_v38 = vor.u32 %v2472_v21, %v2471_v30  ;;  %v2475_v61 = vrot.slane %v2471_v30, 4 }
 0x1da   : > { %v2460_v15 = vshrl.u32 %v4402_v32, 16  ;;  %v2457_v62 = vor.u32 %v2455_v35, %v2454_v20  ;;  %v2479_v41 = vrot.slane %v2477_v55, 7  ;;  %v2463_v9 = vshll.u32 %v4402_v32, 16  ;;  %v2648_v55 = vld [vmem:[#allocation2 + $0x44] sm:$0x1] }
 0x1db   : > { %v2638_v11 = vsel %vm4989_vm6, %v2474_v38, %v2637_v4  ;;  %v2458_v23 = vrot.slane %v2454_v20, 4 }
 0x1dc   : > { %v2462_v14 = vrot.slane %v2460_v15, 7  ;;  %2639 = vst [vmem:[#allocation2 + $0x30] sm:$0xf] %v2638_v11  ;;  %v2631_v31 = vsel %vm4989_vm6, %v2457_v62, %v2630_v46  ;;  %v2482_v60 = vor.u32 %v2480_v39, %v2479_v41  ;;  %v2484_v45 = vrot.slane %v2479_v41, 4 }
 0x1dd   : > { %2632 = vst [vmem:[#allocation2 + $0x24] sm:$0xf] %v2631_v31 }
 0x1de   : > { %v2465_v2 = vor.u32 %v2463_v9, %v2462_v14  ;;  %v2467_v37 = vrot.slane %v2462_v14, 4  ;;  %v2483_v56 = vsel %vm4981_vm5, %v2475_v61, %v2482_v60  ;;  %v2642_v12 = vsel %vm5000_vm7, %v2484_v45, %v2641_v33 }
 0x1df   : > { %2640 = vst.msk [vmem:[#allocation2 + $0x34] sm:$0xf] %vm548_vm2, %v2483_v56  ;;  %2643 = vst [vmem:[#allocation2 + $0x38] sm:$0x1] %v2642_v12 }
 0x1e0   : > { %v2466_v5 = vsel %vm4981_vm5, %v2458_v23, %v2465_v2  ;;  %v2635_v22 = vsel %vm5000_vm7, %v2467_v37, %v2634_v63 }
 0x1e1   : > { %2633 = vst.msk [vmem:[#allocation2 + $0x28] sm:$0xf] %vm548_vm2, %v2466_v5  ;;  %2636 = vst [vmem:[#allocation2 + $0x2c] sm:$0x1] %v2635_v22 }
 0x1ee   : > { %v4473_v52 = vpop.f32.mrb[8].mxu0 }
 0x1ef   : > { %v2299_v51 = vadd.f32 %v4473_v52, %v5883_v28  ;;  %v2290_v29 = vpop.f32.mrb[9].mxu0 }
 0x1f0   : > { %v2291_v36 = vadd.f32 %v5883_v28, %v2290_v29  ;;  %v4474_v42 = vpop.f32.mrb[10].mxu0 }
 0x1f1   : > { %v2347_v58 = vmax.f32 %v2299_v51, 0.0  ;;  %v2302_v0 = vadd.f32 %v4474_v42, %v5883_v28  ;;  %v2293_v17 = vpop.f32.mrb[11].mxu0 }
 0x1f2   : > { %v2345_v25 = vmax.f32 %v2291_v36, 0.0  ;;  %v2294_v16 = vadd.f32 %v5883_v28, %v2293_v17  ;;  %v2665_v17 = vld [vmem:[#allocation2 + $0x60] sm:$0xf] }
 0x1f3   : > { %v4407_v6 = vpack.c.bf16 %v2347_v58, %v2347_v58  ;;  %v2348_v50 = vmax.f32 %v2302_v0, 0.0 }
 0x1f4   : > { %v4405_v3 = vpack.c.bf16 %v2345_v25, %v2345_v25  ;;  %v2346_v10 = vmax.f32 %v2294_v16, 0.0 }
 0x1f5   : > { %v2503_v27 = vshrl.u32 %v4407_v6, 16  ;;  %v4408_v43 = vpack.c.bf16 %v2348_v50, %v2348_v50  ;;  %v2506_v26 = vshll.u32 %v4407_v6, 16 }
 0x1f6   : > { %v2486_v54 = vshrl.u32 %v4405_v3, 16  ;;  %v4406_v48 = vpack.c.bf16 %v2346_v10, %v2346_v10  ;;  %v2489_v19 = vshll.u32 %v4405_v3, 16  ;;  %v2658_v3 = vld [vmem:[#allocation2 + $0x54] sm:$0xf] }
 0x1f7   : > { %v2505_v34 = vrot.slane %v2503_v27, 7  ;;  %v2511_v59 = vshrl.u32 %v4408_v43, 16  ;;  %v2514_v57 = vshll.u32 %v4408_v43, 16 }
 0x1f8   : > { %v2488_v53 = vrot.slane %v2486_v54, 7  ;;  %v2494_v8 = vshrl.u32 %v4406_v48, 16  ;;  %v2497_v21 = vshll.u32 %v4406_v48, 16  ;;  %v2669_v54 = vld [vmem:[#allocation2 + $0x68] sm:$0x1] }
 0x1f9   : > { %v2508_v47 = vor.u32 %v2506_v26, %v2505_v34  ;;  %v2513_v1 = vrot.slane %v2511_v59, 7  ;;  %v2509_v32 = vrot.slane %v2505_v34, 4 }
 0x1fa   : > { %v2491_v24 = vor.u32 %v2489_v19, %v2488_v53  ;;  %v2496_v30 = vrot.slane %v2494_v8, 7  ;;  %v2492_v38 = vrot.slane %v2488_v53, 4  ;;  %v2662_v19 = vld [vmem:[#allocation2 + $0x5c] sm:$0x1] }
 0x1fb   : > { %v2652_v4 = vsel %vm4989_vm6, %v2508_v47, %v2651_v49  ;;  %v2516_v20 = vor.u32 %v2514_v57, %v2513_v1  ;;  %v2518_v35 = vrot.slane %v2513_v1, 4 }
 0x1fc   : > { %2653 = vst [vmem:[#allocation2 + $0x48] sm:$0xf] %v2652_v4  ;;  %v2645_v46 = vsel %vm4989_vm6, %v2491_v24, %v2644_v44  ;;  %v2499_v15 = vor.u32 %v2497_v21, %v2496_v30  ;;  %v2501_v62 = vrot.slane %v2496_v30, 4 }
 0x1fd   : > { %2646 = vst [vmem:[#allocation2 + $0x3c] sm:$0xf] %v2645_v46  ;;  %v2517_v41 = vsel %vm4981_vm5, %v2509_v32, %v2516_v20  ;;  %v2656_v39 = vsel %vm5000_vm7, %v2518_v35, %v2655_v40 }
 0x1fe   : > { %2654 = vst.msk [vmem:[#allocation2 + $0x4c] sm:$0xf] %vm548_vm2, %v2517_v41  ;;  %2657 = vst [vmem:[#allocation2 + $0x50] sm:$0x1] %v2656_v39  ;;  %v2500_v11 = vsel %vm4981_vm5, %v2492_v38, %v2499_v15  ;;  %v2649_v33 = vsel %vm5000_vm7, %v2501_v62, %v2648_v55 }
 0x1ff   : > { %2647 = vst.msk [vmem:[#allocation2 + $0x40] sm:$0xf] %vm548_vm2, %v2500_v11  ;;  %2650 = vst [vmem:[#allocation2 + $0x44] sm:$0x1] %v2649_v33 }
 0x20e   : > { %v4477_v14 = vpop.f32.mrb[12].mxu0 }
 0x20f   : > { %v2315_v9 = vadd.f32 %v4477_v14, %v5883_v28  ;;  %v2306_v61 = vpop.f32.mrb[13].mxu0 }
 0x210   : > { %v2307_v31 = vadd.f32 %v5883_v28, %v2306_v61  ;;  %v4478_v60 = vpop.f32.mrb[14].mxu0 }
 0x211   : > { %v2351_v45 = vmax.f32 %v2315_v9, 0.0  ;;  %v2318_v63 = vadd.f32 %v4478_v60, %v5883_v28  ;;  %v2309_v23 = vpop.f32.mrb[15].mxu0 }
 0x212   : > { %v2349_v2 = vmax.f32 %v2307_v31, 0.0  ;;  %v2310_v37 = vadd.f32 %v5883_v28, %v2309_v23  ;;  %v2679_v23 = vld [vmem:[#allocation2 + $0x78] sm:$0xf] }
 0x213   : > { %v4411_v56 = vpack.c.bf16 %v2351_v45, %v2351_v45  ;;  %v2352_v12 = vmax.f32 %v2318_v63, 0.0 }
 0x214   : > { %v4409_v5 = vpack.c.bf16 %v2349_v2, %v2349_v2  ;;  %v2350_v22 = vmax.f32 %v2310_v37, 0.0 }
 0x215   : > { %v2537_v52 = vshrl.u32 %v4411_v56, 16  ;;  %v4412_v51 = vpack.c.bf16 %v2352_v12, %v2352_v12  ;;  %v2540_v58 = vshll.u32 %v4411_v56, 16 }
 0x216   : > { %v2520_v29 = vshrl.u32 %v4409_v5, 16  ;;  %v4410_v36 = vpack.c.bf16 %v2350_v22, %v2350_v22  ;;  %v2523_v16 = vshll.u32 %v4409_v5, 16  ;;  %v2672_v5 = vld [vmem:[#allocation2 + $0x6c] sm:$0xf] }
 0x217   : > { %v2539_v42 = vrot.slane %v2537_v52, 7  ;;  %v2545_v0 = vshrl.u32 %v4412_v51, 16  ;;  %v2548_v27 = vshll.u32 %v4412_v51, 16  ;;  %v2683_v51 = vld [vmem:[#allocation2 + $0x80] sm:$0x1] }
 0x218   : > { %v2522_v25 = vrot.slane %v2520_v29, 7  ;;  %v2528_v6 = vshrl.u32 %v4410_v36, 16  ;;  %v2531_v34 = vshll.u32 %v4410_v36, 16 }
 0x219   : > { %v2542_v50 = vor.u32 %v2540_v58, %v2539_v42  ;;  %v2547_v10 = vrot.slane %v2545_v0, 7  ;;  %v2543_v26 = vrot.slane %v2539_v42, 4 }
 0x21a   : > { %v2525_v43 = vor.u32 %v2523_v16, %v2522_v25  ;;  %v2530_v48 = vrot.slane %v2528_v6, 7  ;;  %v2526_v8 = vrot.slane %v2522_v25, 4  ;;  %v2676_v25 = vld [vmem:[#allocation2 + $0x74] sm:$0x1] }
 0x21b   : > { %v2666_v59 = vsel %vm4989_vm6, %v2542_v50, %v2665_v17  ;;  %v2550_v49 = vor.u32 %v2548_v27, %v2547_v10  ;;  %v2552_v53 = vrot.slane %v2547_v10, 4 }
 0x21c   : > { %2667 = vst [vmem:[#allocation2 + $0x60] sm:$0xf] %v2666_v59  ;;  %v2659_v47 = vsel %vm4989_vm6, %v2525_v43, %v2658_v3  ;;  %v2533_v44 = vor.u32 %v2531_v34, %v2530_v48  ;;  %v2535_v1 = vrot.slane %v2530_v48, 4  ;;  %v2689_v48 = vld [vmem:[#allocation2 + $0xc] sm:$0xf] (!%p4285_p8) }
 0x21d   : > { %2660 = vst [vmem:[#allocation2 + $0x54] sm:$0xf] %v2659_v47  ;;  %v2551_v57 = vsel %vm4981_vm5, %v2543_v26, %v2550_v49  ;;  %v2670_v24 = vsel %vm5000_vm7, %v2552_v53, %v2669_v54  ;;  %v2693_v34 = vld [vmem:[#allocation2 + $0x14] sm:$0x1] (!%p4285_p8)  ;;  %v2690_v7 = vsel (!%p4285_p8), %vm4989_vm6, 0, %v2689_v48  ;;  %v4846_v26 = vmov (!%p4285_p8), 0  }
 0x21e   : > { %2668 = vst.msk [vmem:[#allocation2 + $0x64] sm:$0xf] %vm548_vm2, %v2551_v57  ;;  %2671 = vst [vmem:[#allocation2 + $0x68] sm:$0x1] %v2670_v24  ;;  %v2534_v40 = vsel %vm4981_vm5, %v2526_v8, %v2533_v44  ;;  %v2663_v30 = vsel %vm5000_vm7, %v2535_v1, %v2662_v19  ;;  %v2694_v59 = vsel (!%p4285_p8), %vm5000_vm7, 0, %v2693_v34 }
 0x21f   : > { %2661 = vst.msk [vmem:[#allocation2 + $0x58] sm:$0xf] %vm548_vm2, %v2534_v40  ;;  %2664 = vst [vmem:[#allocation2 + $0x5c] sm:$0x1] %v2663_v30 }
 0x220   : > { %2692 = vst.msk [vmem:[#allocation2 + $0x10] sm:$0xf] (!%p4285_p8), %vm548_vm2, %v4846_v26  ;;  %2691 = vst [vmem:[#allocation2 + $0xc] sm:$0xf] (!%p4285_p8), %v2690_v7 }
 0x221   : > { %2695 = vst [vmem:[#allocation2 + $0x14] sm:$0x1] (!%p4285_p8), %v2694_v59 }
 0x22b   : > { %v4481_v21 = vpop.f32.mrb[16].mxu0 }
 0x22c   : > { %v2331_v32 = vadd.f32 %v4481_v21, %v5883_v28  ;;  %v2322_v4 = vpop.f32.mrb[17].mxu0 }
 0x22d   : > { %v2323_v20 = vadd.f32 %v5883_v28, %v2322_v4  ;;  %v4482_v35 = vpop.f32.mrb[18].mxu0 }
 0x22e   : > { %v2355_v55 = vmax.f32 %v2331_v32, 0.0  ;;  %v2334_v38 = vadd.f32 %v4482_v35, %v5883_v28  ;;  %v2325_v46 = vpop.f32.mrb[19].mxu0 }
 0x22f   : > { %v2353_v15 = vmax.f32 %v2323_v20, 0.0  ;;  %v2326_v62 = vadd.f32 %v5883_v28, %v2325_v46 }
 0x230   : > { %v4415_v41 = vpack.c.bf16 %v2355_v55, %v2355_v55  ;;  %v2356_v39 = vmax.f32 %v2334_v38, 0.0 }
 0x231   : > { %v4413_v11 = vpack.c.bf16 %v2353_v15, %v2353_v15  ;;  %v2354_v33 = vmax.f32 %v2326_v62, 0.0 }
 0x232   : > { %v2571_v14 = vshrl.u32 %v4415_v41, 16  ;;  %v4416_v9 = vpack.c.bf16 %v2356_v39, %v2356_v39  ;;  %v2574_v45 = vshll.u32 %v4415_v41, 16 }
 0x233   : > { %v2554_v61 = vshrl.u32 %v4413_v11, 16  ;;  %v4414_v31 = vpack.c.bf16 %v2354_v33, %v2354_v33  ;;  %v2557_v37 = vshll.u32 %v4413_v11, 16 }
 0x234   : > { %v2573_v60 = vrot.slane %v2571_v14, 7  ;;  %v2579_v63 = vshrl.u32 %v4416_v9, 16  ;;  %v2582_v52 = vshll.u32 %v4416_v9, 16 }
 0x235   : > { %v2556_v2 = vrot.slane %v2554_v61, 7  ;;  %v2562_v56 = vshrl.u32 %v4414_v31, 16  ;;  %v2565_v36 = vshll.u32 %v4414_v31, 16 }
 0x236   : > { %v2576_v12 = vor.u32 %v2574_v45, %v2573_v60  ;;  %v2581_v22 = vrot.slane %v2579_v63, 7  ;;  %v2577_v42 = vrot.slane %v2573_v60, 4  ;;  %2688 = sbr.rel (%p4285_p8) target bundleno = 573 (0x23d), region = 52 }
 0x237   : > { %v2559_v28 = vor.u32 %v2557_v37, %v2556_v2  ;;  %v2564_v29 = vrot.slane %v2562_v56, 7  ;;  %v2560_v16 = vrot.slane %v2556_v2, 4 }
 0x238   : > { %v2680_v58 = vsel %vm4989_vm6, %v2576_v12, %v2679_v23  ;;  %v2584_v0 = vor.u32 %v2582_v52, %v2581_v22  ;;  %v2586_v17 = vrot.slane %v2581_v22, 4 }
 0x239   : > { %2681 = vst [vmem:[#allocation2 + $0x78] sm:$0xf] %v2680_v58  ;;  %v2673_v6 = vsel %vm4989_vm6, %v2559_v28, %v2672_v5  ;;  %v2567_v50 = vor.u32 %v2565_v36, %v2564_v29  ;;  %v2569_v3 = vrot.slane %v2564_v29, 4 }
 0x23a   : > { %2674 = vst [vmem:[#allocation2 + $0x6c] sm:$0xf] %v2673_v6  ;;  %v2585_v10 = vsel %vm4981_vm5, %v2577_v42, %v2584_v0  ;;  %v2684_v27 = vsel %vm5000_vm7, %v2586_v17, %v2683_v51 }
 0x23b   : > { %2682 = vst.msk [vmem:[#allocation2 + $0x7c] sm:$0xf] %vm548_vm2, %v2585_v10  ;;  %2685 = vst [vmem:[#allocation2 + $0x80] sm:$0x1] %v2684_v27  ;;  %v2568_v43 = vsel %vm4981_vm5, %v2560_v16, %v2567_v50  ;;  %v2677_v54 = vsel %vm5000_vm7, %v2569_v3, %v2676_v25 }
 0x23c   : > { %2675 = vst.msk [vmem:[#allocation2 + $0x70] sm:$0xf] %vm548_vm2, %v2568_v43  ;;  %2678 = vst [vmem:[#allocation2 + $0x74] sm:$0x1] %v2677_v54 }
 0x23d PF: > { %p4286_p10 = scmp.ne.s32.totalorder %s4820_s30, 1 }
 0x23e   : > { %v4847_v8 = vmov (!%p4286_p10), 0  }
 0x23f   : > { %2698 = sbr.rel (%p4286_p10) target bundleno = 582 (0x246), region = 56  ;;  %2702 = vst.msk [vmem:[#allocation2 + $0x7c] sm:$0xf] (!%p4286_p10), %vm548_vm2, %v4847_v8 }
 0x240   : > { %v2699_v49 = vld [vmem:[#allocation2 + $0x78] sm:$0xf] (!%p4286_p10) }
 0x241   : > { %v2700_v19 = vsel (!%p4286_p10), %vm4989_vm6, 0, %v2699_v49 }
 0x242   : > { %v2703_v53 = vld [vmem:[#allocation2 + $0x80] sm:$0x1] (!%p4286_p10)  ;;  %2701 = vst [vmem:[#allocation2 + $0x78] sm:$0xf] (!%p4286_p10), %v2700_v19 }
 0x243   : > { %v2704_v47 = vsel (!%p4286_p10), %vm5000_vm7, 0, %v2703_v53 }
 0x244   : > { %2705 = vst [vmem:[#allocation2 + $0x80] sm:$0x1] (!%p4286_p10), %v2704_v47 }
 0x246 PF: > { %v2738_v44 = vld [vmem:[#allocation2 + $0x18] sm:$0xf]  ;;  %v5993_v1 = vld [vmem:[#allocation2 + $0x1c] sm:$0xf]  ;;  %v2707_v57 = vld [vmem:[#allocation2 + $0x10] sm:$0xf] }
 0x247   : > { %v4311_v24 = vcombine.low %v2738_v44, %v5993_v1  ;;  %v2730_v40 = vld [vmem:[#allocation2 + $0xc] sm:$0xe]  ;;  %v4668_v21 = vld [vmem:[#allocation2 + $0x14] ss:$0 sps:$4 sm:$0x11]   ;;  %s6532_s22 = smov 12  }
 0x248   : > { %v2706_v30 = vld [vmem:[#allocation2 + $0xc] sm:$0xf]  ;;  %v4303_v13 = vcombine.low %v2730_v40, %v2707_v57  ;;  %v2708_v4 = vld [vmem:[#allocation2 + $0x18] sm:$0xf]  ;;  %v2709_v18 = vld [vmem:[#allocation2 + $0x1c] sm:$0xf] }
 0x249   : > { %v5996_v32 = vcombine.low %v2706_v30, %v2707_v57  ;;  %3083 = vrot.lane.b32.xlu0 %v4311_v24, %s6532_s22  ;;  %v2731_v20 = vld [vmem:[#allocation2 + $0x18] sm:$0xe]  ;;  %v3004_v55 = vrot.slane %v4668_v21, 1  ;;  %v5999_v38 = vcombine.low %v2708_v4, %v2709_v18  ;;  %v4672_v46 = vld [vmem:[#allocation2 + $0x20] ss:$0 sps:$4 sm:$0x11]  }
 0x24a   : > { %v3003_v35 = vrot.slane %v4303_v13, 1  ;;  %v4304_v15 = vcombine.low %v2731_v20, %v2709_v18  ;;  %v2875_v39 = vshll.u32 %v4668_v21, 16  ;;  %v2740_v11 = vld [vmem:[#allocation2 + $0x24] sm:$0xf]  ;;  %v3007_v9 = vrot.slane %v4672_v46, 1  ;;  %s6533_s24 = smov 8  }
 0x24b   : > { %v2868_v62 = vshrl.u32 %v5996_v32, 16  ;;  %v2870_v41 = vshll.u32 %v5996_v32, 16  ;;  %v2741_v61 = vld [vmem:[#allocation2 + $0x28] sm:$0xf]  ;;  %v2880_v31 = vshrl.u32 %v5999_v38, 16  ;;  %v2882_v23 = vshll.u32 %v5999_v38, 16 }
 0x24c   : > { %v3005_v33 = vsel %vm1313_vm9, %v3003_v35, %v3004_v55  ;;  %v3006_v14 = vrot.slane %v4304_v15, 1  ;;  %v2877_v45 = vrot.slane %v2875_v39, 1  ;;  %v4312_v63 = vcombine.low %v2740_v11, %v2741_v61  ;;  %v4675_v56 = vld [vmem:[#allocation2 + $0x2c] ss:$0 sps:$4 sm:$0x11]   ;;  %s6534_s0 = smov 4  }
 0x24d   : > { %3027 = vrot.lane.b32.xlu1 %v3005_v33, %s6533_s24  ;;  %v2872_v60 = vrot.slane %v2870_v41, 1  ;;  %v2887_v37 = vshll.u32 %v4672_v46, 16  ;;  %v2884_v5 = vrot.slane %v2882_v23, 1  ;;  %v4676_v28 = vld [vmem:[#allocation2 + $0x20] ss:$0 sps:$4 sm:$0x11]  }
 0x24e   : > { %v3008_v2 = vsel %vm1313_vm9, %v3006_v14, %v3007_v9  ;;  %v3136_v22 = vshrl.u32 %v4312_v63, 16  ;;  %v3138_v52 = vshll.u32 %v4312_v63, 16  ;;  %v3143_v29 = vshll.u32 %v4675_v56, 16  ;;  %v2763_v58 = vld [vmem:[#allocation2 + $0x24] sm:$0xe]  ;;  %s6535_s1 = smov 16  }
 0x24f   : > { %v2873_v12 = vor.u32 %v2872_v60, %v2868_v62  ;;  %v2889_v51 = vrot.slane %v2887_v37, 1  ;;  %v3124_v36 = vshrl.u32 %v4311_v24, 16  ;;  %v3126_v42 = vshll.u32 %v4311_v24, 16  ;;  %v2762_v6 = vld [vmem:[#allocation2 + $0x18] sm:$0xe]  ;;  %v4739_v8 = vld [vmem:[%s6478_s5] sm:$0xff]  }
 0x250   : > { %v2885_v17 = vor.u32 %v2884_v5, %v2880_v31  ;;  %v3140_v25 = vrot.slane %v3138_v52, 1  ;;  %v3131_v16 = vshll.u32 %v4676_v28, 16  ;;  %v2773_v50 = vld [vmem:[#allocation2 + $0x30] sm:$0xf]  ;;  %v3145_v3 = vrot.slane %v3143_v29, 1  ;;  %4483 = vmatprep.subr.bf16.mxu1 %v4739_v8  ;;  %v4740_v39 = vld [vmem:[%s6478_s5 + $0x8] sm:$0xff]  }
 0x251   : > { %3029 = vrot.lane.b32.xlu1 %v3008_v2, %s6533_s24  ;;  %v2878_v0 = vsel %vm1142_vm11, %v2873_v12, %v2877_v45  ;;  %v3128_v10 = vrot.slane %v3126_v42, 1  ;;  %v4328_v27 = vcombine.low %v2763_v58, %v2741_v61  ;;  %v6011_v43 = vld [vmem:[#allocation2 + $0x34] sm:$0xf]  ;;  %v2771_v54 = vld [vmem:[#allocation2 + $0x24] sm:$0xf]  ;;  %v4327_v26 = vcombine.low %v2762_v6, %v5993_v1  ;;  %4484 = vmatpush3.bf16.msra.mxu1 %v4739_v8  ;;  %s6536_s14 = smov 24  }
 0x252   : > { %2963 = vrot.lane.b32.xlu0 %v2878_v0, %s6534_s0  ;;  %v2890_v48 = vsel %vm1142_vm11, %v2885_v17, %v2889_v51  ;;  %v3141_v34 = vor.u32 %v3140_v25, %v3136_v22  ;;  %v3133_v7 = vrot.slane %v3131_v16, 1  ;;  %v6015_v59 = vld [vmem:[#allocation2 + $0x28] sm:$0xf]  ;;  %v4336_v53 = vcombine.low %v2773_v50, %v6011_v43  ;;  %v6018_v19 = vld [vmem:[#allocation2 + $0x38] ss:$0 sps:$4 sm:$0x11]   ;;  %4485 = vmatprep.subr.bf16.mxu1 %v4740_v39 }
 0x253   : > { %v3129_v49 = vor.u32 %v3128_v10, %v3124_v36  ;;  %v3263_v47 = vrot.slane %v4675_v56, 1  ;;  %v4335_v44 = vcombine.low %v2771_v54, %v6015_v59  ;;  %v6025_v57 = vld [vmem:[#allocation2 + $0x2c] ss:$0 sps:$4 sm:$0x11]   ;;  %v3262_v24 = vrot.slane %v4328_v27, 1  ;;  %s6537_s25 = smov 28  }
 0x254   : > { %v3146_v1 = vsel %vm1142_vm11, %v3141_v34, %v3145_v3  ;;  %v3260_v40 = vrot.slane %v4676_v28, 1  ;;  %v2710_v30 = vld [vmem:[#allocation2 + $0x24] sm:$0xf]  ;;  %v6029_v21 = vld [vmem:[#allocation2 + $0x28] sm:$0xf]  ;;  %v3259_v4 = vrot.slane %v4327_v26, 1 }
 0x255   : > { %3085 = vrot.lane.b32.xlu1 %v4312_v63, %s6532_s22  ;;  %v3134_v13 = vsel %vm1142_vm11, %v3129_v49, %v3133_v7  ;;  %v3394_v18 = vshll.u32 %v4336_v53, 16  ;;  %v3382_v20 = vshll.u32 %v4335_v44, 16  ;;  %v6033_v35 = vcombine.low %v2710_v30, %v6029_v21  ;;  %v6035_v55 = vld [vmem:[#allocation2 + $0x2c] ss:$0 sps:$4 sm:$0x11]   ;;  %4486 = vmatpush3.bf16.msra.mxu1 %v4740_v39  ;;  %s6538_s20 = smov 32  }
 0x256   : > { %2965 = vrot.lane.b32.xlu0 %v2890_v48, %s6534_s0  ;;  %v3392_v46 = vshrl.u32 %v4336_v53, 16  ;;  %v3399_v62 = vshll.u32 %v6018_v19, 16  ;;  %v2712_v41 = vld [vmem:[#allocation2 + $0x30] sm:$0xf]  ;;  %v3264_v11 = vsel %vm1313_vm9, %v3262_v24, %v3263_v47  ;;  %v2713_v14 = vld [vmem:[#allocation2 + $0x34] sm:$0xf]  ;;  %v3261_v9 = vsel %vm1313_vm9, %v3259_v4, %v3260_v40 }
 0x257   : > { %v3396_v15 = vrot.slane %v3394_v18, 1  ;;  %v2894_v33 = vshll.u32 %v6033_v35, 16  ;;  %v3380_v61 = vshrl.u32 %v4335_v44, 16  ;;  %v3384_v31 = vrot.slane %v3382_v20, 1  ;;  %v2795_v63 = vld [vmem:[#allocation2 + $0x24] sm:$0xe] }
 0x258   : > { %v3387_v60 = vshll.u32 %v6025_v57, 16  ;;  %v2899_v45 = vshll.u32 %v6035_v55, 16  ;;  %v6048_v23 = vcombine.low %v2712_v41, %v2713_v14  ;;  %v3401_v37 = vrot.slane %v3399_v62, 1  ;;  %v4687_v5 = vld [vmem:[#allocation2 + $0x38] ss:$0 sps:$4 sm:$0x11]  }
 0x259   : > { %3221 = vrot.lane.b32.xlu1 %v3146_v1, %s6535_s1  ;;  %v3397_v2 = vor.u32 %v3396_v15, %v3392_v46  ;;  %v2892_v56 = vshrl.u32 %v6033_v35, 16  ;;  %v2896_v12 = vrot.slane %v2894_v33, 1  ;;  %v3385_v52 = vor.u32 %v3384_v31, %v3380_v61  ;;  %v2796_v36 = vld [vmem:[#allocation2 + $0x30] sm:$0xe]  ;;  %v2732_v6 = vld [vmem:[#allocation2 + $0x24] sm:$0xe] }
 0x25a   : > { %3219 = vrot.lane.b32.xlu0 %v3134_v13, %s6535_s1  ;;  %v2906_v22 = vshll.u32 %v6048_v23, 16  ;;  %v3389_v28 = vrot.slane %v3387_v60, 1  ;;  %v4351_v51 = vcombine.low %v2795_v63, %v6015_v59  ;;  %v2901_v29 = vrot.slane %v2899_v45, 1  ;;  %v2733_v58 = vld [vmem:[#allocation2 + $0x30] sm:$0xe] }
 0x25b   : > { %v3402_v42 = vsel %vm1142_vm11, %v3397_v2, %v3401_v37  ;;  %v2897_v0 = vor.u32 %v2896_v12, %v2892_v56  ;;  %v2904_v17 = vshrl.u32 %v6048_v23, 16  ;;  %v2911_v16 = vshll.u32 %v4687_v5, 16  ;;  %v2744_v54 = vld [vmem:[#allocation2 + $0x3c] sm:$0xf]  ;;  %v2745_v48 = vld [vmem:[#allocation2 + $0x40] sm:$0xf] }
 0x25c   : > { %v2908_v25 = vrot.slane %v2906_v22, 1  ;;  %v3390_v50 = vsel %vm1142_vm11, %v3385_v52, %v3389_v28  ;;  %v3515_v3 = vrot.slane %v4351_v51, 1  ;;  %v3516_v10 = vrot.slane %v6025_v57, 1  ;;  %v2742_v34 = vld [vmem:[#allocation2 + $0x30] sm:$0xf] }
 0x25d   : > { %3285 = vrot.lane.b32.xlu1 %v3264_v11, %s4841_s26  ;;  %v4352_v27 = vcombine.low %v2796_v36, %v6011_v43  ;;  %v6062_v7 = vld [vmem:[#allocation2 + $0x34] sm:$0xf]  ;;  %v4306_v26 = vcombine.low %v2733_v58, %v2713_v14  ;;  %v4305_v59 = vcombine.low %v2732_v6, %v6029_v21  ;;  %v2902_v49 = vsel %vm1142_vm11, %v2897_v0, %v2901_v29  ;;  %v4693_v4 = vld [vmem:[#allocation2 + $0x44] ss:$0 sps:$4 sm:$0x11]  }
 0x25e   : > { %3283 = vrot.lane.b32.xlu0 %v3261_v9, %s4841_s26  ;;  %v2913_v8 = vrot.slane %v2911_v16, 1  ;;  %v4314_v47 = vcombine.low %v2744_v54, %v2745_v48  ;;  %v3519_v57 = vrot.slane %v6018_v19, 1  ;;  %v4313_v1 = vcombine.low %v2742_v34, %v6062_v7  ;;  %v4694_v46 = vld [vmem:[#allocation2 + $0x38] ss:$0 sps:$4 sm:$0x11]  }
 0x25f   : > { %v3518_v43 = vrot.slane %v4352_v27, 1  ;;  %v3013_v24 = vrot.slane %v4687_v5, 1  ;;  %v3010_v40 = vrot.slane %v6035_v55, 1  ;;  %v3012_v21 = vrot.slane %v4306_v26, 1  ;;  %v2765_v62 = vld [vmem:[#allocation2 + $0x3c] sm:$0xe] }
 0x260   : > { %v3009_v13 = vrot.slane %v4305_v59, 1  ;;  %v3162_v18 = vshll.u32 %v4314_v47, 16  ;;  %v3150_v15 = vshll.u32 %v4313_v1, 16  ;;  %v3160_v19 = vshrl.u32 %v4314_v47, 16  ;;  %v2777_v11 = vld [vmem:[#allocation2 + $0x48] sm:$0xf] }
 0x261   : > { %3341 = vrot.lane.b32.xlu1 %v4336_v53, %s6536_s14  ;;  %v2909_v53 = vor.u32 %v2908_v25, %v2904_v17  ;;  %v3520_v20 = vsel %vm1313_vm9, %v3518_v43, %v3519_v57  ;;  %v3014_v55 = vsel %vm1313_vm9, %v3012_v21, %v3013_v24  ;;  %v3167_v39 = vshll.u32 %v4693_v4, 16  ;;  %v6079_v33 = vld [vmem:[#allocation2 + $0x4c] sm:$0xf]  ;;  %v2764_v60 = vld [vmem:[#allocation2 + $0x30] sm:$0xe] }
 0x262   : > { %3339 = vrot.lane.b32.xlu0 %v4335_v44, %s6536_s14  ;;  %v3517_v44 = vsel %vm1313_vm9, %v3515_v3, %v3516_v10  ;;  %v3164_v41 = vrot.slane %v3162_v18, 1  ;;  %v3011_v14 = vsel %vm1313_vm9, %v3009_v13, %v3010_v40  ;;  %v3148_v9 = vshrl.u32 %v4313_v1, 16  ;;  %v2775_v45 = vld [vmem:[#allocation2 + $0x3c] sm:$0xf]  ;;  %v2776_v63 = vld [vmem:[#allocation2 + $0x40] sm:$0xf] }
 0x263   : > { %v2914_v30 = vsel %vm1142_vm11, %v2909_v53, %v2913_v8  ;;  %v3152_v61 = vrot.slane %v3150_v15, 1  ;;  %v3155_v31 = vshll.u32 %v4694_v46, 16  ;;  %v4338_v2 = vcombine.low %v2777_v11, %v6079_v33  ;;  %v2714_v51 = vld [vmem:[#allocation2 + $0x3c] sm:$0xf]  ;;  %v6086_v29 = vld [vmem:[#allocation2 + $0x40] sm:$0xf] }
 0x264   : > { %v3165_v37 = vor.u32 %v3164_v41, %v3160_v19  ;;  %v3169_v56 = vrot.slane %v3167_v39, 1  ;;  %v4330_v12 = vcombine.low %v2765_v62, %v2745_v48  ;;  %v4329_v52 = vcombine.low %v2764_v60, %v6062_v7  ;;  %v4700_v16 = vld [vmem:[#allocation2 + $0x44] ss:$0 sps:$4 sm:$0x11]   ;;  %v2716_v27 = vld [vmem:[#allocation2 + $0x48] sm:$0xf] }
 0x265   : > { %3477 = vrot.lane.b32.xlu1 %v3402_v42, %s6537_s25  ;;  %v3153_v5 = vor.u32 %v3152_v61, %v3148_v9  ;;  %v3157_v22 = vrot.slane %v3155_v31, 1  ;;  %v4337_v28 = vcombine.low %v2775_v45, %v2776_v63  ;;  %v3269_v36 = vrot.slane %v4693_v4, 1  ;;  %v6089_v42 = vld [vmem:[#allocation2 + $0x50] ss:$0 sps:$4 sm:$0x11]  }
 0x266   : > { %3475 = vrot.lane.b32.xlu0 %v3390_v50, %s6537_s25  ;;  %v3418_v58 = vshll.u32 %v4338_v2, 16  ;;  %v3170_v0 = vsel %vm1142_vm11, %v3165_v37, %v3169_v56  ;;  %v3268_v17 = vrot.slane %v4330_v12, 1  ;;  %v3266_v25 = vrot.slane %v4694_v46, 1  ;;  %v6097_v54 = vld [vmem:[#allocation2 + $0x4c] sm:$0xf] }
 0x267   : > { %v6094_v6 = vcombine.low %v2714_v51, %v6086_v29  ;;  %v3158_v50 = vsel %vm1142_vm11, %v3153_v5, %v3157_v22  ;;  %v3265_v3 = vrot.slane %v4329_v52, 1  ;;  %v3406_v10 = vshll.u32 %v4337_v28, 16  ;;  %v6101_v26 = vld [vmem:[#allocation2 + $0x44] ss:$0 sps:$4 sm:$0x11]  }
 0x268   : > { %v3416_v48 = vshrl.u32 %v4338_v2, 16  ;;  %v3420_v34 = vrot.slane %v3418_v58, 1  ;;  %v3423_v7 = vshll.u32 %v6089_v42, 16  ;;  %v3270_v59 = vsel %vm1313_vm9, %v3268_v17, %v3269_v36  ;;  %v2797_v53 = vld [vmem:[#allocation2 + $0x3c] sm:$0xe] }
 0x269   : > { %2967 = vrot.lane.b32.xlu1 %v2902_v49, %s6534_s0  ;;  %v2918_v49 = vshll.u32 %v6094_v6, 16  ;;  %v6107_v8 = vcombine.low %v2716_v27, %v6097_v54  ;;  %v3408_v43 = vrot.slane %v3406_v10, 1  ;;  %v3411_v57 = vshll.u32 %v4700_v16, 16  ;;  %v4705_v4 = vld [vmem:[#allocation2 + $0x50] ss:$0 sps:$4 sm:$0x11]  }
 0x26a   : > { %3539 = vrot.lane.b32.xlu0 %v3517_v44, %s6538_s20  ;;  %v3404_v44 = vshrl.u32 %v4337_v28, 16  ;;  %v3425_v24 = vrot.slane %v3423_v7, 1  ;;  %v2923_v40 = vshll.u32 %v6101_v26, 16  ;;  %v2916_v21 = vshrl.u32 %v6094_v6, 16  ;;  %v2798_v15 = vld [vmem:[#allocation2 + $0x48] sm:$0xe] }
 0x26b   : > { %v2920_v13 = vrot.slane %v2918_v49, 1  ;;  %v2930_v18 = vshll.u32 %v6107_v8, 16  ;;  %v3413_v46 = vrot.slane %v3411_v57, 1  ;;  %v3522_v41 = vrot.slane %v4700_v16, 1  ;;  %v2735_v61 = vld [vmem:[#allocation2 + $0x48] sm:$0xe] }
 0x26c   : > { %v2925_v62 = vrot.slane %v2923_v40, 1  ;;  %v2928_v11 = vshrl.u32 %v6107_v8, 16  ;;  %v2935_v9 = vshll.u32 %v4705_v4, 16  ;;  %v4354_v60 = vcombine.low %v2798_v15, %v6079_v33  ;;  %v2748_v45 = vld [vmem:[#allocation2 + $0x54] sm:$0xf] }
 0x26d   : > { %2969 = vrot.lane.b32.xlu1 %v2914_v30, %s6534_s0  ;;  %v4353_v30 = vcombine.low %v2797_v53, %v2776_v63  ;;  %v2921_v39 = vor.u32 %v2920_v13, %v2916_v21  ;;  %v6121_v63 = vld [vmem:[#allocation2 + $0x58] sm:$0xf]  ;;  %v2746_v37 = vld [vmem:[#allocation2 + $0x48] sm:$0xf]  ;;  %v6123_v56 = vld [vmem:[#allocation2 + $0x4c] sm:$0xf]  ;;  %v4308_v5 = vcombine.low %v2735_v61, %v6097_v54 }
 0x26e   : > { %3541 = vrot.lane.b32.xlu0 %v3520_v20, %s6538_s20  ;;  %v3409_v20 = vor.u32 %v3408_v43, %v3404_v44  ;;  %v3525_v12 = vrot.slane %v6089_v42, 1  ;;  %v4316_v33 = vcombine.low %v2748_v45, %v6121_v63  ;;  %v3524_v36 = vrot.slane %v4354_v60, 1  ;;  %v6135_v42 = vld [vmem:[#allocation2 + $0x5c] ss:$0 sps:$4 sm:$0x11]  }
 0x26f   : > { %v2926_v22 = vsel %vm1142_vm11, %v2921_v39, %v2925_v62  ;;  %v3019_v16 = vrot.slane %v4705_v4, 1  ;;  %v2767_v7 = vld [vmem:[#allocation2 + $0x54] sm:$0xe]  ;;  %v6148_v44 = vld [vmem:[#allocation2 + $0x64] sm:$0xf] }
 0x270   : > { %v3414_v31 = vsel %vm1142_vm11, %v3409_v20, %v3413_v46  ;;  %v3526_v10 = vsel %vm1313_vm9, %v3524_v36, %v3525_v12  ;;  %v6151_v40 = vld [vmem:[#allocation2 + $0x58] sm:$0xf]  ;;  %v4741_v60 = vld [vmem:[%s6478_s5 + $0x10] ss:$0 sps:$4 sm:$0x33]  }
 0x271   : > { %3033 = vrot.lane.b32.xlu1 %v3014_v55, %s6533_s24  ;;  %v3521_v55 = vrot.slane %v4353_v30, 1  ;;  %v6159_v62 = vld [vmem:[#allocation2 + $0x58] sm:$0xf]  ;;  %4506 = vmatprep.subr.msk.bf16.mxu1 %vm2220_vm13, %v4741_v60  ;;  %v3727_v12 = vsel %vm2220_vm13, %v4741_v60, 0 }
 0x272   : > { %3031 = vrot.lane.b32.xlu0 %v3011_v14, %s6533_s24  ;;  %v2932_v14 = vrot.slane %v2930_v18, 1  ;;  %v4332_v18 = vcombine.low %v2767_v7, %v6121_v63  ;;  %4488 = vmatpush3.bf16.msra.mxu1 %v3727_v12 }
 0x273   : > { %v3523_v51 = vsel %vm1313_vm9, %v3521_v55, %v3522_v41  ;;  %v3275_v55 = vrot.slane %v6135_v42, 1  ;;  %v6162_v41 = vld [vmem:[#allocation2 + $0x68] ss:$0 sps:$4 sm:$0x11]  }
 0x274   : > { %v2933_v52 = vor.u32 %v2932_v14, %v2928_v11  ;;  %v6166_v14 = vld [vmem:[#allocation2 + $0x5c] ss:$0 sps:$4 sm:$0x11]   ;;  %v3274_v61 = vrot.slane %v4332_v18, 1  ;;  %v2736_v18 = vld [vmem:[#allocation2 + $0x54] sm:$0xe] }
 0x275   : > { %3089 = vrot.lane.b32.xlu1 %v4314_v47, %s6532_s22  ;;  %v3267_v47 = vsel %vm1313_vm9, %v3265_v3, %v3266_v25  ;;  %v3018_v25 = vrot.slane %v4308_v5, 1  ;;  %v6139_v3 = vld [vmem:[#allocation2 + $0x50] ss:$0 sps:$4 sm:$0x11]  }
 0x276   : > { %3087 = vrot.lane.b32.xlu0 %v4313_v1, %s6532_s22  ;;  %v3421_v1 = vor.u32 %v3420_v34, %v3416_v48  ;;  %v3184_v48 = vshrl.u32 %v4316_v33, 16  ;;  %v3191_v34 = vshll.u32 %v6135_v42, 16  ;;  %v3179_v53 = vshll.u32 %v6139_v3, 16 }
 0x277   : > { %v3272_v39 = vrot.slane %v6139_v3, 1 }
 0x278   : > { %v3426_v19 = vsel %vm1142_vm11, %v3421_v1, %v3425_v24  ;;  %v2766_v1 = vld [vmem:[#allocation2 + $0x48] sm:$0xe]  ;;  %v2779_v24 = vld [vmem:[#allocation2 + $0x54] sm:$0xf]  ;;  %v3193_v13 = vrot.slane %v3191_v34, 1  ;;  %v3181_v4 = vrot.slane %v3179_v53, 1 }
 0x279   : > { %3225 = vrot.lane.b32.xlu1 %v3170_v0, %s6535_s1  ;;  %v4315_v0 = vcombine.low %v2746_v37, %v6123_v56  ;;  %v4331_v46 = vcombine.low %v2766_v1, %v6123_v56  ;;  %v4339_v15 = vcombine.low %v2779_v24, %v6151_v40  ;;  %v2720_v37 = vld [vmem:[#allocation2 + $0x60] sm:$0xf]  ;;  %v2721_v56 = vld [vmem:[#allocation2 + $0x64] sm:$0xf] }
 0x27a   : > { %3223 = vrot.lane.b32.xlu0 %v3158_v50, %s6535_s1  ;;  %v3186_v50 = vshll.u32 %v4316_v33, 16  ;;  %v6186_v36 = vcombine.low %v2720_v37, %v2721_v56  ;;  %v2737_v1 = vld [vmem:[#allocation2 + $0x60] sm:$0xe] }
 0x27b   : > { %v3174_v54 = vshll.u32 %v4315_v0, 16  ;;  %v3271_v63 = vrot.slane %v4331_v46, 1  ;;  %v2751_v46 = vld [vmem:[#allocation2 + $0x64] sm:$0xf] }
 0x27c   : > { %v3188_v49 = vrot.slane %v3186_v50, 1 }
 0x27d   : > { %3289 = vrot.lane.b32.xlu1 %v3270_v59, %s4841_s26  ;;  %v3020_v59 = vsel %vm1313_vm9, %v3018_v25, %v3019_v16  ;;  %v3176_v57 = vrot.slane %v3174_v54, 1  ;;  %v2799_v25 = vld [vmem:[#allocation2 + $0x54] sm:$0xe]  ;;  %v2954_v54 = vshll.u32 %v6186_v36, 16 }
 0x27e   : > { %3287 = vrot.lane.b32.xlu0 %v3267_v47, %s4841_s26  ;;  %v2781_v47 = vld [vmem:[#allocation2 + $0x60] sm:$0xf]  ;;  %v3189_v21 = vor.u32 %v3188_v49, %v3184_v48  ;;  %v4355_v7 = vcombine.low %v2799_v25, %v6151_v40 }
 0x27f   : > { %v4340_v30 = vcombine.low %v2781_v47, %v6148_v44 }
 0x281   : > { %3345 = vrot.lane.b32.xlu1 %v4338_v2, %s6536_s14  ;;  %v2734_v2 = vld [vmem:[#allocation2 + $0x3c] sm:$0xe]  ;;  %v3442_v11 = vshll.u32 %v4340_v30, 16  ;;  %v3440_v5 = vshrl.u32 %v4340_v30, 16 }
 0x282   : > { %3343 = vrot.lane.b32.xlu0 %v4337_v28, %s6536_s14  ;;  %v2937_v28 = vrot.slane %v2935_v9, 1  ;;  %v4307_v58 = vcombine.low %v2734_v2, %v6086_v29  ;;  %v3016_v29 = vrot.slane %v6101_v26, 1  ;;  %v3172_v26 = vshrl.u32 %v4315_v0, 16 }
 0x283   : > { %v3194_v9 = vsel %vm1142_vm11, %v3189_v21, %v3193_v13  ;;  %v3430_v2 = vshll.u32 %v4339_v15, 16  ;;  %v3527_v21 = vrot.slane %v4355_v7, 1  ;;  %v3528_v13 = vrot.slane %v6166_v14, 1 }
 0x284   : > { %v2938_v17 = vsel %vm1142_vm11, %v2933_v52, %v2937_v28  ;;  %v3015_v27 = vrot.slane %v4307_v58, 1  ;;  %v3177_v20 = vor.u32 %v3176_v57, %v3172_v26  ;;  %v3447_v52 = vshll.u32 %v6162_v41, 16  ;;  %v6181_v28 = vld [vmem:[#allocation2 + $0x5c] ss:$0 sps:$4 sm:$0x11]  }
 0x285   : > { %3481 = vrot.lane.b32.xlu1 %v3426_v19, %s6537_s25  ;;  %v2718_v19 = vld [vmem:[#allocation2 + $0x54] sm:$0xf]  ;;  %v3273_v58 = vsel %vm1313_vm9, %v3271_v63, %v3272_v39  ;;  %v3432_v42 = vrot.slane %v3430_v2, 1  ;;  %v2947_v3 = vshll.u32 %v6181_v28, 16  ;;  %v2956_v26 = vrot.slane %v2954_v54, 1 }
 0x286   : > { %3479 = vrot.lane.b32.xlu0 %v3414_v31, %s6537_s25  ;;  %v3017_v43 = vsel %vm1313_vm9, %v3015_v27, %v3016_v29  ;;  %v6171_v31 = vcombine.low %v2718_v19, %v6159_v62  ;;  %v3182_v45 = vsel %vm1142_vm11, %v3177_v20, %v3181_v4  ;;  %v3449_v50 = vrot.slane %v3447_v52, 1  ;;  %v4723_v29 = vld [vmem:[#allocation2 + $0x68] ss:$0 sps:$4 sm:$0x11]   ;;  %v2752_v4 = vld [vmem:[#allocation2 + $0x6c] sm:$0xf] }
 0x287   : > { %v2949_v53 = vrot.slane %v2947_v3, 1  ;;  %v2959_v57 = vshll.u32 %v4723_v29, 16  ;;  %v2750_v20 = vld [vmem:[#allocation2 + $0x60] sm:$0xf]  ;;  %v4310_v19 = vcombine.low %v2737_v1, %v2721_v56  ;;  %v3025_v63 = vrot.slane %v4723_v29, 1 }
 0x288   : > { %v4317_v60 = vcombine.low %v2750_v20, %v2751_v46  ;;  %v4729_v2 = vld [vmem:[#allocation2 + $0x74] ss:$0 sps:$4 sm:$0x11]   ;;  %v2786_v3 = vld [vmem:[#allocation2 + $0x7c] sm:$0xf] }
 0x289   : > { %2971 = vrot.lane.b32.xlu1 %v2926_v22, %s6534_s0  ;;  %v3444_v22 = vrot.slane %v3442_v11, 1  ;;  %v2961_v11 = vrot.slane %v2959_v57, 1  ;;  %v4735_v57 = vld [vmem:[#allocation2 + $0x80] ss:$0 sps:$4 sm:$0x11]  }
 0x28a   : > { %3543 = vrot.lane.b32.xlu0 %v3523_v51, %s6538_s20  ;;  %v2942_v51 = vshll.u32 %v6171_v31, 16  ;;  %v3198_v52 = vshll.u32 %v4317_v60, 16 }
 0x28b   : > { %v3445_v16 = vor.u32 %v3444_v22, %v3440_v5  ;;  %v3022_v5 = vrot.slane %v6181_v28, 1  ;;  %v4730_v22 = vld [vmem:[#allocation2 + $0x68] ss:$0 sps:$4 sm:$0x11]   ;;  %v2768_v28 = vld [vmem:[#allocation2 + $0x60] sm:$0xe] }
 0x28c   : > { %v2944_v27 = vrot.slane %v2942_v51, 1  ;;  %v3200_v25 = vrot.slane %v3198_v52, 1 }
 0x28d   : > { %2973 = vrot.lane.b32.xlu1 %v2938_v17, %s6534_s0  ;;  %v3435_v17 = vshll.u32 %v6166_v14, 16  ;;  %v3450_v49 = vsel %vm1142_vm11, %v3445_v16, %v3449_v50  ;;  %v3529_v14 = vsel %vm1313_vm9, %v3527_v21, %v3528_v13  ;;  %v3203_v16 = vshll.u32 %v4730_v22, 16  ;;  %v2785_v50 = vld [vmem:[#allocation2 + $0x78] sm:$0xf] }
 0x28e   : > { %3545 = vrot.lane.b32.xlu0 %v3526_v10, %s6538_s20  ;;  %v2940_v10 = vshrl.u32 %v6171_v31, 16  ;;  %v3278_v13 = vrot.slane %v4730_v22, 1 }
 0x28f   : > { %v3437_v34 = vrot.slane %v3435_v17, 1 }
 0x290   : > { %v2945_v47 = vor.u32 %v2944_v27, %v2940_v10  ;;  %v2783_v10 = vld [vmem:[#allocation2 + $0x6c] sm:$0xf]  ;;  %v2784_v27 = vld [vmem:[#allocation2 + $0x70] sm:$0xf] }
 0x291   : > { %3037 = vrot.lane.b32.xlu1 %v3020_v59, %s6533_s24  ;;  %v2800_v59 = vld [vmem:[#allocation2 + $0x60] sm:$0xe] }
 0x292   : > { %3035 = vrot.lane.b32.xlu0 %v3017_v43, %s6533_s24  ;;  %v2952_v43 = vshrl.u32 %v6186_v36, 16  ;;  %v4356_v40 = vcombine.low %v2800_v59, %v6148_v44  ;;  %v3205_v59 = vrot.slane %v3203_v16, 1 }
 0x294   : > { %v2957_v39 = vor.u32 %v2956_v26, %v2952_v43  ;;  %v3530_v44 = vrot.slane %v4356_v40, 1  ;;  %v3281_v26 = vrot.slane %v4729_v2, 1  ;;  %v4736_v40 = vld [vmem:[#allocation2 + $0x74] ss:$0 sps:$4 sm:$0x11]  }
 0x295   : > { %3093 = vrot.lane.b32.xlu1 %v4316_v33, %s6532_s22  ;;  %v3276_v33 = vsel %vm1313_vm9, %v3274_v61, %v3275_v55  ;;  %v2950_v55 = vsel %vm1142_vm11, %v2945_v47, %v2949_v53  ;;  %v4309_v61 = vcombine.low %v2736_v18, %v6159_v62  ;;  %v4341_v53 = vcombine.low %v2783_v10, %v2784_v27 }
 0x296   : > { %3091 = vrot.lane.b32.xlu0 %v4315_v0, %s6532_s22  ;;  %v3428_v0 = vshrl.u32 %v4339_v15, 16 }
 0x297   : > { %v3021_v12 = vrot.slane %v4309_v61, 1 }
 0x298   : > { %v3433_v48 = vor.u32 %v3432_v42, %v3428_v0  ;;  %v3196_v0 = vshrl.u32 %v4317_v60, 16  ;;  %v2769_v42 = vld [vmem:[#allocation2 + $0x6c] sm:$0xe] }
 0x299   : > { %3229 = vrot.lane.b32.xlu1 %v3194_v9, %s6535_s1  ;;  %v3023_v17 = vsel %vm1313_vm9, %v3021_v12, %v3022_v5  ;;  %v3537_v12 = vrot.slane %v4735_v57, 1 }
 0x29a   : > { %3227 = vrot.lane.b32.xlu0 %v3182_v45, %s6535_s1  ;;  %v3438_v24 = vsel %vm1142_vm11, %v3433_v48, %v3437_v34  ;;  %v3024_v45 = vrot.slane %v4310_v19, 1  ;;  %v4342_v34 = vcombine.low %v2785_v50, %v2786_v3  ;;  %v3201_v7 = vor.u32 %v3200_v25, %v3196_v0 }
 0x29b   : > { %v3452_v19 = vshrl.u32 %v4341_v53, 16 }
 0x29c   : > { %v3026_v62 = vsel %vm1313_vm9, %v3024_v45, %v3025_v63  ;;  %v3466_v1 = vshll.u32 %v4342_v34, 16  ;;  %v3464_v18 = vshrl.u32 %v4342_v34, 16 }
 0x29d   : > { %3293 = vrot.lane.b32.xlu1 %v3276_v33, %s4841_s26 }
 0x29e   : > { %3291 = vrot.lane.b32.xlu0 %v3273_v58, %s4841_s26  ;;  %v3215_v58 = vshll.u32 %v4729_v2, 16  ;;  %v3468_v20 = vrot.slane %v3466_v1, 1 }
 0x2a0   : > { %v3217_v54 = vrot.slane %v3215_v58, 1 }
 0x2a1   : > { %3349 = vrot.lane.b32.xlu1 %v4340_v30, %s6536_s14  ;;  %v2753_v30 = vld [vmem:[#allocation2 + $0x70] sm:$0xf] }
 0x2a2   : > { %3347 = vrot.lane.b32.xlu0 %v4339_v15, %s6536_s14  ;;  %v3531_v15 = vrot.slane %v6162_v41, 1  ;;  %v4318_v9 = vcombine.low %v2752_v4, %v2753_v30  ;;  %v2962_v41 = vsel %vm1142_vm11, %v2957_v39, %v2961_v11  ;;  %v4334_v48 = vcombine.low %v2769_v42, %v2753_v30  ;;  %v2802_v11 = vld [vmem:[#allocation2 + $0x78] sm:$0xe] }
 0x2a3   : > { %v3454_v4 = vshll.u32 %v4341_v53, 16  ;;  %v3459_v39 = vshll.u32 %v4736_v40, 16 }
 0x2a4   : > { %v3210_v37 = vshll.u32 %v4318_v9, 16  ;;  %v3532_v56 = vsel %vm1313_vm9, %v3530_v44, %v3531_v15  ;;  %v3208_v33 = vshrl.u32 %v4318_v9, 16  ;;  %v3280_v43 = vrot.slane %v4334_v48, 1 }
 0x2a5   : > { %3485 = vrot.lane.b32.xlu1 %v3450_v49, %s6537_s25  ;;  %v4333_v49 = vcombine.low %v2768_v28, %v2751_v46  ;;  %v3471_v46 = vshll.u32 %v4735_v57, 16  ;;  %v3469_v44 = vor.u32 %v3468_v20, %v3464_v18 }
 0x2a6   : > { %3483 = vrot.lane.b32.xlu0 %v3438_v24, %s6537_s25  ;;  %v3212_v51 = vrot.slane %v3210_v37, 1  ;;  %v3206_v24 = vsel %vm1142_vm11, %v3201_v7, %v3205_v59  ;;  %v3282_v30 = vsel %vm1313_vm9, %v3280_v43, %v3281_v26 }
 0x2a7   : > { %v3277_v21 = vrot.slane %v4333_v49, 1  ;;  %v3473_v61 = vrot.slane %v3471_v46, 1 }
 0x2a8   : > { %v3213_v29 = vor.u32 %v3212_v51, %v3208_v33 }
 0x2a9   : > { %2975 = vrot.lane.b32.xlu1 %v2950_v55, %s6534_s0  ;;  %v3279_v15 = vsel %vm1313_vm9, %v3277_v21, %v3278_v13  ;;  %v3456_v55 = vrot.slane %v3454_v4, 1  ;;  %v3474_v37 = vsel %vm1142_vm11, %v3469_v44, %v3473_v61 }
 0x2aa   : > { %3547 = vrot.lane.b32.xlu0 %v3529_v14, %s6538_s20  ;;  %v3218_v47 = vsel %vm1142_vm11, %v3213_v29, %v3217_v54 }
 0x2ab   : > { %v3457_v63 = vor.u32 %v3456_v55, %v3452_v19 }
 0x2ad   : > { %2977 = vrot.lane.b32.xlu1 %v2962_v41, %s6534_s0  ;;  %v3461_v41 = vrot.slane %v3459_v39, 1 }
 0x2ae   : > { %3549 = vrot.lane.b32.xlu0 %v3532_v56, %s6538_s20 }
 0x2af   : > { %v3462_v22 = vsel %vm1142_vm11, %v3457_v63, %v3461_v41 }
 0x2b1   : > { %3041 = vrot.lane.b32.xlu1 %v3026_v62, %s6533_s24  ;;  %v3534_v62 = vrot.slane %v4736_v40, 1 }
 0x2b2   : > { %3039 = vrot.lane.b32.xlu0 %v3023_v17, %s6533_s24 }
 0x2b5   : > { %3097 = vrot.lane.b32.xlu1 %v4318_v9, %s6532_s22  ;;  %v2801_v9 = vld [vmem:[#allocation2 + $0x6c] sm:$0xe] }
 0x2b6   : > { %3095 = vrot.lane.b32.xlu0 %v4317_v60, %s6532_s22  ;;  %v4358_v60 = vcombine.low %v2802_v11, %v2786_v3  ;;  %v4357_v2 = vcombine.low %v2801_v9, %v2784_v27 }
 0x2b8   : > { %v3536_v56 = vrot.slane %v4358_v60, 1  ;;  %v3533_v52 = vrot.slane %v4357_v2, 1 }
 0x2b9   : > { %3233 = vrot.lane.b32.xlu1 %v3218_v47, %s6535_s1 }
 0x2ba   : > { %3231 = vrot.lane.b32.xlu0 %v3206_v24, %s6535_s1  ;;  %v3538_v51 = vsel %vm1313_vm9, %v3536_v56, %v3537_v12  ;;  %v3535_v0 = vsel %vm1313_vm9, %v3533_v52, %v3534_v62 }
 0x2bb   : > { %v3084_v14 = vpop.permute.xlu0 %3083 }
 0x2bd   : > { %3297 = vrot.lane.b32.xlu1 %v3282_v30, %s4841_s26 }
 0x2be   : > { %3295 = vrot.lane.b32.xlu0 %v3279_v15, %s4841_s26 }
 0x2bf   : > { %v3028_v45 = vpop.permute.xlu1 %3027 }
 0x2c1   : > { %3353 = vrot.lane.b32.xlu1 %v4342_v34, %s6536_s14 }
 0x2c2   : > { %3351 = vrot.lane.b32.xlu0 %v4341_v53, %s6536_s14 }
 0x2c3   : > { %v3030_v5 = vpop.permute.xlu1 %3029 }
 0x2c4   : > { %v2964_v33 = vpop.permute.xlu0 %2963 }
 0x2c5   : > { %3489 = vrot.lane.b32.xlu1 %v3474_v37, %s6537_s25  ;;  %v3556_v3 = vsel %vm2004_vm14, %v5996_v32, %v2964_v33 }
 0x2c6   : > { %3487 = vrot.lane.b32.xlu0 %v3462_v22, %s6537_s25  ;;  %v3572_v29 = vsel %vm2025_vm15, %v3556_v3, %v3028_v45 }
 0x2c7   : > { %v3086_v58 = vpop.permute.xlu1 %3085  ;;  %v3588_v34 = vsel %vm2046_vm0, %v3572_v29, %v3084_v14 }
 0x2c8   : > { %v2966_v42 = vpop.permute.xlu0 %2965 }
 0x2c9   : > { %3553 = vrot.lane.b32.xlu1 %v3538_v51, %s6538_s20  ;;  %v3558_v10 = vsel %vm2004_vm14, %v5999_v38, %v2966_v42 }
 0x2ca   : > { %3551 = vrot.lane.b32.xlu0 %v3535_v0, %s6538_s20  ;;  %v3574_v54 = vsel %vm2025_vm15, %v3558_v10, %v3030_v5 }
 0x2cb   : > { %v3222_v17 = vpop.permute.xlu1 %3221  ;;  %v3590_v49 = vsel %vm2046_vm0, %v3574_v54, %v3086_v58 }
 0x2cc   : > { %v3220_v25 = vpop.permute.xlu0 %3219  ;;  %v3606_v26 = vsel %vm2067_vm1, %v3590_v49, %v3222_v17 }
 0x2cd   : > { %v3604_v59 = vsel %vm2067_vm1, %v3588_v34, %v3220_v25 }
 0x2cf   : > { %v3286_v16 = vpop.permute.xlu1 %3285 }
 0x2d0   : > { %v3284_v50 = vpop.permute.xlu0 %3283  ;;  %v3622_v1 = vsel %vm2088_vm8, %v3606_v26, %v3286_v16 }
 0x2d1   : > { %v3620_v53 = vsel %vm2088_vm8, %v3604_v59, %v3284_v50 }
 0x2d3   : > { %v3342_v28 = vpop.permute.xlu1 %3341 }
 0x2d4   : > { %v3340_v27 = vpop.permute.xlu0 %3339  ;;  %v3638_v24 = vsel %vm2109_vm3, %v3622_v1, %v3342_v28 }
 0x2d5   : > { %v3636_v32 = vsel %vm2109_vm3, %v3620_v53, %v3340_v27 }
 0x2d7   : > { %v3478_v48 = vpop.permute.xlu1 %3477 }
 0x2d8   : > { %v3476_v7 = vpop.permute.xlu0 %3475  ;;  %v3654_v13 = vsel %vm2130_vm10, %v3638_v24, %v3478_v48 }
 0x2d9   : > { %v3652_v38 = vsel %vm2130_vm10, %v3636_v32, %v3476_v7 }
 0x2db   : > { %v2968_v47 = vpop.permute.xlu1 %2967 }
 0x2dc   : > { %v3540_v43 = vpop.permute.xlu0 %3539  ;;  %v3560_v14 = vsel %vm2004_vm14, %v6033_v35, %v2968_v47 }
 0x2dd   : > { %v3668_v57 = vsel %vm2151_vm12, %v3652_v38, %v3540_v43 }
 0x2de   : > { %4489 = vmatprep.mubr.msk.bf16.mxu1 %vm2199_vm4, %v3668_v57 }
 0x2df   : > { %v2970_v21 = vpop.permute.xlu1 %2969 }
 0x2e0   : > { %v3542_v40 = vpop.permute.xlu0 %3541  ;;  %v3562_v41 = vsel %vm2004_vm14, %v6048_v23, %v2970_v21 }
 0x2e1   : > { %v3670_v4 = vsel %vm2151_vm12, %v3654_v13, %v3542_v40 }
 0x2e2   : > { %4490 = vmatmul.mubr.msk.bf16.vlgmr.msra.gmra.mrb[0].mxu1 %vm2199_vm4, %v3670_v4 }
 0x2e3   : > { %v3034_v30 = vpop.permute.xlu1 %3033 }
 0x2e4   : > { %v3032_v18 = vpop.permute.xlu0 %3031  ;;  %v3578_v37 = vsel %vm2025_vm15, %v3562_v41, %v3034_v30 }
 0x2e5   : > { %v3576_v44 = vsel %vm2025_vm15, %v3560_v14, %v3032_v18 }
 0x2e7   : > { %v3090_v20 = vpop.permute.xlu1 %3089 }
 0x2e8   : > { %v3088_v46 = vpop.permute.xlu0 %3087  ;;  %v3594_v35 = vsel %vm2046_vm0, %v3578_v37, %v3090_v20 }
 0x2e9   : > { %v3592_v60 = vsel %vm2046_vm0, %v3576_v44, %v3088_v46 }
 0x2eb   : > { %v3226_v15 = vpop.permute.xlu1 %3225 }
 0x2ec   : > { %v3224_v19 = vpop.permute.xlu0 %3223  ;;  %v3610_v52 = vsel %vm2067_vm1, %v3594_v35, %v3226_v15 }
 0x2ed   : > { %v3608_v63 = vsel %vm2067_vm1, %v3592_v60, %v3224_v19 }
 0x2ef   : > { %v3290_v55 = vpop.permute.xlu1 %3289 }
 0x2f0   : > { %v3288_v39 = vpop.permute.xlu0 %3287  ;;  %v3626_v33 = vsel %vm2088_vm8, %v3610_v52, %v3290_v55 }
 0x2f1   : > { %v3624_v2 = vsel %vm2088_vm8, %v3608_v63, %v3288_v39 }
 0x2f3   : > { %v3346_v11 = vpop.permute.xlu1 %3345 }
 0x2f4   : > { %v3344_v9 = vpop.permute.xlu0 %3343  ;;  %v3642_v23 = vsel %vm2109_vm3, %v3626_v33, %v3346_v11 }
 0x2f5   : > { %v3640_v56 = vsel %vm2109_vm3, %v3624_v2, %v3344_v9 }
 0x2f7   : > { %v3482_v61 = vpop.permute.xlu1 %3481 }
 0x2f8   : > { %v3480_v45 = vpop.permute.xlu0 %3479  ;;  %v3658_v58 = vsel %vm2130_vm10, %v3642_v23, %v3482_v61 }
 0x2f9   : > { %v3656_v5 = vsel %vm2130_vm10, %v3640_v56, %v3480_v45 }
 0x2fb   : > { %v2972_v12 = vpop.permute.xlu1 %2971 }
 0x2fc   : > { %v3544_v22 = vpop.permute.xlu0 %3543  ;;  %v3564_v48 = vsel %vm2004_vm14, %v6094_v6, %v2972_v12 }
 0x2fd   : > { %v3672_v62 = vsel %vm2151_vm12, %v3656_v5, %v3544_v22 }
 0x2fe   : > { %4493 = vmatprep.mubr.msk.bf16.mxu1 %vm2199_vm4, %v3672_v62 }
 0x2ff   : > { %v2974_v51 = vpop.permute.xlu1 %2973 }
 0x300   : > { %v3546_v0 = vpop.permute.xlu0 %3545  ;;  %v3566_v32 = vsel %vm2004_vm14, %v6107_v8, %v2974_v51 }
 0x301   : > { %v3674_v42 = vsel %vm2151_vm12, %v3658_v58, %v3546_v0  ;;  %v4359_v0 = vld [vmem:[%s6479_s6] ss:$0 sm:$0xff] }
 0x302   : > { %4494 = vmatmul.mubr.msk.bf16.gmra.mrb[4].mxu1 %vm2199_vm4, %v3674_v42 }
 0x303   : > { %v3038_v17 = vpop.permute.xlu1 %3037 }
 0x304   : > { %v3036_v25 = vpop.permute.xlu0 %3035  ;;  %v3582_v38 = vsel %vm2025_vm15, %v3566_v32, %v3038_v17 }
 0x305   : > { %v3580_v34 = vsel %vm2025_vm15, %v3564_v48, %v3036_v25 }
 0x307   : > { %v3094_v16 = vpop.permute.xlu1 %3093 }
 0x308   : > { %v3092_v50 = vpop.permute.xlu0 %3091  ;;  %v3598_v6 = vsel %vm2046_vm0, %v3582_v38, %v3094_v16 }
 0x309   : > { %v3596_v59 = vsel %vm2046_vm0, %v3580_v34, %v3092_v50 }
 0x30b   : > { %v3230_v3 = vpop.permute.xlu1 %3229 }
 0x30c   : > { %v3228_v28 = vpop.permute.xlu0 %3227  ;;  %v3614_v24 = vsel %vm2067_vm1, %v3598_v6, %v3230_v3 }
 0x30d   : > { %v3612_v53 = vsel %vm2067_vm1, %v3596_v59, %v3228_v28 }
 0x30f   : > { %v3294_v10 = vpop.permute.xlu1 %3293 }
 0x310   : > { %v3292_v27 = vpop.permute.xlu0 %3291  ;;  %v3630_v13 = vsel %vm2088_vm8, %v3614_v24, %v3294_v10 }
 0x311   : > { %v3628_v47 = vsel %vm2088_vm8, %v3612_v53, %v3292_v27 }
 0x313   : > { %v3350_v29 = vpop.permute.xlu1 %3349 }
 0x314   : > { %v3348_v54 = vpop.permute.xlu0 %3347  ;;  %v3646_v8 = vsel %vm2109_vm3, %v3630_v13, %v3350_v29 }
 0x315   : > { %v3644_v43 = vsel %vm2109_vm3, %v3628_v47, %v3348_v54 }
 0x317   : > { %v3486_v7 = vpop.permute.xlu1 %3485 }
 0x318   : > { %v3484_v49 = vpop.permute.xlu0 %3483  ;;  %v3662_v4 = vsel %vm2130_vm10, %v3646_v8, %v3486_v7 }
 0x319   : > { %v3660_v57 = vsel %vm2130_vm10, %v3644_v43, %v3484_v49 }
 0x31b   : > { %v2976_v26 = vpop.permute.xlu1 %2975 }
 0x31c   : > { %v3548_v1 = vpop.permute.xlu0 %3547  ;;  %v3568_v60 = vsel %vm2004_vm14, %v6171_v31, %v2976_v26 }
 0x31d   : > { %v3676_v21 = vsel %vm2151_vm12, %v3660_v57, %v3548_v1 }
 0x31e   : > { %4497 = vmatprep.mubr.msk.bf16.mxu1 %vm2199_vm4, %v3676_v21 }
 0x31f   : > { %v2978_v40 = vpop.permute.xlu1 %2977 }
 0x320   : > { %v3550_v30 = vpop.permute.xlu0 %3549  ;;  %v3570_v61 = vsel %vm2004_vm14, %v6186_v36, %v2978_v40 }
 0x321   : > { %v3678_v18 = vsel %vm2151_vm12, %v3662_v4, %v3550_v30 }
 0x322   : > { %4498 = vmatmul.mubr.msk.bf16.gmra.mrb[8].mxu1 %vm2199_vm4, %v3678_v18  ;;  %v4848_v18 = vmov (!%p4285_p8), 0.0  }
 0x323   : > { %v3042_v20 = vpop.permute.xlu1 %3041 }
 0x324   : > { %v3040_v46 = vpop.permute.xlu0 %3039  ;;  %v3586_v45 = vsel %vm2025_vm15, %v3570_v61, %v3042_v20 }
 0x325   : > { %v3584_v63 = vsel %vm2025_vm15, %v3568_v60, %v3040_v46 }
 0x327   : > { %v3098_v15 = vpop.permute.xlu1 %3097 }
 0x328   : > { %v3096_v19 = vpop.permute.xlu0 %3095  ;;  %v3602_v41 = vsel %vm2046_vm0, %v3586_v45, %v3098_v15 }
 0x329   : > { %v3600_v37 = vsel %vm2046_vm0, %v3584_v63, %v3096_v19 }
 0x32b   : > { %v3234_v55 = vpop.permute.xlu1 %3233 }
 0x32c   : > { %v3232_v39 = vpop.permute.xlu0 %3231  ;;  %v3618_v56 = vsel %vm2067_vm1, %v3602_v41, %v3234_v55 }
 0x32d   : > { %v3616_v35 = vsel %vm2067_vm1, %v3600_v37, %v3232_v39 }
 0x32f   : > { %v3298_v11 = vpop.permute.xlu1 %3297 }
 0x330   : > { %v3296_v9 = vpop.permute.xlu0 %3295  ;;  %v3634_v5 = vsel %vm2088_vm8, %v3618_v56, %v3298_v11 }
 0x331   : > { %v3632_v36 = vsel %vm2088_vm8, %v3616_v35, %v3296_v9 }
 0x333   : > { %v3354_v14 = vpop.permute.xlu1 %3353 }
 0x334   : > { %v3352_v44 = vpop.permute.xlu0 %3351  ;;  %v3650_v31 = vsel %vm2109_vm3, %v3634_v5, %v3354_v14 }
 0x335   : > { %v3648_v22 = vsel %vm2109_vm3, %v3632_v36, %v3352_v44 }
 0x337   : > { %v3490_v2 = vpop.permute.xlu1 %3489 }
 0x338   : > { %v3488_v12 = vpop.permute.xlu0 %3487  ;;  %v3666_v52 = vsel %vm2130_vm10, %v3650_v31, %v3490_v2 }
 0x339   : > { %v3664_v33 = vsel %vm2130_vm10, %v3648_v22, %v3488_v12 }
 0x33b   : > { %v3554_v62 = vpop.permute.xlu1 %3553 }
 0x33c   : > { %v3682_v23 = vsel %vm2151_vm12, %v3666_v52, %v3554_v62  ;;  %v3552_v51 = vpop.permute.xlu0 %3551 }
 0x33d   : > { %v3680_v58 = vsel %vm2151_vm12, %v3664_v33, %v3552_v51 }
 0x33e   : > { %4501 = vmatprep.mubr.msk.bf16.mxu1 %vm2199_vm4, %v3680_v58 }
 0x33f   : > { %4502 = vmatmul.mubr.msk.bf16.gmra.mrb[12].mxu1 %vm2199_vm4, %v3682_v23  ;;  %vm6539_vm4 = vcmask (!%p4285_p8), 24576  }
 0x340   : > { %3830 = vst.msk [vmem:[%s5977_s19] sm:$0x1] (!%p4285_p8), %vm6539_vm4, %v4848_v18 }
 0x3b5   : > { %v4491_v42 = vpop.f32.mrb[0].mxu1 }
 0x3b6   : > { %v3772_v17 = vadd.f32 %v4491_v42, %v4359_v0  ;;  %v3763_v25 = vpop.f32.mrb[1].mxu1 }
 0x3b7   : > { %v3764_v16 = vadd.f32 %v4359_v0, %v3763_v25  ;;  %v4492_v50 = vpop.f32.mrb[2].mxu1 }
 0x3b8   : > { %v3775_v3 = vadd.f32 %v4492_v50, %v4359_v0  ;;  %v3766_v28 = vpop.f32.mrb[3].mxu1 }
 0x3b9   : > { %v3767_v10 = vadd.f32 %v4359_v0, %v3766_v28 }
 0x3d5   : > { %v4495_v27 = vpop.f32.mrb[4].mxu1 }
 0x3d6   : > { %v3788_v29 = vadd.f32 %v4495_v27, %v4359_v0  ;;  %v3779_v54 = vpop.f32.mrb[5].mxu1 }
 0x3d7   : > { %v3780_v48 = vadd.f32 %v4359_v0, %v3779_v54  ;;  %v4496_v34 = vpop.f32.mrb[6].mxu1 }
 0x3d8   : > { %v6323_v7 = vadd.f32 %v4496_v34, %v4359_v0  ;;  %v3782_v59 = vpop.f32.mrb[7].mxu1 }
 0x3d9   : > { %v3783_v49 = vadd.f32 %v4359_v0, %v3782_v59 }
 0x3f5   : > { %v4499_v53 = vpop.f32.mrb[8].mxu1 }
 0x3f6   : > { %v6325_v32 = vadd.f32 %v4499_v53, %v4359_v0  ;;  %v3795_v47 = vpop.f32.mrb[9].mxu1 }
 0x3f7   : > { %v6327_v38 = vadd.f32 %v4359_v0, %v3795_v47  ;;  %v4500_v43 = vpop.f32.mrb[10].mxu1 }
 0x3f8   : > { %v6329_v26 = vadd.f32 %v4500_v43, %v4359_v0  ;;  %v3798_v6 = vpop.f32.mrb[11].mxu1 }
 0x3f9   : > { %v3799_v57 = vadd.f32 %v4359_v0, %v3798_v6 }
 0x410   : > { %3828 = sbr.rel (%p4285_p8) target bundleno = 1047 (0x417), region = 60 }
 0x412   : > { %v4503_v1 = vpop.f32.mrb[12].mxu1 }
 0x413   : > { %v6331_v24 = vadd.f32 %v4503_v1, %v4359_v0  ;;  %v3811_v21 = vpop.f32.mrb[13].mxu1 }
 0x414   : > { %v6333_v13 = vadd.f32 %v4359_v0, %v3811_v21  ;;  %v4504_v8 = vpop.f32.mrb[14].mxu1 }
 0x415   : > { %v6335_v40 = vadd.f32 %v4504_v8, %v4359_v0  ;;  %v3814_v4 = vpop.f32.mrb[15].mxu1 }
 0x416   : > { %v3815_v30 = vadd.f32 %v4359_v0, %v3814_v4 }
 0x417 PF: > { %v3832_v20 = vsel %vm2004_vm14, %v3764_v16, 0.0  ;;  %v3833_v46 = vsel %vm2004_vm14, %v3767_v10, 0.0  ;;  %v3835_v15 = vsel %vm2004_vm14, %v3772_v17, 0.0  ;;  %v3837_v55 = vsel %vm2004_vm14, %v3775_v3, 0.0  ;;  %s4388_s30 = sshll.u32 %s4824_s9, 4  ;;  %s6541_s14 = sand.u32 1, %s4812_s28  }
 0x418   : > { %v3834_v19 = vadd.f32 %v3833_v46, %v3832_v20  ;;  %v3839_v11 = vsel %vm2004_vm14, %v3780_v48, 0.0  ;;  %v3841_v9 = vsel %vm2004_vm14, %v3783_v49, 0.0  ;;  %v3843_v14 = vsel %vm2004_vm14, %v3788_v29, 0.0  ;;  %s6416_s1 = scalar_lea.hbm %s6481_s8, %s4388_s30  ;;  %s3962_s25 = scalar_lea.sflag [#allocation4], %s6541_s14 }
 0x419   : > { %v4417_v44 = vpack.c.bf16 %v3764_v16, %v3764_v16  ;;  %v4418_v61 = vpack.c.bf16 %v3767_v10, %v3767_v10  ;;  %v4419_v45 = vpack.c.bf16 %v3772_v17, %v3772_v17  ;;  %v4420_v63 = vpack.c.bf16 %v3775_v3, %v3775_v3  ;;  %s4849_s9 = smov [#allocation3]  }
 0x41a   : > { %v3836_v39 = vadd.f32 %v3835_v15, %v3834_v19  ;;  %v4421_v41 = vpack.c.bf16 %v3780_v48, %v3780_v48  ;;  %v4422_v2 = vpack.c.bf16 %v3783_v49, %v3783_v49  ;;  %v4423_v37 = vpack.c.bf16 %v3788_v29, %v3788_v29  ;;  %s4746_s16 = sshll.u32 %s4849_s9, 4  ;;  %s4747_s16 = int_to_ptr.vmem [resolvable:$false] %s4746_s16 }
 0x41b   : > { %3936 = vst.msk [vmem:[%s4996_s13] sm:$0xf] %vm548_vm2, %v4417_v44  ;;  %3937 = vst.msk [vmem:[%s4996_s13 + $0x4] sm:$0xf] %vm548_vm2, %v4418_v61  ;;  %v4424_v56 = vpack.c.bf16 %v6323_v7, %v6323_v7  ;;  %v4425_v12 = vpack.c.bf16 %v6327_v38, %v6327_v38  ;;  %v4426_v5 = vpack.c.bf16 %v3799_v57, %v3799_v57  ;;  %v3845_v51 = vsel %vm2004_vm14, %v6323_v7, 0.0  ;;  %s4748_s23 = scalar_lea.vmem %s4747_s16, 32 }
 0x41c   : > { %v3838_v60 = vadd.f32 %v3837_v55, %v3836_v39  ;;  %3938 = vst.msk [vmem:[%s4996_s13 + $0x8] sm:$0xf] %vm548_vm2, %v4419_v45  ;;  %3939 = vst.msk [vmem:[%s4996_s13 + $0xc] sm:$0xf] %vm548_vm2, %v4420_v63  ;;  %v4427_v36 = vpack.c.bf16 %v6325_v32, %v6325_v32  ;;  %v4428_v31 = vpack.c.bf16 %v6329_v26, %v6329_v26  ;;  %v3847_v0 = vsel %vm2004_vm14, %v6327_v38, 0.0 }
 0x41d   : > { %3940 = vst.msk [vmem:[%s4996_s13 + $0x10] sm:$0xf] %vm548_vm2, %v4421_v41  ;;  %3941 = vst.msk [vmem:[%s4996_s13 + $0x14] sm:$0xf] %vm548_vm2, %v4422_v2  ;;  %v4429_v22 = vpack.c.bf16 %v6333_v13, %v6333_v13  ;;  %v4430_v52 = vpack.c.bf16 %v3815_v30, %v3815_v30  ;;  %v4431_v62 = vpack.c.bf16 %v6331_v24, %v6331_v24  ;;  %v3849_v17 = vsel %vm2004_vm14, %v3799_v57, 0.0 }
 0x41e   : > { %v3840_v35 = vadd.f32 %v3839_v11, %v3838_v60  ;;  %3942 = vst.msk [vmem:[%s4996_s13 + $0x18] sm:$0xf] %vm548_vm2, %v4423_v37  ;;  %3943 = vst.msk [vmem:[%s4996_s13 + $0x1c] sm:$0xf] %vm548_vm2, %v4424_v56  ;;  %v4432_v33 = vpack.c.bf16 %v6335_v40, %v6335_v40  ;;  %v3851_v16 = vsel %vm2004_vm14, %v6325_v32, 0.0  ;;  %v3853_v3 = vsel %vm2004_vm14, %v6329_v26, 0.0 }
 0x41f   : > { %3944 = vst.msk [vmem:[%s4996_s13 + $0x20] sm:$0xf] %vm548_vm2, %v4425_v12  ;;  %3945 = vst.msk [vmem:[%s4996_s13 + $0x24] sm:$0xf] %vm548_vm2, %v4426_v5  ;;  %v3855_v10 = vsel %vm2004_vm14, %v6333_v13, 0.0  ;;  %v3857_v29 = vsel %vm2004_vm14, %v3815_v30, 0.0 }
 0x420   : > { %v3842_v23 = vadd.f32 %v3841_v9, %v3840_v35  ;;  %3946 = vst.msk [vmem:[%s4996_s13 + $0x28] sm:$0xf] %vm548_vm2, %v4427_v36  ;;  %3947 = vst.msk [vmem:[%s4996_s13 + $0x2c] sm:$0xf] %vm548_vm2, %v4428_v31  ;;  %v3859_v48 = vsel %vm2004_vm14, %v6331_v24, 0.0  ;;  %v3861_v7 = vsel %vm2004_vm14, %v6335_v40, 0.0 }
 0x421   : > { %3948 = vst.msk [vmem:[%s4996_s13 + $0x30] sm:$0xf] %vm548_vm2, %v4429_v22  ;;  %3949 = vst.msk [vmem:[%s4996_s13 + $0x34] sm:$0xf] %vm548_vm2, %v4430_v52  ;;  %v3831_v26 = vld [vmem:[%s5977_s19] sm:$0x1] }
 0x422   : > { %3950 = vst.msk [vmem:[%s4996_s13 + $0x38] sm:$0xf] %vm548_vm2, %v4431_v62  ;;  %3951 = vst.msk [vmem:[%s4996_s13 + $0x3c] sm:$0xf] %vm548_vm2, %v4432_v33  ;;  %v3844_v58 = vadd.f32 %v3843_v14, %v3842_v23  ;;  %s3978_s13 = sshll.u32 %s5977_s19, 4  ;;  %vm6540_vm2 = vcmask 24576   ;;  %s6418_s13 = int_to_ptr.vmem [resolvable:$true] %s3978_s13 }
 0x423   : > { %s4742_s20 = scalar_lea.vmem %s6418_s13, 16  ;;  %p4749_p0 = scmp.lt.s32.totalorder %s6418_s13, %s4747_s16 }
 0x424   : > { %v3846_v42 = vadd.f32 %v3845_v51, %v3844_v58  ;;  %p4743_p11 = scmp.ne.s32.totalorder %s6418_s13, %s4742_s20  ;;  %p4750_p1 = scmp.lt.s32.totalorder %s4748_s23, %s4742_s20 }
 0x426   : > { %v3848_v25 = vadd.f32 %v3847_v0, %v3846_v42  ;;  %p4744_p12 = pnand %p4743_p11, %p4944_p3  ;;  %p4751_p2 = por %p4750_p1, %p4749_p0 }
 0x428   : > { %v3850_v50 = vadd.f32 %v3849_v17, %v3848_v25  ;;  %p4745_p13 = pneg %p4744_p12 }
 0x42a   : > { %v3852_v28 = vadd.f32 %v3851_v16, %v3850_v50  ;;  %p4752_p4 = pnand %p4751_p2, %p4745_p13 }
 0x42c   : > { %v3854_v27 = vadd.f32 %v3853_v3, %v3852_v28 }
 0x42e   : > { %v3856_v54 = vadd.f32 %v3855_v10, %v3854_v27 }
 0x430   : > { %v3858_v34 = vadd.f32 %v3857_v29, %v3856_v54 }
 0x432   : > { %v3860_v59 = vadd.f32 %v3859_v48, %v3858_v34 }
 0x434   : > { %v3862_v49 = vadd.f32 %v3861_v7, %v3860_v59 }
 0x436   : > { %v3863_v53 = vrot.slane %v3862_v49, 4 }
 0x438   : > { %v3864_v32 = vadd.f32 %v3863_v53, %v3862_v49 }
 0x43a   : > { %v3865_v47 = vrot.slane %v3864_v32, 2 }
 0x43c   : > { %v3866_v38 = vadd.f32 %v3865_v47, %v3864_v32 }
 0x43e   : > { %v3867_v43 = vrot.slane %v3866_v38, 1 }
 0x440   : > { %v3868_v6 = vadd.f32 %v3867_v43, %v3866_v38 }
 0x442   : > { %v3869_v57 = vadd.f32 %v3868_v6, %v3831_v26 }
 0x444   : > { %3871 = vst.msk [vmem:[%s5977_s19] sm:$0x1] %vm6540_vm2, %v3869_v57 }
 0x445   : > { %4755 = shalt.err (!%p4752_p4)
}
 0x446   : > { %s4756_s19 = scalar_lea.hbm %s6416_s1, 16  ;;  %s4760_s30 = scalar_lea.hbm %s6481_s8, 32 }
 0x447   : > { %p4757_p5 = scmp.ne.s32.totalorder %s6416_s1, %s4756_s19  ;;  %p4761_p8 = scmp.lt.u32.totalorder %s6416_s1, %s6481_s8 }
 0x448   : > { %p4762_p10 = scmp.lt.u32.totalorder %s4760_s30, %s4756_s19  ;;  %p4764_p12 = scmp.lt.u32.totalorder %s4756_s19, %s6416_s1 }
 0x449   : > { %p4758_p6 = pnand %p4757_p5, %p4944_p3 }
 0x44a   : > { %p4763_p11 = por %p4762_p10, %p4761_p8 }
 0x44b   : > { %p4759_p7 = pneg %p4758_p6 }
 0x44c   : > { %p4765_p13 = por %p4764_p12, %p4763_p11 }
 0x44e   : > { %p4766_p0 = pnand %p4765_p13, %p4759_p7 }
 0x450   : > { %4769 = shalt.err (!%p4766_p0)
}
 0x451   : > { %4507 = dma.vmem_to_hbm [thread:$0]  (%p4944_p3), %s6418_s13, 16, %s6416_s1, %s3962_s25  }
 0x452 PF: > { %p4513_p1 = scmp.ge.s32.totalorder %s4836_s12, 2  ;;  %s4002_s14 = sand.u32 1, %s4808_s27  }
 0x453   : > { %s4003_s20 = scalar_lea.sflag [#allocation4], %s4002_s14 }
 0x454   : > { %p4510_p2 = pnand %p4513_p1, %p4954_p9 }
 0x456   : > { %4803 = dma.done.wait (!%p4510_p2), %s4003_s20, 16  }
 0x457   : > { %4805 = vsyncadd (!%p4510_p2), %s4003_s20, 4294967280  ;;  %s22_s12 = sadd.s32 1, %s4836_s12   ;;  %s6542_s17 = sld [smem:[#allocation6_spill]] }
 0x458   : > { %p19_p4 = scmp.ge.s32.totalorder %s22_s12, 6   ;;  %s6543_s27 = smov %s4812_s28 }
 0x459   : > { %s6544_s28 = smov %s4816_s29  ;;  %s6545_s29 = smov %s4962_s21 }
 0x45a   : > { %s6546_s30 = smov %s4828_s10  ;;  %s6547_s9 = smov %s4832_s11 }
 0x45b   : > { %s6548_s10 = smov %s6551_s15  ;;  %21 = sbr.rel (!%p19_p4) target bundleno = 8 (0x8), region = 117 }
 0x45d   : > { %s6549_s11 = smov %s6542_s17 }
 0x462   :  { %4007 = vsyncpa [#allocation4], 1 }
 0x463   :  { %4009 = vsyncpa [#allocation4 + $0x1], 1 }

</bundles_post_ra>
